<compile_context>
chip_gen: v5e
topology: v5e:2x2
jax: 0.10.0
libtpu: 0.0.40
codegen_flags: <defaults>
</compile_context>

<pallas_src>
import functools

import numpy as np

import jax
import jax.numpy as jnp
from jax.experimental import pallas as pl
from jax.experimental.pallas import tpu as pltpu


# ---------------------------------------------------------------------------
# Fused kernel: whole Critic forward for one batch tile of `tb` images
# ---------------------------------------------------------------------------
def _shift_rows(a, k):
    """out[i] = a[(i + k) % n] via an XLU sublane rotate (co-issues with MXU).

    The circularly wrapped rows only ever land in per-sample tail positions
    that are never read back, so the wrap-around is harmless."""
    if k == 0:
        return a
    return pltpu.roll(a, a.shape[0] - k, axis=0)


def _critic_kernel(tb, x_ref, u_ref, t1_ref, t2_ref, cb1_ref, cb2_ref,
                   w1_ref, b1_ref, w2a_ref, w2b_ref, b2_ref, w3_ref, b3_ref,
                   o_ref, s1_ref, s2_ref):
    """Per-tile layouts (s = sample in tile, all f32):
       x_ref : (28*tb, 128)  image rows; lanes 0..27 = columns, rest zero
       t1    : (640, 256)    conv1 Toeplitz; row = ki*128 + (2q+dj+kj),
                             col = dj*128 + q*10 + oc
       t2    : (640, 256)    conv2 Toeplitz; row = ki*128 + (2q2+dj+kj)*10 + c,
                             col = dj*128 + q2*20 + od
       cb1/cb2: (1, 128)     conv biases on the (pooled-col, channel) lanes
       w1    : (512, 128)    fc1 with NCHW flatten folded in, 4 slabs of 128
       w2a/w2b/b2, w3/b3     fc2 split-weight (cat with u), fc3 row
       o_ref : (tb, 128)     Q broadcast across lanes (unmasked stores)
       s1/s2 : VMEM scratch for strided (stride-2 / stride-14) row selection
    """
    f32 = jnp.float32
    n2 = 14 * tb

    # ---------------- conv1 ----------------
    x = x_ref[...]                                                   # (28*tb, 128)
    # 5-row window, lane-tile aligned concat (pure vreg placement)
    win1 = jnp.concatenate([_shift_rows(x, k) for k in range(5)], axis=1)   # (28*tb, 640)
    z1 = jnp.dot(win1, t1_ref[...], preferred_element_type=f32)     # (28*tb, 256)
    # 2x2 max pool: column parity lives in the two 128-lane halves,
    # row pairs via a row-roll, stride-2 row pick via strided scratch read.
    y1 = jnp.maximum(z1[:, 0:128], z1[:, 128:256])                   # (28*tb, 128)
    y1 = jnp.maximum(y1, _shift_rows(y1, 1))
    s1_ref[...] = y1
    p1 = jnp.maximum(s1_ref[pl.ds(0, n2, stride=2), :] + cb1_ref[...], 0.0)   # (14*tb, 128)

    # ---------------- conv2 ----------------
    win2 = jnp.concatenate([_shift_rows(p1, k) for k in range(5)], axis=1)  # (14*tb, 640)
    z2 = jnp.dot(win2, t2_ref[...], preferred_element_type=f32)     # (14*tb, 256)
    y2 = jnp.maximum(z2[:, 0:128], z2[:, 128:256])                   # (14*tb, 128)
    y2 = jnp.maximum(y2, _shift_rows(y2, 1))
    s2_ref[...] = y2

    # ---------------- fc1 (flatten folded into 4 weight slabs) ----------------
    h1 = jnp.zeros((tb, 128), f32)
    for p2 in range(4):
        # rows s*14 + 2*p2 for all samples s: one strided read per pooled row
        a_p2 = jnp.maximum(
            s2_ref[pl.ds(2 * p2, tb, stride=14), :] + cb2_ref[...], 0.0)   # (tb, 128)
        h1 = h1 + jnp.dot(a_p2, w1_ref[p2 * 128:(p2 + 1) * 128, :],
                          preferred_element_type=f32)
    h1 = jnp.maximum(h1 + b1_ref[...], 0.0)                          # (tb, 128)

    # ---------------- fc2 / fc3 ----------------
    # torch.cat([h1, u], 1) @ W2.T == h1 @ W2a + u * w2b
    h2 = jnp.maximum(jnp.dot(h1, w2a_ref[...], preferred_element_type=f32)
                     + u_ref[...] * w2b_ref[...] + b2_ref[...], 0.0)  # (tb, 128)
    h3 = jnp.sum(h2 * w3_ref[...], axis=1, keepdims=True) + b3_ref[...]  # (tb, 1)
    # lane-dense output: broadcast Q across 128 lanes -> unmasked full stores
    o_ref[...] = jnp.broadcast_to(jnp.maximum(h3, 0.0), (tb, 128))


# ---------------------------------------------------------------------------
# One-off weight preparation (hoisted out of the per-call path; pure numpy)
# ---------------------------------------------------------------------------
def build_critic_mats(params):
    cw1 = np.asarray(params["cw1"], np.float32)   # (10, 1, 5, 5)
    cb1 = np.asarray(params["cb1"], np.float32)   # (10,)
    cw2 = np.asarray(params["cw2"], np.float32)   # (20, 10, 5, 5)
    cb2 = np.asarray(params["cb2"], np.float32)   # (20,)
    fw1 = np.asarray(params["fw1"], np.float32)   # (100, 320)
    fb1 = np.asarray(params["fb1"], np.float32)   # (100,)
    fw2 = np.asarray(params["fw2"], np.float32)   # (50, 101)
    fb2 = np.asarray(params["fb2"], np.float32)   # (50,)
    fw3 = np.asarray(params["fw3"], np.float32)   # (1, 50)
    fb3 = np.asarray(params["fb3"], np.float32)   # (1,)

    # conv1 Toeplitz T1 (640, 256)
    t1 = np.zeros((640, 256), np.float32)
    ki, kj, dj, q, oc = np.meshgrid(np.arange(5), np.arange(5), np.arange(2),
                                    np.arange(12), np.arange(10), indexing="ij")
    t1[(ki * 128 + 2 * q + dj + kj).ravel(),
       (dj * 128 + q * 10 + oc).ravel()] = cw1[oc.ravel(), 0, ki.ravel(), kj.ravel()]

    # conv2 Toeplitz T2 (640, 256)
    t2 = np.zeros((640, 256), np.float32)
    ki, kj, dj, q2, od, c = np.meshgrid(np.arange(5), np.arange(5), np.arange(2),
                                        np.arange(4), np.arange(20), np.arange(10),
                                        indexing="ij")
    t2[(ki * 128 + (2 * q2 + dj + kj) * 10 + c).ravel(),
       (dj * 128 + q2 * 20 + od).ravel()] = cw2[od.ravel(), c.ravel(),
                                                ki.ravel(), kj.ravel()]

    # conv biases broadcast over the (pooled-col, channel) lane layout
    cb1row = np.zeros((1, 128), np.float32)
    cb1row[0, :120] = np.tile(cb1, 12)                   # lane = q*10 + oc
    cb2row = np.zeros((1, 128), np.float32)
    cb2row[0, :80] = np.tile(cb2, 4)                     # lane = q2*20 + od

    # fc1 with the torch NCHW flatten (feature = od*16 + p2*4 + q2) folded in,
    # stored as 4 stacked 128-row slabs (rows = p2*128 + q2*20 + od)
    w1 = np.zeros((512, 128), np.float32)
    p2g, q2g, odg = np.meshgrid(np.arange(4), np.arange(4), np.arange(20),
                                indexing="ij")
    rows = (p2g * 128 + q2g * 20 + odg).ravel()
    feats = (odg * 16 + p2g * 4 + q2g).ravel()
    w1[rows[:, None], np.arange(100)[None, :]] = fw1[:, feats].T
    b1row = np.zeros((1, 128), np.float32)
    b1row[0, :100] = fb1

    # fc2 split weights (cat([h1, u]))
    w2a = np.zeros((128, 128), np.float32)
    w2a[:100, :50] = fw2[:, :100].T
    w2b = np.zeros((1, 128), np.float32)
    w2b[0, :50] = fw2[:, 100]
    b2row = np.zeros((1, 128), np.float32)
    b2row[0, :50] = fb2

    # fc3
    w3row = np.zeros((1, 128), np.float32)
    w3row[0, :50] = fw3[0]
    b3s = fb3.reshape(1, 1).astype(np.float32)

    mats = (t1, t2, cb1row, cb2row, w1, b1row, w2a, w2b, b2row, w3row, b3s)
    return tuple(jnp.asarray(m) for m in mats)


# ---------------------------------------------------------------------------
# Wrapper: one fused, batch-gridded pallas_call
# ---------------------------------------------------------------------------
def _pick_tiling(batch):
    # tb: multiple of 8, capped at 32; grid: even number of tiles (>= 2) so the
    # ("parallel",) batch axis can split across v7x's two TensorCores.
    tb = min(32, max(8, 8 * ((batch + 15) // 16)))
    n_tiles = max(2, -(-batch // tb))
    n_tiles += n_tiles % 2
    return tb, n_tiles


def critic_apply(mats, x, u):
    """x: (B, 784) (or any (B, 1, 28, 28)-compatible) state, u: (B, 1) action."""
    B = x.shape[0]
    x = x.reshape(B, -1).astype(jnp.float32)
    u = u.reshape(B, 1).astype(jnp.float32)
    tb, n_tiles = _pick_tiling(B)
    bp = tb * n_tiles

    xp = jnp.zeros((bp, 784), jnp.float32).at[:B].set(x)
    up = jnp.zeros((bp, 1), jnp.float32).at[:B].set(u)
    # raw image rows, zero-padded to a 128-lane row so all in-kernel window
    # concatenations stay lane-tile aligned
    x2d = jnp.zeros((bp * 28, 128), jnp.float32).at[:, :28].set(xp.reshape(bp * 28, 28))

    kernel = functools.partial(_critic_kernel, tb)
    in_specs = [
        pl.BlockSpec((28 * tb, 128), lambda i: (i, 0)),   # image rows (batch tiled)
        pl.BlockSpec((tb, 1), lambda i: (i, 0)),          # action (batch tiled)
    ] + [pl.BlockSpec(m.shape, lambda i: (0, 0)) for m in mats]   # weights: resident

    flops_tile = 2 * (28 * tb * 640 * 256 + 14 * tb * 640 * 256
                      + 5 * tb * 128 * 128) + 10 * tb * 128
    bytes_acc = 4 * (bp * 28 * 128 + bp + sum(int(m.size) for m in mats) + bp * 128)

    out = pl.pallas_call(
        kernel,
        out_shape=jax.ShapeDtypeStruct((bp, 128), jnp.float32),
        grid=(n_tiles,),
        in_specs=in_specs,
        out_specs=pl.BlockSpec((tb, 128), lambda i: (i, 0)),
        scratch_shapes=[pltpu.VMEM((28 * tb, 128), jnp.float32),
                        pltpu.VMEM((14 * tb, 128), jnp.float32)],
        compiler_params=pltpu.CompilerParams(
            dimension_semantics=("parallel",),
            vmem_limit_bytes=32 * 1024 * 1024),
        cost_estimate=pl.CostEstimate(flops=int(n_tiles * flops_tile),
                                      transcendentals=0,
                                      bytes_accessed=int(bytes_acc)),
    )(x2d, up, *mats)

    q = out[:B, 0:1]
    # forward() uses the same conv1/conv2/fc1/fc2/fc3 for both branches -> x1 == x2
    return q, q


def make_critic_forward(params):
    """Build the constant layout-folded weight matrices ONCE and return a
    jitted forward(x, u) -> (q1, q2) whose per-call path is just the kernel."""
    mats = build_critic_mats(params)
    apply_jit = jax.jit(critic_apply)

    def forward(x, u):
        return apply_jit(mats, x, u)

    return forward


# ---------------------------------------------------------------------------
# Deterministic parameter init (shapes from Critic.__init__)
# ---------------------------------------------------------------------------
def init_params(key):
    ks = jax.random.split(key, 10)
    s = 0.1
    return {
        "cw1": jax.random.normal(ks[0], (10, 1, 5, 5), jnp.float32) * s,   # conv1
        "cb1": jax.random.normal(ks[1], (10,), jnp.float32) * s,
        "cw2": jax.random.normal(ks[2], (20, 10, 5, 5), jnp.float32) * s,  # conv2
        "cb2": jax.random.normal(ks[3], (20,), jnp.float32) * s,
        "fw1": jax.random.normal(ks[4], (100, 320), jnp.float32) * s,      # fc1
        "fb1": jax.random.normal(ks[5], (100,), jnp.float32) * s,
        "fw2": jax.random.normal(ks[6], (50, 101), jnp.float32) * s,       # fc2
        "fb2": jax.random.normal(ks[7], (50,), jnp.float32) * s,
        "fw3": jax.random.normal(ks[8], (1, 50), jnp.float32) * s,         # fc3
        "fb3": jax.random.normal(ks[9], (1,), jnp.float32) * s,
    }


# ---------------------------------------------------------------------------
# Pure-JAX reference (sanity check)
# ---------------------------------------------------------------------------
def ref_forward(params, x, u):
    B = x.shape[0]
    hp = jax.lax.Precision.HIGHEST
    xi = x.reshape(B, 1, 28, 28)
    y = jax.lax.conv_general_dilated(xi, params["cw1"], (1, 1), "VALID",
                                     dimension_numbers=("NCHW", "OIHW", "NCHW"),
                                     precision=hp) + params["cb1"][None, :, None, None]
    y = jax.lax.reduce_window(y, -jnp.inf, jax.lax.max, (1, 1, 2, 2), (1, 1, 2, 2), "VALID")
    y = jnp.maximum(y, 0.0)
    y = jax.lax.conv_general_dilated(y, params["cw2"], (1, 1), "VALID",
                                     dimension_numbers=("NCHW", "OIHW", "NCHW"),
                                     precision=hp) + params["cb2"][None, :, None, None]
    y = jax.lax.reduce_window(y, -jnp.inf, jax.lax.max, (1, 1, 2, 2), (1, 1, 2, 2), "VALID")
    y = jnp.maximum(y, 0.0)
    y = y.reshape(B, 320)
    h = jnp.maximum(jnp.dot(y, params["fw1"].T, precision=hp) + params["fb1"], 0.0)
    hu = jnp.concatenate([h, u], axis=1)
    h = jnp.maximum(jnp.dot(hu, params["fw2"].T, precision=hp) + params["fb2"], 0.0)
    h = jnp.maximum(jnp.dot(h, params["fw3"].T, precision=hp) + params["fb3"], 0.0)
    return h


if __name__ == "__main__":
    key = jax.random.PRNGKey(0)
    kp, kx, ku = jax.random.split(key, 3)
    params = init_params(kp)

    B = 2
    x = jax.random.normal(kx, (B, 784), jnp.float32)   # state -> viewed as (B,1,28,28)
    u = jax.random.normal(ku, (B, 1), jnp.float32)     # action_dim = 1 (fc2 expects 100+1)

    fwd = make_critic_forward(params)                  # weights folded ONCE here
    q1, q2 = fwd(x, u)
    q1 = jax.block_until_ready(q1)
    q2 = jax.block_until_ready(q2)

    ref = ref_forward(params, x, u)
    assert q1.shape == (B, 1) and q2.shape == (B, 1)
    assert jnp.allclose(q1, ref, atol=1e-3, rtol=1e-3), (q1, ref)
    assert jnp.allclose(q2, ref, atol=1e-3, rtol=1e-3), (q2, ref)

    print("KERNEL_OK")
</pallas_src>

<mosaic_0001>
module attributes {stable_mosaic.version = 11 : i64} {
  func.func @_critic_kernel(%arg0: i32, %arg1: memref<224x128xf32, #tpu.memory_space<vmem>>, %arg2: memref<8x1xf32, #tpu.memory_space<vmem>>, %arg3: memref<640x256xf32, #tpu.memory_space<vmem>>, %arg4: memref<640x256xf32, #tpu.memory_space<vmem>>, %arg5: memref<1x128xf32, #tpu.memory_space<vmem>>, %arg6: memref<1x128xf32, #tpu.memory_space<vmem>>, %arg7: memref<512x128xf32, #tpu.memory_space<vmem>>, %arg8: memref<1x128xf32, #tpu.memory_space<vmem>>, %arg9: memref<128x128xf32, #tpu.memory_space<vmem>>, %arg10: memref<1x128xf32, #tpu.memory_space<vmem>>, %arg11: memref<1x128xf32, #tpu.memory_space<vmem>>, %arg12: memref<1x128xf32, #tpu.memory_space<vmem>>, %arg13: memref<1x1xf32, #tpu.memory_space<vmem>>, %arg14: memref<8x128xf32, #tpu.memory_space<vmem>>, %arg15: memref<224x128xf32, #tpu.memory_space<vmem>>, %arg16: memref<112x128xf32, #tpu.memory_space<vmem>>) attributes {dimension_semantics = [#tpu.dimension_semantics<parallel>], iteration_bounds = array<i64: 2>, scalar_prefetch = 0 : i64, scratch_operands = 2 : i64, tpu.core_type = #tpu.core_type<tc>, window_params = [{transform_indices = @transform_0, window_bounds = array<i64: 224, 128>}, {transform_indices = @transform_1, window_bounds = array<i64: 8, 1>}, {pipeline_mode = #tpu.pipeline_mode<synchronous>, transform_indices = @transform_2, window_bounds = array<i64: 640, 256>}, {pipeline_mode = #tpu.pipeline_mode<synchronous>, transform_indices = @transform_3, window_bounds = array<i64: 640, 256>}, {pipeline_mode = #tpu.pipeline_mode<synchronous>, transform_indices = @transform_4, window_bounds = array<i64: 1, 128>}, {pipeline_mode = #tpu.pipeline_mode<synchronous>, transform_indices = @transform_5, window_bounds = array<i64: 1, 128>}, {pipeline_mode = #tpu.pipeline_mode<synchronous>, transform_indices = @transform_6, window_bounds = array<i64: 512, 128>}, {pipeline_mode = #tpu.pipeline_mode<synchronous>, transform_indices = @transform_7, window_bounds = array<i64: 1, 128>}, {pipeline_mode = #tpu.pipeline_mode<synchronous>, transform_indices = @transform_8, window_bounds = array<i64: 128, 128>}, {pipeline_mode = #tpu.pipeline_mode<synchronous>, transform_indices = @transform_9, window_bounds = array<i64: 1, 128>}, {pipeline_mode = #tpu.pipeline_mode<synchronous>, transform_indices = @transform_10, window_bounds = array<i64: 1, 128>}, {pipeline_mode = #tpu.pipeline_mode<synchronous>, transform_indices = @transform_11, window_bounds = array<i64: 1, 128>}, {pipeline_mode = #tpu.pipeline_mode<synchronous>, transform_indices = @transform_12, window_bounds = array<i64: 1, 1>}, {transform_indices = @transform_13, window_bounds = array<i64: 8, 128>}]} {
    %c0 = arith.constant 0 : index
    %c0_0 = arith.constant 0 : index
    %0 = vector.load %arg1[%c0, %c0_0] : memref<224x128xf32, #tpu.memory_space<vmem>>, vector<224x128xf32>
    %c223_i32 = arith.constant 223 : i32
    %1 = tpu.dynamic_rotate %0 by %c223_i32 dim 0 : vector<224x128xf32>, i32 -> vector<224x128xf32>
    %c222_i32 = arith.constant 222 : i32
    %2 = tpu.dynamic_rotate %0 by %c222_i32 dim 0 : vector<224x128xf32>, i32 -> vector<224x128xf32>
    %c221_i32 = arith.constant 221 : i32
    %3 = tpu.dynamic_rotate %0 by %c221_i32 dim 0 : vector<224x128xf32>, i32 -> vector<224x128xf32>
    %c220_i32 = arith.constant 220 : i32
    %4 = tpu.dynamic_rotate %0 by %c220_i32 dim 0 : vector<224x128xf32>, i32 -> vector<224x128xf32>
    %5 = tpu.concatenate %0, %1, %2, %3, %4 in 1 : vector<224x128xf32>, vector<224x128xf32>, vector<224x128xf32>, vector<224x128xf32>, vector<224x128xf32> -> vector<224x640xf32>
    %c0_1 = arith.constant 0 : index
    %c0_2 = arith.constant 0 : index
    %6 = vector.load %arg3[%c0_1, %c0_2] : memref<640x256xf32, #tpu.memory_space<vmem>>, vector<640x256xf32>
    %cst = arith.constant dense<0.000000e+00> : vector<224x256xf32>
    %7 = tpu.matmul %5, %6, %cst {dimension_numbers = #tpu.dot_dimension_numbers<[1], [0], [0], [1], [0, 0, 1, 1], [], []>} : vector<224x640xf32>, vector<640x256xf32>, vector<224x256xf32> -> vector<224x256xf32>
    %8 = vector.extract_strided_slice %7 {offsets = [0, 0], sizes = [224, 128], strides = [1, 1]} : vector<224x256xf32> to vector<224x128xf32>
    %9 = vector.extract_strided_slice %7 {offsets = [0, 128], sizes = [224, 128], strides = [1, 1]} : vector<224x256xf32> to vector<224x128xf32>
    %10 = arith.maximumf %8, %9 : vector<224x128xf32>
    %c223_i32_3 = arith.constant 223 : i32
    %11 = tpu.dynamic_rotate %10 by %c223_i32_3 dim 0 : vector<224x128xf32>, i32 -> vector<224x128xf32>
    %12 = arith.maximumf %10, %11 : vector<224x128xf32>
    %c0_4 = arith.constant 0 : index
    %c0_5 = arith.constant 0 : index
    %13 = vector.load %arg15[%c0_4, %c0_5] : memref<224x128xf32, #tpu.memory_space<vmem>>, vector<224x128xf32>
    tpu.vector_store %arg15[%c0_4, %c0_5], %12 {strides = array<i32>} : memref<224x128xf32, #tpu.memory_space<vmem>>, vector<224x128xf32>,
    %c0_6 = arith.constant 0 : index
    %c0_7 = arith.constant 0 : index
    %14 = tpu.strided_load %arg15[%c0_6, %c0_7] {strides = array<i32: 2, 1>} : memref<224x128xf32, #tpu.memory_space<vmem>>, vector<112x128xf32>
    %c0_8 = arith.constant 0 : index
    %c0_9 = arith.constant 0 : index
    %15 = vector.load %arg5[%c0_8, %c0_9] : memref<1x128xf32, #tpu.memory_space<vmem>>, vector<1x128xf32>
    %16 = vector.broadcast %15 : vector<1x128xf32> to vector<112x128xf32>
    %17 = arith.addf %14, %16 : vector<112x128xf32>
    %cst_10 = arith.constant 0.000000e+00 : f32
    %18 = vector.broadcast %cst_10 : f32 to vector<112x128xf32>
    %19 = arith.maximumf %17, %18 : vector<112x128xf32>
    %c111_i32 = arith.constant 111 : i32
    %20 = tpu.dynamic_rotate %19 by %c111_i32 dim 0 : vector<112x128xf32>, i32 -> vector<112x128xf32>
    %c110_i32 = arith.constant 110 : i32
    %21 = tpu.dynamic_rotate %19 by %c110_i32 dim 0 : vector<112x128xf32>, i32 -> vector<112x128xf32>
    %c109_i32 = arith.constant 109 : i32
    %22 = tpu.dynamic_rotate %19 by %c109_i32 dim 0 : vector<112x128xf32>, i32 -> vector<112x128xf32>
    %c108_i32 = arith.constant 108 : i32
    %23 = tpu.dynamic_rotate %19 by %c108_i32 dim 0 : vector<112x128xf32>, i32 -> vector<112x128xf32>
    %24 = tpu.concatenate %19, %20, %21, %22, %23 in 1 : vector<112x128xf32>, vector<112x128xf32>, vector<112x128xf32>, vector<112x128xf32>, vector<112x128xf32> -> vector<112x640xf32>
    %c0_11 = arith.constant 0 : index
    %c0_12 = arith.constant 0 : index
    %25 = vector.load %arg4[%c0_11, %c0_12] : memref<640x256xf32, #tpu.memory_space<vmem>>, vector<640x256xf32>
    %cst_13 = arith.constant dense<0.000000e+00> : vector<112x256xf32>
    %26 = tpu.matmul %24, %25, %cst_13 {dimension_numbers = #tpu.dot_dimension_numbers<[1], [0], [0], [1], [0, 0, 1, 1], [], []>} : vector<112x640xf32>, vector<640x256xf32>, vector<112x256xf32> -> vector<112x256xf32>
    %27 = vector.extract_strided_slice %26 {offsets = [0, 0], sizes = [112, 128], strides = [1, 1]} : vector<112x256xf32> to vector<112x128xf32>
    %28 = vector.extract_strided_slice %26 {offsets = [0, 128], sizes = [112, 128], strides = [1, 1]} : vector<112x256xf32> to vector<112x128xf32>
    %29 = arith.maximumf %27, %28 : vector<112x128xf32>
    %c111_i32_14 = arith.constant 111 : i32
    %30 = tpu.dynamic_rotate %29 by %c111_i32_14 dim 0 : vector<112x128xf32>, i32 -> vector<112x128xf32>
    %31 = arith.maximumf %29, %30 : vector<112x128xf32>
    %c0_15 = arith.constant 0 : index
    %c0_16 = arith.constant 0 : index
    %32 = vector.load %arg16[%c0_15, %c0_16] : memref<112x128xf32, #tpu.memory_space<vmem>>, vector<112x128xf32>
    tpu.vector_store %arg16[%c0_15, %c0_16], %31 {strides = array<i32>} : memref<112x128xf32, #tpu.memory_space<vmem>>, vector<112x128xf32>,
    %cst_17 = arith.constant 0.000000e+00 : f32
    %33 = vector.broadcast %cst_17 : f32 to vector<8x128xf32>
    %c0_18 = arith.constant 0 : index
    %c0_19 = arith.constant 0 : index
    %34 = tpu.strided_load %arg16[%c0_18, %c0_19] {strides = array<i32: 14, 1>} : memref<112x128xf32, #tpu.memory_space<vmem>>, vector<8x128xf32>
    %c0_20 = arith.constant 0 : index
    %c0_21 = arith.constant 0 : index
    %35 = vector.load %arg6[%c0_20, %c0_21] : memref<1x128xf32, #tpu.memory_space<vmem>>, vector<1x128xf32>
    %36 = vector.broadcast %35 : vector<1x128xf32> to vector<8x128xf32>
    %37 = arith.addf %34, %36 : vector<8x128xf32>
    %cst_22 = arith.constant 0.000000e+00 : f32
    %38 = vector.broadcast %cst_22 : f32 to vector<8x128xf32>
    %39 = arith.maximumf %37, %38 : vector<8x128xf32>
    %c0_23 = arith.constant 0 : index
    %c0_24 = arith.constant 0 : index
    %40 = vector.load %arg7[%c0_23, %c0_24] : memref<512x128xf32, #tpu.memory_space<vmem>>, vector<128x128xf32>
    %cst_25 = arith.constant dense<0.000000e+00> : vector<8x128xf32>
    %41 = tpu.matmul %39, %40, %cst_25 {dimension_numbers = #tpu.dot_dimension_numbers<[1], [0], [0], [1], [0, 0, 1, 1], [], []>} : vector<8x128xf32>, vector<128x128xf32>, vector<8x128xf32> -> vector<8x128xf32>
    %42 = arith.addf %33, %41 : vector<8x128xf32>
    %c2 = arith.constant 2 : index
    %c0_26 = arith.constant 0 : index
    %43 = tpu.strided_load %arg16[%c2, %c0_26] {strides = array<i32: 14, 1>} : memref<112x128xf32, #tpu.memory_space<vmem>>, vector<8x128xf32>
    %c0_27 = arith.constant 0 : index
    %c0_28 = arith.constant 0 : index
    %44 = vector.load %arg6[%c0_27, %c0_28] : memref<1x128xf32, #tpu.memory_space<vmem>>, vector<1x128xf32>
    %45 = vector.broadcast %44 : vector<1x128xf32> to vector<8x128xf32>
    %46 = arith.addf %43, %45 : vector<8x128xf32>
    %cst_29 = arith.constant 0.000000e+00 : f32
    %47 = vector.broadcast %cst_29 : f32 to vector<8x128xf32>
    %48 = arith.maximumf %46, %47 : vector<8x128xf32>
    %c128 = arith.constant 128 : index
    %c0_30 = arith.constant 0 : index
    %49 = vector.load %arg7[%c128, %c0_30] : memref<512x128xf32, #tpu.memory_space<vmem>>, vector<128x128xf32>
    %cst_31 = arith.constant dense<0.000000e+00> : vector<8x128xf32>
    %50 = tpu.matmul %48, %49, %cst_31 {dimension_numbers = #tpu.dot_dimension_numbers<[1], [0], [0], [1], [0, 0, 1, 1], [], []>} : vector<8x128xf32>, vector<128x128xf32>, vector<8x128xf32> -> vector<8x128xf32>
    %51 = arith.addf %42, %50 : vector<8x128xf32>
    %c4 = arith.constant 4 : index
    %c0_32 = arith.constant 0 : index
    %52 = tpu.strided_load %arg16[%c4, %c0_32] {strides = array<i32: 14, 1>} : memref<112x128xf32, #tpu.memory_space<vmem>>, vector<8x128xf32>
    %c0_33 = arith.constant 0 : index
    %c0_34 = arith.constant 0 : index
    %53 = vector.load %arg6[%c0_33, %c0_34] : memref<1x128xf32, #tpu.memory_space<vmem>>, vector<1x128xf32>
    %54 = vector.broadcast %53 : vector<1x128xf32> to vector<8x128xf32>
    %55 = arith.addf %52, %54 : vector<8x128xf32>
    %cst_35 = arith.constant 0.000000e+00 : f32
    %56 = vector.broadcast %cst_35 : f32 to vector<8x128xf32>
    %57 = arith.maximumf %55, %56 : vector<8x128xf32>
    %c256 = arith.constant 256 : index
    %c0_36 = arith.constant 0 : index
    %58 = vector.load %arg7[%c256, %c0_36] : memref<512x128xf32, #tpu.memory_space<vmem>>, vector<128x128xf32>
    %cst_37 = arith.constant dense<0.000000e+00> : vector<8x128xf32>
    %59 = tpu.matmul %57, %58, %cst_37 {dimension_numbers = #tpu.dot_dimension_numbers<[1], [0], [0], [1], [0, 0, 1, 1], [], []>} : vector<8x128xf32>, vector<128x128xf32>, vector<8x128xf32> -> vector<8x128xf32>
    %60 = arith.addf %51, %59 : vector<8x128xf32>
    %c6 = arith.constant 6 : index
    %c0_38 = arith.constant 0 : index
    %61 = tpu.strided_load %arg16[%c6, %c0_38] {strides = array<i32: 14, 1>} : memref<112x128xf32, #tpu.memory_space<vmem>>, vector<8x128xf32>
    %c0_39 = arith.constant 0 : index
    %c0_40 = arith.constant 0 : index
    %62 = vector.load %arg6[%c0_39, %c0_40] : memref<1x128xf32, #tpu.memory_space<vmem>>, vector<1x128xf32>
    %63 = vector.broadcast %62 : vector<1x128xf32> to vector<8x128xf32>
    %64 = arith.addf %61, %63 : vector<8x128xf32>
    %cst_41 = arith.constant 0.000000e+00 : f32
    %65 = vector.broadcast %cst_41 : f32 to vector<8x128xf32>
    %66 = arith.maximumf %64, %65 : vector<8x128xf32>
    %c384 = arith.constant 384 : index
    %c0_42 = arith.constant 0 : index
    %67 = vector.load %arg7[%c384, %c0_42] : memref<512x128xf32, #tpu.memory_space<vmem>>, vector<128x128xf32>
    %cst_43 = arith.constant dense<0.000000e+00> : vector<8x128xf32>
    %68 = tpu.matmul %66, %67, %cst_43 {dimension_numbers = #tpu.dot_dimension_numbers<[1], [0], [0], [1], [0, 0, 1, 1], [], []>} : vector<8x128xf32>, vector<128x128xf32>, vector<8x128xf32> -> vector<8x128xf32>
    %69 = arith.addf %60, %68 : vector<8x128xf32>
    %c0_44 = arith.constant 0 : index
    %c0_45 = arith.constant 0 : index
    %70 = vector.load %arg8[%c0_44, %c0_45] : memref<1x128xf32, #tpu.memory_space<vmem>>, vector<1x128xf32>
    %71 = vector.broadcast %70 : vector<1x128xf32> to vector<8x128xf32>
    %72 = arith.addf %69, %71 : vector<8x128xf32>
    %cst_46 = arith.constant 0.000000e+00 : f32
    %73 = vector.broadcast %cst_46 : f32 to vector<8x128xf32>
    %74 = arith.maximumf %72, %73 : vector<8x128xf32>
    %c0_47 = arith.constant 0 : index
    %c0_48 = arith.constant 0 : index
    %75 = vector.load %arg9[%c0_47, %c0_48] : memref<128x128xf32, #tpu.memory_space<vmem>>, vector<128x128xf32>
    %cst_49 = arith.constant dense<0.000000e+00> : vector<8x128xf32>
    %76 = tpu.matmul %74, %75, %cst_49 {dimension_numbers = #tpu.dot_dimension_numbers<[1], [0], [0], [1], [0, 0, 1, 1], [], []>} : vector<8x128xf32>, vector<128x128xf32>, vector<8x128xf32> -> vector<8x128xf32>
    %c0_50 = arith.constant 0 : index
    %c0_51 = arith.constant 0 : index
    %77 = vector.load %arg2[%c0_50, %c0_51] : memref<8x1xf32, #tpu.memory_space<vmem>>, vector<8x1xf32>
    %c0_52 = arith.constant 0 : index
    %c0_53 = arith.constant 0 : index
    %78 = vector.load %arg10[%c0_52, %c0_53] : memref<1x128xf32, #tpu.memory_space<vmem>>, vector<1x128xf32>
    %79 = vector.broadcast %77 : vector<8x1xf32> to vector<8x128xf32>
    %80 = vector.broadcast %78 : vector<1x128xf32> to vector<8x128xf32>
    %81 = arith.mulf %79, %80 : vector<8x128xf32>
    %82 = arith.addf %76, %81 : vector<8x128xf32>
    %c0_54 = arith.constant 0 : index
    %c0_55 = arith.constant 0 : index
    %83 = vector.load %arg11[%c0_54, %c0_55] : memref<1x128xf32, #tpu.memory_space<vmem>>, vector<1x128xf32>
    %84 = vector.broadcast %83 : vector<1x128xf32> to vector<8x128xf32>
    %85 = arith.addf %82, %84 : vector<8x128xf32>
    %cst_56 = arith.constant 0.000000e+00 : f32
    %86 = vector.broadcast %cst_56 : f32 to vector<8x128xf32>
    %87 = arith.maximumf %85, %86 : vector<8x128xf32>
    %c0_57 = arith.constant 0 : index
    %c0_58 = arith.constant 0 : index
    %88 = vector.load %arg12[%c0_57, %c0_58] : memref<1x128xf32, #tpu.memory_space<vmem>>, vector<1x128xf32>
    %89 = vector.broadcast %88 : vector<1x128xf32> to vector<8x128xf32>
    %90 = arith.mulf %87, %89 : vector<8x128xf32>
    %cst_59 = arith.constant dense<0.000000e+00> : vector<8xf32>
    %91 = vector.multi_reduction <add>, %90, %cst_59 [1] : vector<8x128xf32> to vector<8xf32>
    %92 = vector.shape_cast %91 : vector<8xf32> to vector<8x1xf32>
    %c0_60 = arith.constant 0 : index
    %c0_61 = arith.constant 0 : index
    %93 = vector.load %arg13[%c0_60, %c0_61] : memref<1x1xf32, #tpu.memory_space<vmem>>, vector<1x1xf32>
    %94 = vector.broadcast %93 : vector<1x1xf32> to vector<8x1xf32>
    %95 = arith.addf %92, %94 : vector<8x1xf32>
    %cst_62 = arith.constant 0.000000e+00 : f32
    %96 = vector.broadcast %cst_62 : f32 to vector<8x1xf32>
    %97 = arith.maximumf %95, %96 : vector<8x1xf32>
    %98 = vector.shape_cast %97 : vector<8x1xf32> to vector<8x1xf32>
    %99 = vector.broadcast %98 : vector<8x1xf32> to vector<8x128xf32>
    %c0_63 = arith.constant 0 : index
    %c0_64 = arith.constant 0 : index
    %100 = vector.load %arg14[%c0_63, %c0_64] : memref<8x128xf32, #tpu.memory_space<vmem>>, vector<8x128xf32>
    tpu.vector_store %arg14[%c0_63, %c0_64], %99 {strides = array<i32>} : memref<8x128xf32, #tpu.memory_space<vmem>>, vector<8x128xf32>,
    return
  }
  func.func @transform_0(%arg0: i32) -> (i32, i32) {
    %c0_i32 = arith.constant 0 : i32
    %c0_i32_0 = arith.constant 0 : i32
    return %arg0, %c0_i32 : i32, i32
  }
  func.func @transform_1(%arg0: i32) -> (i32, i32) {
    %c0_i32 = arith.constant 0 : i32
    %c0_i32_0 = arith.constant 0 : i32
    return %arg0, %c0_i32 : i32, i32
  }
  func.func @transform_2(%arg0: i32) -> (i32, i32) {
    %c0_i32 = arith.constant 0 : i32
    %c0_i32_0 = arith.constant 0 : i32
    %c0_i32_1 = arith.constant 0 : i32
    return %c0_i32, %c0_i32_0 : i32, i32
  }
  func.func @transform_3(%arg0: i32) -> (i32, i32) {
    %c0_i32 = arith.constant 0 : i32
    %c0_i32_0 = arith.constant 0 : i32
    %c0_i32_1 = arith.constant 0 : i32
    return %c0_i32, %c0_i32_0 : i32, i32
  }
  func.func @transform_4(%arg0: i32) -> (i32, i32) {
    %c0_i32 = arith.constant 0 : i32
    %c0_i32_0 = arith.constant 0 : i32
    %c0_i32_1 = arith.constant 0 : i32
    return %c0_i32, %c0_i32_0 : i32, i32
  }
  func.func @transform_5(%arg0: i32) -> (i32, i32) {
    %c0_i32 = arith.constant 0 : i32
    %c0_i32_0 = arith.constant 0 : i32
    %c0_i32_1 = arith.constant 0 : i32
    return %c0_i32, %c0_i32_0 : i32, i32
  }
  func.func @transform_6(%arg0: i32) -> (i32, i32) {
    %c0_i32 = arith.constant 0 : i32
    %c0_i32_0 = arith.constant 0 : i32
    %c0_i32_1 = arith.constant 0 : i32
    return %c0_i32, %c0_i32_0 : i32, i32
  }
  func.func @transform_7(%arg0: i32) -> (i32, i32) {
    %c0_i32 = arith.constant 0 : i32
    %c0_i32_0 = arith.constant 0 : i32
    %c0_i32_1 = arith.constant 0 : i32
    return %c0_i32, %c0_i32_0 : i32, i32
  }
  func.func @transform_8(%arg0: i32) -> (i32, i32) {
    %c0_i32 = arith.constant 0 : i32
    %c0_i32_0 = arith.constant 0 : i32
    %c0_i32_1 = arith.constant 0 : i32
    return %c0_i32, %c0_i32_0 : i32, i32
  }
  func.func @transform_9(%arg0: i32) -> (i32, i32) {
    %c0_i32 = arith.constant 0 : i32
    %c0_i32_0 = arith.constant 0 : i32
    %c0_i32_1 = arith.constant 0 : i32
    return %c0_i32, %c0_i32_0 : i32, i32
  }
  func.func @transform_10(%arg0: i32) -> (i32, i32) {
    %c0_i32 = arith.constant 0 : i32
    %c0_i32_0 = arith.constant 0 : i32
    %c0_i32_1 = arith.constant 0 : i32
    return %c0_i32, %c0_i32_0 : i32, i32
  }
  func.func @transform_11(%arg0: i32) -> (i32, i32) {
    %c0_i32 = arith.constant 0 : i32
    %c0_i32_0 = arith.constant 0 : i32
    %c0_i32_1 = arith.constant 0 : i32
    return %c0_i32, %c0_i32_0 : i32, i32
  }
  func.func @transform_12(%arg0: i32) -> (i32, i32) {
    %c0_i32 = arith.constant 0 : i32
    %c0_i32_0 = arith.constant 0 : i32
    %c0_i32_1 = arith.constant 0 : i32
    return %c0_i32, %c0_i32_0 : i32, i32
  }
  func.func @transform_13(%arg0: i32) -> (i32, i32) {
    %c0_i32 = arith.constant 0 : i32
    %c0_i32_0 = arith.constant 0 : i32
    return %arg0, %c0_i32 : i32, i32
  }
}

</mosaic_0001>

<bundles_post_ra>
// kernel: critic_apply.1
= control target key start
LH: loop header
LB: loop body
LE: loop exit
PB: predicated region body
PF: predicated region fallthrough
CT: control target
= control target key end

     0   :  { %s6285_s0 = inlined_call_operand.vmem [shape: f32[448,128], index: 0, kind: input, shape index: {}]   ;;  %s6286_s1 = inlined_call_operand.vmem [shape: f32[16,1], index: 1, kind: input, shape index: {}]   ;;  %s6287_s2 = inlined_call_operand.vmem [shape: f32[640,256], index: 2, kind: input, shape index: {}]   ;;  %s6288_s3 = inlined_call_operand.hbm [shape: f32[640,256], index: 3, kind: input, shape index: {}]   ;;  %s6289_s4 = inlined_call_operand.vmem [shape: f32[1,128], index: 4, kind: input, shape index: {}]   ;;  %s6290_s5 = inlined_call_operand.vmem [shape: f32[1,128], index: 5, kind: input, shape index: {}]   ;;  %s6291_s6 = inlined_call_operand.hbm [shape: f32[512,128], index: 6, kind: input, shape index: {}]   ;;  %s6292_s7 = inlined_call_operand.vmem [shape: f32[1,128], index: 7, kind: input, shape index: {}]   ;;  %s6293_s8 = inlined_call_operand.vmem [shape: f32[128,128], index: 8, kind: input, shape index: {}]   ;;  %s6294_s9 = inlined_call_operand.vmem [shape: f32[1,128], index: 9, kind: input, shape index: {}]   ;;  %s6295_s10 = inlined_call_operand.vmem [shape: f32[1,128], index: 10, kind: input, shape index: {}]   ;;  %s6296_s11 = inlined_call_operand.vmem [shape: f32[1,128], index: 11, kind: input, shape index: {}]   ;;  %s6297_s12 = inlined_call_operand.<no memory space> [shape: f32[1,1], index: 12, kind: input, shape index: {}]   ;;  %s6298_s13 = inlined_call_operand.vmem [shape: f32[16,128], index: 13, kind: output, shape index: {}]  }
   0x1   :  { %v18_v0 = vstv %s6297_s12 }
   0x2   :  { %19 = vst [vmem:[#allocation4] sm:$0x1] %v18_v0 }
   0x3   :  { %20 = vsyncpa [#allocation6], 0 }
   0x4   :  { %21 = vsyncpa [#allocation8], 0  ;;  %s3621_s27 = smov 0  }
   0x5 LB: > { %s355_s30 = sshll.u32 %s6288_s3, 4  ;;  %s3630_s14 = sadd.s32 4294967295, %s3539_s27   ;;  %s3539_s27 = sphi %s3621_s27, %s27_s27   ;;  %s356_s30 = int_to_ptr.hbm [resolvable:$true] %s355_s30 }
   0x6   : > { %p3385_p0 = scmp.ge.s32.totalorder %s3539_s27, 1  ;;  %p341_p1 = scmp.lt.s32.totalorder %s3539_s27, 3 }
   0x7   : > { %p3412_p2 = scmp.eq.s32.totalorder %s3630_s14, 0  ;;  %s3541_s15 = smov [#allocation5]  }
   0x8   : > { %p3635_p3 = pnand %p3385_p0, %p341_p1  ;;  %s357_s16 = sshll.u32 %s3541_s15, 4  ;;  %s358_s16 = int_to_ptr.vmem [resolvable:$true] %s357_s16 }
   0x9   : > { %s375_s19 = sshll.u32 %s6291_s6, 4  ;;  %s3542_s20 = smov [#allocation7]   ;;  %s376_s19 = int_to_ptr.hbm [resolvable:$true] %s375_s19 }
   0xa   : > { %p3405_p4 = pneg %p3635_p3  ;;  %s377_s21 = sshll.u32 %s3542_s20, 4  ;;  %s378_s21 = int_to_ptr.vmem [resolvable:$true] %s377_s21 }
   0xb   : > { %s3543_s22 = smov 256   ;;  %s3544_s23 = smov 16  }
   0xc   : > { %p3406_p5 = pnand %p3412_p2, %p3405_p4  ;;  %s3545_s24 = smov 128  }
   0xd   : > { %s3546_s25 = smov 8   ;;  %427 = sbr.rel (%p3635_p3) target bundleno = 1784 (0x6f8), region = 72 }
   0xe   : > { %3408 = dma.hbm_to_vmem [thread:$0]  (!%p3406_p5), %s356_s30, 20480, %s358_s16, [#allocation6], %s3543_s22, %s3543_s22, %s3544_s23  }
   0xf   : > { %3411 = dma.hbm_to_vmem [thread:$0]  (!%p3406_p5), %s376_s19, 8192, %s378_s21, [#allocation8], %s3545_s24, %s3545_s24, %s3546_s25  }
  0x12   : > { %3530 = dma.done.wait (%p3412_p2), [#allocation6], 20480  }
  0x13   : > { %3532 = vsyncadd (%p3412_p2), [#allocation6], 4294946816 }
  0x14   : > { %3534 = dma.done.wait (%p3412_p2), [#allocation8], 8192  }
  0x15   : > { %3536 = vsyncadd (%p3412_p2), [#allocation8], 4294959104  ;;  %v782_v1 = vld [vmem:[%s6287_s2 + $0xf0] sm:$0xff]  ;;  %v780_v4 = vld [vmem:[%s6287_s2 + $0xe0] sm:$0xff]  ;;  %s480_s24 = smul.u32 28, %s3630_s14  ;;  %v550_v40 = vlaneseq  ;;  %p486_p7 = scmp.lt.s32.totalorder %s3630_s14, 1 }
  0x16   : > { %v814_v2 = vld [vmem:[%s6287_s2 + $0x1f0] sm:$0xff]  ;;  %912 = vmatpush.msra.mxu0 %v782_v1  ;;  %v812_v5 = vld [vmem:[%s6287_s2 + $0x1e0] sm:$0xff] }
  0x17   : > { %v846_v3 = vld [vmem:[%s6287_s2 + $0x2f0] sm:$0xff]  ;;  %1013 = vmatpush.msra.mxu1 %v814_v2  ;;  %v844_v6 = vld [vmem:[%s6287_s2 + $0x2e0] sm:$0xff]  ;;  %p3728_p6 = scmp.lt.s32.totalorder %s480_s24, 55  ;;  %v3825_v52 = vshrl.u32 %v550_v40, 7  ;;  %s6615_s14 = smov (!%p486_p7, %s3630_s14), 1 }
  0x18   : > { %1114 = vmatpush.msra.mxu2 %v846_v3  ;;  %v878_v7 = vld [vmem:[%s6287_s2 + $0x3f0] sm:$0xff]  ;;  %913 = vmatpush.msra.mxu0 %v780_v4  ;;  %v876_v11 = vld [vmem:[%s6287_s2 + $0x3e0] sm:$0xff] }
  0x19   : > { %v778_v8 = vld [vmem:[%s6287_s2 + $0xd0] sm:$0xff]  ;;  %1014 = vmatpush.msra.mxu1 %v812_v5  ;;  %1215 = vmatpush.msra.mxu3 %v878_v7  ;;  %v776_v12 = vld [vmem:[%s6287_s2 + $0xc0] sm:$0xff]  ;;  %s6613_s24 = smov (!%p3728_p6, %s480_s24), 55  ;;  %vm552_vm0 = vcmp.lt.s32.totalorder %v3825_v52, 7  ;;  %vm609_vm1 = vcmp.lt.s32.totalorder %v3825_v52, 6  ;;  %vm666_vm2 = vcmp.lt.s32.totalorder %v3825_v52, 5 }
  0x1a   : > { %v810_v9 = vld [vmem:[%s6287_s2 + $0x1d0] sm:$0xff]  ;;  %1115 = vmatpush.msra.mxu2 %v844_v6  ;;  %v808_v13 = vld [vmem:[%s6287_s2 + $0x1c0] sm:$0xff]  ;;  %914 = vmatpush.msra.mxu0 %v778_v8  ;;  %s3392_s12 = sshll.u32 %s6613_s24, 3  ;;  %vm723_vm3 = vcmp.lt.s32.totalorder %v3825_v52, 4 }
  0x1b   : > { %v842_v10 = vld [vmem:[%s6287_s2 + $0x2d0] sm:$0xff]  ;;  %1015 = vmatpush.msra.mxu1 %v810_v9  ;;  %v840_v14 = vld [vmem:[%s6287_s2 + $0x2c0] sm:$0xff]  ;;  %1216 = vmatpush.msra.mxu3 %v876_v11  ;;  %s3814_s18 = scalar_lea.vmem %s6285_s0, %s3392_s12 }
  0x1c   : > { %v874_v15 = vld [vmem:[%s6287_s2 + $0x3d0] sm:$0xff]  ;;  %1116 = vmatpush.msra.mxu2 %v842_v10  ;;  %915 = vmatpush.msra.mxu0 %v776_v12  ;;  %v872_v19 = vld [vmem:[%s6287_s2 + $0x3c0] sm:$0xff]  ;;  %v3846_v59 = vld [vmem:[%s3814_s18 + $0x8] sm:$0xff] }
  0x1d   : > { %v774_v16 = vld [vmem:[%s6287_s2 + $0xb0] sm:$0xff]  ;;  %1016 = vmatpush.msra.mxu1 %v808_v13  ;;  %1217 = vmatpush.msra.mxu3 %v874_v15  ;;  %v772_v20 = vld [vmem:[%s6287_s2 + $0xa0] sm:$0xff]  ;;  %v523_v1 = vrot.slane %v3846_v59, 1  ;;  %v582_v3 = vrot.slane %v3846_v59, 2  ;;  %v639_v9 = vrot.slane %v3846_v59, 3  ;;  %v783_v15 = vld [vmem:[%s6287_s2 + $0xf8] sm:$0xff] }
  0x1e   : > { %v806_v17 = vld [vmem:[%s6287_s2 + $0x1b0] sm:$0xff]  ;;  %1117 = vmatpush.msra.mxu2 %v840_v14  ;;  %v804_v21 = vld [vmem:[%s6287_s2 + $0x1a0] sm:$0xff]  ;;  %916 = vmatpush.msra.mxu0 %v774_v16 }
  0x1f   : > { %v838_v18 = vld [vmem:[%s6287_s2 + $0x2b0] sm:$0xff]  ;;  %1017 = vmatpush.msra.mxu1 %v806_v17  ;;  %v836_v22 = vld [vmem:[%s6287_s2 + $0x2a0] sm:$0xff]  ;;  %1218 = vmatpush.msra.mxu3 %v872_v19  ;;  %v781_v19 = vld [vmem:[%s6287_s2 + $0xe8] sm:$0xff] }
  0x20   : > { %v870_v23 = vld [vmem:[%s6287_s2 + $0x3b0] sm:$0xff]  ;;  %1118 = vmatpush.msra.mxu2 %v838_v18  ;;  %917 = vmatpush.msra.mxu0 %v772_v20  ;;  %v868_v27 = vld [vmem:[%s6287_s2 + $0x3a0] sm:$0xff] }
  0x21   : > { %v770_v24 = vld [vmem:[%s6287_s2 + $0x90] sm:$0xff]  ;;  %1018 = vmatpush.msra.mxu1 %v804_v21  ;;  %1219 = vmatpush.msra.mxu3 %v870_v23  ;;  %v768_v28 = vld [vmem:[%s6287_s2 + $0x80] sm:$0xff] }
  0x22   : > { %v802_v25 = vld [vmem:[%s6287_s2 + $0x190] sm:$0xff]  ;;  %1119 = vmatpush.msra.mxu2 %v836_v22  ;;  %v800_v29 = vld [vmem:[%s6287_s2 + $0x180] sm:$0xff]  ;;  %918 = vmatpush.msra.mxu0 %v770_v24  ;;  %v779_v22 = vld [vmem:[%s6287_s2 + $0xd8] sm:$0xff] }
  0x23   : > { %v834_v26 = vld [vmem:[%s6287_s2 + $0x290] sm:$0xff]  ;;  %1019 = vmatpush.msra.mxu1 %v802_v25  ;;  %v832_v30 = vld [vmem:[%s6287_s2 + $0x280] sm:$0xff]  ;;  %1220 = vmatpush.msra.mxu3 %v868_v27 }
  0x24   : > { %v866_v31 = vld [vmem:[%s6287_s2 + $0x390] sm:$0xff]  ;;  %1120 = vmatpush.msra.mxu2 %v834_v26  ;;  %919 = vmatpush.msra.mxu0 %v768_v28  ;;  %v864_v35 = vld [vmem:[%s6287_s2 + $0x380] sm:$0xff]  ;;  %v497_v26 = vld [vmem:[%s3814_s18 + $0x18] sm:$0xff] }
  0x25   : > { %v766_v32 = vld [vmem:[%s6287_s2 + $0x70] sm:$0xff]  ;;  %1020 = vmatpush.msra.mxu1 %v800_v29  ;;  %1221 = vmatpush.msra.mxu3 %v866_v31  ;;  %v764_v36 = vld [vmem:[%s6287_s2 + $0x60] sm:$0xff]  ;;  %v525_v28 = vrot.slane %v497_v26, 1  ;;  %v584_v29 = vrot.slane %v497_v26, 2  ;;  %v777_v31 = vld [vmem:[%s6287_s2 + $0xc8] sm:$0xff] }
  0x26   : > { %v798_v33 = vld [vmem:[%s6287_s2 + $0x170] sm:$0xff]  ;;  %1121 = vmatpush.msra.mxu2 %v832_v30  ;;  %v796_v37 = vld [vmem:[%s6287_s2 + $0x160] sm:$0xff]  ;;  %920 = vmatpush.msra.mxu0 %v766_v32  ;;  %v641_v32 = vrot.slane %v497_v26, 3 }
  0x27   : > { %v830_v34 = vld [vmem:[%s6287_s2 + $0x270] sm:$0xff]  ;;  %1021 = vmatpush.msra.mxu1 %v798_v33  ;;  %v828_v38 = vld [vmem:[%s6287_s2 + $0x260] sm:$0xff]  ;;  %1222 = vmatpush.msra.mxu3 %v864_v35 }
  0x28   : > { %v862_v39 = vld [vmem:[%s6287_s2 + $0x370] sm:$0xff]  ;;  %1122 = vmatpush.msra.mxu2 %v830_v34  ;;  %921 = vmatpush.msra.mxu0 %v764_v36  ;;  %v860_v44 = vld [vmem:[%s6287_s2 + $0x360] sm:$0xff] }
  0x29   : > { %v762_v41 = vld [vmem:[%s6287_s2 + $0x50] sm:$0xff]  ;;  %1022 = vmatpush.msra.mxu1 %v796_v37  ;;  %v760_v45 = vld [vmem:[%s6287_s2 + $0x40] sm:$0xff]  ;;  %1223 = vmatpush.msra.mxu3 %v862_v39 }
  0x2a   : > { %v794_v42 = vld [vmem:[%s6287_s2 + $0x150] sm:$0xff]  ;;  %1123 = vmatpush.msra.mxu2 %v828_v38  ;;  %v792_v46 = vld [vmem:[%s6287_s2 + $0x140] sm:$0xff]  ;;  %922 = vmatpush.msra.mxu0 %v762_v41 }
  0x2b   : > { %v826_v43 = vld [vmem:[%s6287_s2 + $0x250] sm:$0xff]  ;;  %v824_v47 = vld [vmem:[%s6287_s2 + $0x240] sm:$0xff]  ;;  %1023 = vmatpush.msra.mxu1 %v794_v42  ;;  %1224 = vmatpush.msra.mxu3 %v860_v44  ;;  %v499_v42 = vld [vmem:[%s3814_s18 + $0x28] sm:$0xff] }
  0x2c   : > { %v858_v48 = vld [vmem:[%s6287_s2 + $0x350] sm:$0xff]  ;;  %1124 = vmatpush.msra.mxu2 %v826_v43  ;;  %v856_v53 = vld [vmem:[%s6287_s2 + $0x340] sm:$0xff]  ;;  %923 = vmatpush.msra.mxu0 %v760_v45  ;;  %v527_v44 = vrot.slane %v499_v42, 1 }
  0x2d   : > { %v758_v49 = vld [vmem:[%s6287_s2 + $0x30] sm:$0xff]  ;;  %v756_v54 = vld [vmem:[%s6287_s2 + $0x20] sm:$0xff]  ;;  %1024 = vmatpush.msra.mxu1 %v792_v46  ;;  %1225 = vmatpush.msra.mxu3 %v858_v48  ;;  %v586_v46 = vrot.slane %v499_v42, 2  ;;  %v643_v48 = vrot.slane %v499_v42, 3 }
  0x2e   : > { %v790_v50 = vld [vmem:[%s6287_s2 + $0x130] sm:$0xff]  ;;  %v788_v55 = vld [vmem:[%s6287_s2 + $0x120] sm:$0xff]  ;;  %1125 = vmatpush.msra.mxu2 %v824_v47  ;;  %924 = vmatpush.msra.mxu0 %v758_v49  ;;  %v775_v47 = vld [vmem:[%s6287_s2 + $0xb8] sm:$0xff] }
  0x2f   : > { %v822_v51 = vld [vmem:[%s6287_s2 + $0x230] sm:$0xff]  ;;  %v820_v56 = vld [vmem:[%s6287_s2 + $0x220] sm:$0xff]  ;;  %1025 = vmatpush.msra.mxu1 %v790_v50  ;;  %1226 = vmatpush.msra.mxu3 %v856_v53 }
  0x30   : > { %v854_v57 = vld [vmem:[%s6287_s2 + $0x330] sm:$0xff]  ;;  %v3843_v58 = vld [vmem:[%s3814_s18] sm:$0xff]  ;;  %1126 = vmatpush.msra.mxu2 %v822_v51  ;;  %925 = vmatpush.msra.mxu0 %v756_v54 }
  0x31   : > { %v754_v60 = vld [vmem:[%s6287_s2 + $0x10] sm:$0xff]  ;;  %v852_v63 = vld [vmem:[%s6287_s2 + $0x320] sm:$0xff]  ;;  %v6301_v0 = vrot.slane %v3843_v58, 1  ;;  %1026 = vmatpush.msra.mxu1 %v788_v55  ;;  %v6300_v2 = vrot.slane %v3843_v58, 2  ;;  %1227 = vmatpush.msra.mxu3 %v854_v57  ;;  %v6299_v8 = vrot.slane %v3843_v58, 3 }
  0x32   : > { %v786_v61 = vld [vmem:[%s6287_s2 + $0x110] sm:$0xff]  ;;  %1127 = vmatpush.msra.mxu2 %v820_v56  ;;  %v752_v4 = vld [vmem:[%s6287_s2] sm:$0xff]  ;;  %926 = vmatpush.msra.mxu0 %v754_v60 }
  0x33   : > { %v818_v62 = vld [vmem:[%s6287_s2 + $0x210] sm:$0xff]  ;;  %v784_v5 = vld [vmem:[%s6287_s2 + $0x100] sm:$0xff]  ;;  %1027 = vmatpush.msra.mxu1 %v786_v61  ;;  %1228 = vmatpush.msra.mxu3 %v852_v63  ;;  %v3884_v10 = vsel %vm552_vm0, %v6301_v0, %v523_v1  ;;  %v3891_v11 = vsel %vm609_vm1, %v6300_v2, %v582_v3  ;;  %v3909_v16 = vsel %vm666_vm2, %v6299_v8, %v639_v9  ;;  %v501_v61 = vld [vmem:[%s3814_s18 + $0x38] sm:$0xff] }
  0x34   : > { %v816_v6 = vld [vmem:[%s6287_s2 + $0x200] sm:$0xff]  ;;  %v850_v7 = vld [vmem:[%s6287_s2 + $0x310] sm:$0xff]  ;;  %1128 = vmatpush.msra.mxu2 %v818_v62  ;;  %927 = vmatpush.msra.mxu0 %v752_v4  ;;  %6365 = vst [vmem:[#allocation11_spill] sm:$0xff] %v3909_v16  ;;  %v529_v63 = vrot.slane %v501_v61, 1  ;;  %v645_v4 = vrot.slane %v501_v61, 3 }
  0x35   : > { %1028 = vmatpush.msra.mxu1 %v784_v5  ;;  %v910_v12 = vld [vmem:[%s6287_s2 + $0x4f0] sm:$0xff]  ;;  %1229 = vmatpush.msra.mxu3 %v850_v7  ;;  %v848_v14 = vld [vmem:[%s6287_s2 + $0x300] sm:$0xff] }
  0x36   : > { %v496_v13 = vld [vmem:[%s3814_s18 + $0x10] sm:$0xff]  ;;  %1129 = vmatpush.msra.mxu2 %v816_v6  ;;  %928 = vmatmul.f32.vlgmr.msra.gmra.mxu0 %v3843_v58  ;;  %v908_v17 = vld [vmem:[%s6287_s2 + $0x4e0] sm:$0xff] }
  0x37   : > { %1029 = vmatmul.f32.vlgmr.msra.gmra.mxu1 %v3884_v10  ;;  %1130 = vmatmul.f32.vlgmr.msra.gmra.mxu2 %v3891_v11  ;;  %v524_v18 = vrot.slane %v496_v13, 1  ;;  %v583_v20 = vrot.slane %v496_v13, 2  ;;  %v906_v21 = vld [vmem:[%s6287_s2 + $0x4d0] sm:$0xff]  ;;  %v640_v23 = vrot.slane %v496_v13, 3  ;;  %v904_v30 = vld [vmem:[%s6287_s2 + $0x4c0] sm:$0xff] }
  0x38   : > { %1316 = vmatpush.msrb.mxu0 %v910_v12  ;;  %1230 = vmatpush.msra.mxu3 %v848_v14  ;;  %v498_v35 = vld [vmem:[%s3814_s18 + $0x20] sm:$0xff]  ;;  %v902_v45 = vld [vmem:[%s6287_s2 + $0x4b0] sm:$0xff] }
  0x39   : > { %1417 = vmatpush.msrb.mxu1 %v783_v15  ;;  %1231 = vmatmul.f32.vlgmr.msra.gmra.mxu3 %v3909_v16  ;;  %v3927_v24 = vsel %vm552_vm0, %v523_v1, %v524_v18  ;;  %v3931_v25 = vsel %vm609_vm1, %v582_v3, %v583_v20  ;;  %v3938_v27 = vsel %vm666_vm2, %v639_v9, %v640_v23  ;;  %v526_v37 = vrot.slane %v498_v35, 1  ;;  %v500_v51 = vld [vmem:[%s3814_s18 + $0x30] sm:$0xff]  ;;  %v900_v56 = vld [vmem:[%s6287_s2 + $0x4a0] sm:$0xff]  ;;  %v773_v1 = vld [vmem:[%s6287_s2 + $0xa8] sm:$0xff] }
  0x3a   : > { %1317 = vmatpush.msrb.mxu0 %v908_v17  ;;  %6366 = vst [vmem:[#allocation12_spill] sm:$0xff] %v3938_v27  ;;  %v3950_v33 = vsel %vm552_vm0, %v524_v18, %v525_v28  ;;  %v3954_v34 = vsel %vm609_vm1, %v583_v20, %v584_v29  ;;  %v3960_v36 = vsel %vm666_vm2, %v640_v23, %v641_v32  ;;  %v585_v38 = vrot.slane %v498_v35, 2  ;;  %v502_v7 = vld [vmem:[%s3814_s18 + $0x40] sm:$0xff]  ;;  %v898_v14 = vld [vmem:[%s6287_s2 + $0x490] sm:$0xff]  ;;  %v771_v15 = vld [vmem:[%s6287_s2 + $0x98] sm:$0xff] }
  0x3b   : > { %1418 = vmatpush.msrb.mxu1 %v781_v19  ;;  %6367 = vst [vmem:[#allocation13_spill] sm:$0xff] %v3960_v36  ;;  %v642_v39 = vrot.slane %v498_v35, 3  ;;  %v3966_v40 = vsel %vm552_vm0, %v525_v28, %v526_v37  ;;  %v3988_v49 = vsel %vm552_vm0, %v526_v37, %v527_v44  ;;  %v528_v54 = vrot.slane %v500_v51, 1  ;;  %v503_v20 = vld [vmem:[%s3814_s18 + $0x48] sm:$0xff]  ;;  %v896_v37 = vld [vmem:[%s6287_s2 + $0x480] sm:$0xff] }
  0x3c   : > { %1318 = vmatpush.msrb.mxu0 %v906_v21  ;;  %v3970_v41 = vsel %vm609_vm1, %v584_v29, %v585_v38  ;;  %v3992_v50 = vsel %vm609_vm1, %v585_v38, %v586_v46  ;;  %v587_v55 = vrot.slane %v500_v51, 2  ;;  %v644_v57 = vrot.slane %v500_v51, 3  ;;  %v769_v38 = vld [vmem:[%s6287_s2 + $0x88] sm:$0xff] }
  0x3d   : > { %1419 = vmatpush.msrb.mxu1 %v779_v22  ;;  %v3976_v43 = vsel %vm666_vm2, %v641_v32, %v642_v39  ;;  %v3998_v53 = vsel %vm666_vm2, %v642_v39, %v643_v48  ;;  %v588_v3 = vrot.slane %v501_v61, 2  ;;  %v4026_v5 = vsel %vm552_vm0, %v528_v54, %v529_v63  ;;  %v809_v16 = vld [vmem:[%s6287_s2 + $0x1c8] sm:$0xff] }
  0x3e   : > { %931 = vmatmul.f32.gmra.mxu0 %v3846_v59  ;;  %6368 = vst [vmem:[#allocation14_spill] sm:$0xff] %v3976_v43  ;;  %v4007_v59 = vsel %vm552_vm0, %v527_v44, %v528_v54  ;;  %v4011_v60 = vsel %vm609_vm1, %v586_v46, %v587_v55  ;;  %v4017_v62 = vsel %vm666_vm2, %v643_v48, %v644_v57  ;;  %v530_v12 = vrot.slane %v502_v7, 1 }
  0x3f   : > { %1032 = vmatmul.f32.gmra.mxu1 %v3927_v24  ;;  %1133 = vmatmul.f32.gmra.mxu2 %v3931_v25  ;;  %6369 = vst [vmem:[#allocation15_spill] sm:$0xff] %v3998_v53  ;;  %v4030_v6 = vsel %vm609_vm1, %v587_v55, %v588_v3  ;;  %v4036_v9 = vsel %vm666_vm2, %v644_v57, %v645_v4  ;;  %v646_v17 = vrot.slane %v502_v7, 3  ;;  %v531_v22 = vrot.slane %v503_v20, 1 }
  0x40   : > { %1319 = vmatpush.msrb.mxu0 %v904_v30  ;;  %1420 = vmatpush.msrb.mxu1 %v777_v31  ;;  %6370 = vst [vmem:[#allocation16_spill] sm:$0xff] %v4017_v62  ;;  %v4048_v18 = vsel %vm552_vm0, %v529_v63, %v530_v12  ;;  %v590_v23 = vrot.slane %v503_v20, 2  ;;  %v504_v30 = vld [vmem:[%s3814_s18 + $0x50] sm:$0xff] }
  0x41   : > { %1234 = vmatmul.f32.gmra.mxu3 %v3938_v27  ;;  %6371 = vst [vmem:[#allocation17_spill] sm:$0xff] %v4036_v9  ;;  %v4058_v21 = vsel %vm666_vm2, %v645_v4, %v646_v17  ;;  %v4064_v28 = vsel %vm552_vm0, %v530_v12, %v531_v22  ;;  %v532_v32 = vrot.slane %v504_v30, 1  ;;  %v648_v39 = vrot.slane %v504_v30, 3  ;;  %v894_v63 = vld [vmem:[%s6287_s2 + $0x470] sm:$0xff] }
  0x42   : > { %1320 = vmatpush.msrb.mxu0 %v902_v45  ;;  %1421 = vmatpush.msrb.mxu1 %v775_v47  ;;  %6372 = vst [vmem:[#allocation18_spill] sm:$0xff] %v4058_v21  ;;  %v505_v45 = vld [vmem:[%s3814_s18 + $0x58] sm:$0xff]  ;;  %v4311_v27 = vld [vmem:[%s3814_s18 + $0xb0] sm:$0xff] }
  0x43   : > { %v533_v47 = vrot.slane %v505_v45, 1  ;;  %v592_v48 = vrot.slane %v505_v45, 2 }
  0x44   : > { %1321 = vmatpush.msrb.mxu0 %v900_v56  ;;  %1422 = vmatpush.msrb.mxu1 %v773_v1  ;;  %v506_v56 = vld [vmem:[%s3814_s18 + $0x60] sm:$0xff] }
  0x45   : > { %v4102_v54 = vsel %vm552_vm0, %v532_v32, %v533_v47  ;;  %v593_v1 = vrot.slane %v506_v56, 2  ;;  %v650_v4 = vrot.slane %v506_v56, 3 }
  0x46   : > { %934 = vmatmul.f32.gmra.mxu0 %v496_v13  ;;  %v589_v13 = vrot.slane %v502_v7, 2  ;;  %1423 = vmatpush.msrb.mxu1 %v771_v15 }
  0x47   : > { %1035 = vmatmul.f32.gmra.mxu1 %v3950_v33  ;;  %1136 = vmatmul.f32.gmra.mxu2 %v3954_v34  ;;  %v4128_v12 = vsel %vm609_vm1, %v592_v48, %v593_v1 }
  0x48   : > { %1322 = vmatpush.msrb.mxu0 %v898_v14  ;;  %v4052_v19 = vsel %vm609_vm1, %v588_v3, %v589_v13  ;;  %v4068_v29 = vsel %vm609_vm1, %v589_v13, %v590_v23  ;;  %1424 = vmatpush.msrb.mxu1 %v769_v38  ;;  %v767_v3 = vld [vmem:[%s6287_s2 + $0x78] sm:$0xff]  ;;  %v507_v13 = vld [vmem:[%s3814_s18 + $0x68] sm:$0xff] }
  0x49   : > { %1237 = vmatmul.f32.gmra.mxu3 %v3960_v36  ;;  %v535_v15 = vrot.slane %v507_v13, 1 }
  0x4a   : > { %1323 = vmatpush.msrb.mxu0 %v896_v37  ;;  %1425 = vmatpush.msrb.mxu1 %v767_v3  ;;  %v765_v37 = vld [vmem:[%s6287_s2 + $0x68] sm:$0xff]  ;;  %v890_v3 = vld [vmem:[%s6287_s2 + $0x450] sm:$0xff] }
  0x4c   : > { %1324 = vmatpush.msrb.mxu0 %v894_v63  ;;  %1426 = vmatpush.msrb.mxu1 %v765_v37 }
  0x4e   : > { %937 = vmatmul.f32.gmra.mxu0 %v497_v26  ;;  %v647_v26 = vrot.slane %v503_v20, 3 }
  0x4f   : > { %1038 = vmatmul.f32.gmra.mxu1 %v3966_v40  ;;  %1139 = vmatmul.f32.gmra.mxu2 %v3970_v41 }
  0x50   : > { %v4074_v31 = vsel %vm666_vm2, %v646_v17, %v647_v26  ;;  %v4096_v46 = vsel %vm666_vm2, %v647_v26, %v648_v39  ;;  %v594_v17 = vrot.slane %v507_v13, 2  ;;  %v508_v26 = vld [vmem:[%s3814_s18 + $0x70] sm:$0xff] }
  0x51   : > { %1240 = vmatmul.f32.gmra.mxu3 %v3976_v43  ;;  %6373 = vst [vmem:[#allocation19_spill] sm:$0xff] %v4074_v31  ;;  %v595_v38 = vrot.slane %v508_v26, 2 }
  0x52   : > { %6374 = vst [vmem:[#allocation20_spill] sm:$0xff] %v4096_v46 }
  0x56   : > { %940 = vmatmul.f32.gmra.mxu0 %v498_v35  ;;  %v591_v35 = vrot.slane %v504_v30, 2 }
  0x57   : > { %1041 = vmatmul.f32.gmra.mxu1 %v3988_v49  ;;  %1142 = vmatmul.f32.gmra.mxu2 %v3992_v50 }
  0x58   : > { %v4090_v44 = vsel %vm609_vm1, %v590_v23, %v591_v35  ;;  %v4106_v55 = vsel %vm609_vm1, %v591_v35, %v592_v48  ;;  %v4144_v23 = vsel %vm609_vm1, %v593_v1, %v594_v17  ;;  %v536_v35 = vrot.slane %v508_v26, 1  ;;  %v509_v48 = vld [vmem:[%s3814_s18 + $0x78] sm:$0xff] }
  0x59   : > { %1243 = vmatmul.f32.gmra.mxu3 %v3998_v53  ;;  %v653_v63 = vrot.slane %v509_v48, 3  ;;  %v515_v53 = vld [vmem:[%s3814_s18 + $0xa8] sm:$0xff] }
  0x5e   : > { %943 = vmatmul.f32.gmra.mxu0 %v499_v42  ;;  %v4086_v42 = vsel %vm552_vm0, %v531_v22, %v532_v32 }
  0x5f   : > { %1044 = vmatmul.f32.gmra.mxu1 %v4007_v59  ;;  %1145 = vmatmul.f32.gmra.mxu2 %v4011_v60 }
  0x61   : > { %1246 = vmatmul.f32.gmra.mxu3 %v4017_v62 }
  0x66   : > { %946 = vmatmul.f32.gmra.mxu0 %v500_v51  ;;  %v649_v51 = vrot.slane %v505_v45, 3 }
  0x67   : > { %1047 = vmatmul.f32.gmra.mxu1 %v4026_v5  ;;  %1148 = vmatmul.f32.gmra.mxu2 %v4030_v6 }
  0x68   : > { %v4112_v57 = vsel %vm666_vm2, %v648_v39, %v649_v51  ;;  %v4134_v14 = vsel %vm666_vm2, %v649_v51, %v650_v4  ;;  %v652_v39 = vrot.slane %v508_v26, 3 }
  0x69   : > { %1249 = vmatmul.f32.gmra.mxu3 %v4036_v9  ;;  %6375 = vst [vmem:[#allocation21_spill] sm:$0xff] %v4112_v57 }
  0x6a   : > { %6376 = vst [vmem:[#allocation22_spill] sm:$0xff] %v4134_v14 }
  0x6e   : > { %949 = vmatmul.f32.gmra.mxu0 %v501_v61  ;;  %v534_v61 = vrot.slane %v506_v56, 1 }
  0x6f   : > { %1050 = vmatmul.f32.gmra.mxu1 %v4048_v18  ;;  %1151 = vmatmul.f32.gmra.mxu2 %v4052_v19 }
  0x70   : > { %v4140_v22 = vsel %vm552_vm0, %v534_v61, %v535_v15 }
  0x71   : > { %1252 = vmatmul.f32.gmra.mxu3 %v4058_v21 }
  0x76   : > { %952 = vmatmul.f32.gmra.mxu0 %v502_v7  ;;  %v4124_v7 = vsel %vm552_vm0, %v533_v47, %v534_v61  ;;  %v4166_v47 = vsel %vm609_vm1, %v594_v17, %v595_v38  ;;  %v596_v61 = vrot.slane %v509_v48, 2  ;;  %v4194_v17 = vsel %vm666_vm2, %v652_v39, %v653_v63 }
  0x77   : > { %1053 = vmatmul.f32.gmra.mxu1 %v4064_v28  ;;  %1154 = vmatmul.f32.gmra.mxu2 %v4068_v29  ;;  %6379 = vst [vmem:[#allocation25_spill] sm:$0xff] %v4194_v17 }
  0x79   : > { %1255 = vmatmul.f32.gmra.mxu3 %v4074_v31  ;;  %v513_v31 = vld [vmem:[%s3814_s18 + $0x98] sm:$0xff] }
  0x7e   : > { %955 = vmatmul.f32.gmra.mxu0 %v503_v20  ;;  %v651_v20 = vrot.slane %v507_v13, 3 }
  0x7f   : > { %1056 = vmatmul.f32.gmra.mxu1 %v4086_v42  ;;  %1157 = vmatmul.f32.gmra.mxu2 %v4090_v44 }
  0x80   : > { %v4153_v32 = vsel %vm666_vm2, %v650_v4, %v651_v20  ;;  %v4172_v51 = vsel %vm666_vm2, %v651_v20, %v652_v39  ;;  %v4185_v4 = vsel %vm609_vm1, %v595_v38, %v596_v61  ;;  %v511_v38 = vld [vmem:[%s3814_s18 + $0x88] sm:$0xff] }
  0x81   : > { %1258 = vmatmul.f32.gmra.mxu3 %v4096_v46  ;;  %6377 = vst [vmem:[#allocation23_spill] sm:$0xff] %v4153_v32 }
  0x82   : > { %6378 = vst [vmem:[#allocation24_spill] sm:$0xff] %v4172_v51 }
  0x86   : > { %958 = vmatmul.f32.gmra.mxu0 %v504_v30  ;;  %v892_v30 = vld [vmem:[%s6287_s2 + $0x460] sm:$0xff] }
  0x87   : > { %1059 = vmatmul.f32.gmra.mxu1 %v4102_v54  ;;  %1160 = vmatmul.f32.gmra.mxu2 %v4106_v55 }
  0x88   : > { %1325 = vmatpush.msrb.mxu0 %v892_v30 }
  0x89   : > { %1261 = vmatmul.f32.gmra.mxu3 %v4112_v57 }
  0x8a   : > { %1326 = vmatpush.msrb.mxu0 %v890_v3  ;;  %v539_v3 = vrot.slane %v511_v38, 1 }
  0x8e   : > { %961 = vmatmul.f32.gmra.mxu0 %v505_v45  ;;  %v4162_v45 = vsel %vm552_vm0, %v535_v15, %v536_v35  ;;  %v763_v15 = vld [vmem:[%s6287_s2 + $0x58] sm:$0xff] }
  0x8f   : > { %1062 = vmatmul.f32.gmra.mxu1 %v4124_v7  ;;  %1163 = vmatmul.f32.gmra.mxu2 %v4128_v12 }
  0x90   : > { %1427 = vmatpush.msrb.mxu1 %v763_v15  ;;  %v598_v15 = vrot.slane %v511_v38, 2 }
  0x91   : > { %1264 = vmatmul.f32.gmra.mxu3 %v4134_v14 }
  0x96   : > { %964 = vmatmul.f32.gmra.mxu0 %v506_v56  ;;  %v537_v56 = vrot.slane %v509_v48, 1 }
  0x97   : > { %1065 = vmatmul.f32.gmra.mxu1 %v4140_v22  ;;  %1166 = vmatmul.f32.gmra.mxu2 %v4144_v23 }
  0x98   : > { %v4178_v1 = vsel %vm552_vm0, %v536_v35, %v537_v56 }
  0x99   : > { %1267 = vmatmul.f32.gmra.mxu3 %v4153_v32 }
  0x9e   : > { %967 = vmatmul.f32.gmra.mxu0 %v507_v13  ;;  %v510_v13 = vld [vmem:[%s3814_s18 + $0x80] sm:$0xff] }
  0x9f   : > { %1068 = vmatmul.f32.gmra.mxu1 %v4162_v45  ;;  %1169 = vmatmul.f32.gmra.mxu2 %v4166_v47  ;;  %v538_v20 = vrot.slane %v510_v13, 1  ;;  %v597_v30 = vrot.slane %v510_v13, 2  ;;  %v654_v35 = vrot.slane %v510_v13, 3 }
  0xa1   : > { %1270 = vmatmul.f32.gmra.mxu3 %v4172_v51  ;;  %v4200_v37 = vsel %vm552_vm0, %v537_v56, %v538_v20  ;;  %v4210_v39 = vsel %vm666_vm2, %v653_v63, %v654_v35  ;;  %v888_v56 = vld [vmem:[%s6287_s2 + $0x440] sm:$0xff]  ;;  %v4219_v2 = vsel %vm552_vm0, %v538_v20, %v539_v3  ;;  %v761_v63 = vld [vmem:[%s6287_s2 + $0x48] sm:$0xff]  ;;  %v4226_v0 = vsel %vm609_vm1, %v597_v30, %v598_v15 }
  0xa2   : > { %6380 = vst [vmem:[#allocation26_spill] sm:$0xff] %v4210_v39  ;;  %1327 = vmatpush.msrb.mxu0 %v888_v56  ;;  %1428 = vmatpush.msrb.mxu1 %v761_v63 }
  0xa6   : > { %970 = vmatmul.f32.gmra.mxu0 %v508_v26  ;;  %v4204_v26 = vsel %vm609_vm1, %v596_v61, %v597_v30  ;;  %v655_v61 = vrot.slane %v511_v38, 3 }
  0xa7   : > { %1071 = vmatmul.f32.gmra.mxu1 %v4178_v1  ;;  %1172 = vmatmul.f32.gmra.mxu2 %v4185_v4 }
  0xa8   : > { %v4232_v56 = vsel %vm666_vm2, %v654_v35, %v655_v61 }
  0xa9   : > { %1273 = vmatmul.f32.gmra.mxu3 %v4194_v17  ;;  %6381 = vst [vmem:[#allocation27_spill] sm:$0xff] %v4232_v56 }
  0xae   : > { %973 = vmatmul.f32.gmra.mxu0 %v509_v48 }
  0xaf   : > { %1074 = vmatmul.f32.gmra.mxu1 %v4200_v37  ;;  %1175 = vmatmul.f32.gmra.mxu2 %v4204_v26 }
  0xb1   : > { %1276 = vmatmul.f32.gmra.mxu3 %v4210_v39  ;;  %v512_v39 = vld [vmem:[%s3814_s18 + $0x90] sm:$0xff] }
  0xb2   : > { %v540_v20 = vrot.slane %v512_v39, 1  ;;  %v599_v17 = vrot.slane %v512_v39, 2  ;;  %v656_v30 = vrot.slane %v512_v39, 3 }
  0xb3   : > { %v929_v8 = vpop.f32.mrf.mxu0 }
  0xb4   : > { %v1030_v48 = vpop.f32.mrf.mxu1  ;;  %v4242_v35 = vsel %vm609_vm1, %v598_v15, %v599_v17 }
  0xb5   : > { %v1031_v51 = vadd.f32 %v1030_v48, %v929_v8  ;;  %v4250_v8 = vsel %vm666_vm2, %v655_v61, %v656_v30 }
  0xb6   : > { %976 = vmatmul.f32.gmra.mxu0 %v510_v13  ;;  %v4238_v13 = vsel %vm552_vm0, %v539_v3, %v540_v20  ;;  %6383 = vst [vmem:[#allocation29_spill] sm:$0xff] %v4250_v8  ;;  %v600_v3 = vrot.slane %v513_v31, 2 }
  0xb7   : > { %1077 = vmatmul.f32.gmra.mxu1 %v4219_v2  ;;  %1178 = vmatmul.f32.gmra.mxu2 %v4226_v0 }
  0xb9   : > { %1279 = vmatmul.f32.gmra.mxu3 %v4232_v56 }
  0xba   : > { %v1131_v32 = vpop.f32.mrf.mxu2 }
  0xbb   : > { %v1132_v14 = vadd.f32 %v1131_v32, %v1031_v51  ;;  %v932_v57 = vpop.f32.mrf.mxu0  ;;  %v541_v32 = vrot.slane %v513_v31, 1  ;;  %v886_v51 = vld [vmem:[%s6287_s2 + $0x430] sm:$0xff] }
  0xbc   : > { %v1033_v63 = vpop.f32.mrf.mxu1  ;;  %v1232_v46 = vpop.f32.mrf.mxu3  ;;  %1328 = vmatpush.msrb.mxu0 %v886_v51 }
  0xbd   : > { %v4245_v21 = vadd.f32 %v1232_v46, %v1132_v14  ;;  %v1034_v15 = vadd.f32 %v1033_v63, %v932_v57  ;;  %v759_v46 = vld [vmem:[%s6287_s2 + $0x38] sm:$0xff]  ;;  %v4266_v57 = vsel %vm609_vm1, %v599_v17, %v600_v3  ;;  %v514_v63 = vld [vmem:[%s3814_s18 + $0xa0] sm:$0xff] }
  0xbe   : > { %979 = vmatmul.f32.gmra.mxu0 %v511_v38  ;;  %v657_v38 = vrot.slane %v513_v31, 3  ;;  %1429 = vmatpush.msrb.mxu1 %v759_v46  ;;  %v601_v46 = vrot.slane %v514_v63, 2 }
  0xbf   : > { %6382 = vst [vmem:[#allocation28_spill] sm:$0xff] %v4245_v21  ;;  %1080 = vmatmul.f32.gmra.mxu1 %v4238_v13  ;;  %1181 = vmatmul.f32.gmra.mxu2 %v4242_v35  ;;  %v4262_v21 = vsel %vm552_vm0, %v540_v20, %v541_v32  ;;  %v542_v20 = vrot.slane %v514_v63, 1 }
  0xc1   : > { %1282 = vmatmul.f32.gmra.mxu3 %v4250_v8  ;;  %v658_v8 = vrot.slane %v514_v63, 3 }
  0xc2   : > { %v1134_v14 = vpop.f32.mrf.mxu2 }
  0xc3   : > { %v1135_v61 = vadd.f32 %v1134_v14, %v1034_v15  ;;  %v935_v48 = vpop.f32.mrf.mxu0  ;;  %v4274_v15 = vsel %vm666_vm2, %v656_v30, %v657_v38  ;;  %v4284_v30 = vsel %vm609_vm1, %v600_v3, %v601_v46  ;;  %v602_v3 = vrot.slane %v515_v53, 2 }
  0xc4   : > { %v1036_v56 = vpop.f32.mrf.mxu1  ;;  %v1235_v9 = vpop.f32.mrf.mxu3  ;;  %6385 = vst [vmem:[#allocation31_spill] sm:$0xff] %v4274_v15 }
  0xc5   : > { %v4269_v51 = vadd.f32 %v1235_v9, %v1135_v61  ;;  %v1037_v14 = vadd.f32 %v1036_v56, %v935_v48  ;;  %6386 = vst [vmem:[#allocation32_spill] sm:$0xff] %v4284_v30  ;;  %v884_v56 = vld [vmem:[%s6287_s2 + $0x420] sm:$0xff]  ;;  %v4295_v48 = vsel %vm666_vm2, %v657_v38, %v658_v8 }
  0xc6   : > { %982 = vmatmul.f32.gmra.mxu0 %v512_v39  ;;  %v4280_v39 = vsel %vm552_vm0, %v541_v32, %v542_v20  ;;  %6388 = vst [vmem:[#allocation34_spill] sm:$0xff] %v4295_v48  ;;  %v543_v32 = vrot.slane %v515_v53, 1 }
  0xc7   : > { %6384 = vst [vmem:[#allocation30_spill] sm:$0xff] %v4269_v51  ;;  %1083 = vmatmul.f32.gmra.mxu1 %v4262_v21  ;;  %1184 = vmatmul.f32.gmra.mxu2 %v4266_v57 }
  0xc8   : > { %1329 = vmatpush.msrb.mxu0 %v884_v56  ;;  %v4308_v56 = vsel %vm609_vm1, %v601_v46, %v602_v3  ;;  %v815_v46 = vld [vmem:[%s6287_s2 + $0x1f8] sm:$0xff] }
  0xc9   : > { %1285 = vmatmul.f32.gmra.mxu3 %v4274_v15  ;;  %6390 = vst [vmem:[#allocation36_spill] sm:$0xff] %v4308_v56  ;;  %1518 = vmatpush.msrb.mxu2 %v815_v46 }
  0xca   : > { %v1137_v17 = vpop.f32.mrf.mxu2 }
  0xcb   : > { %v1138_v62 = vadd.f32 %v1137_v17, %v1037_v14  ;;  %v938_v9 = vpop.f32.mrf.mxu0  ;;  %v659_v14 = vrot.slane %v515_v53, 3 }
  0xcc   : > { %v1039_v61 = vpop.f32.mrf.mxu1  ;;  %v1238_v51 = vpop.f32.mrf.mxu3 }
  0xcd   : > { %v4287_v43 = vadd.f32 %v1238_v51, %v1138_v62  ;;  %v757_v62 = vld [vmem:[%s6287_s2 + $0x28] sm:$0xff]  ;;  %v1040_v51 = vadd.f32 %v1039_v61, %v938_v9  ;;  %v4318_v9 = vsel %vm666_vm2, %v658_v8, %v659_v14  ;;  %v603_v61 = vrot.slane %v4311_v27, 2 }
  0xce   : > { %985 = vmatmul.f32.gmra.mxu0 %v513_v31  ;;  %1430 = vmatpush.msrb.mxu1 %v757_v62  ;;  %6392 = vst [vmem:[#allocation38_spill] sm:$0xff] %v4318_v9  ;;  %v813_v8 = vld [vmem:[%s6287_s2 + $0x1e8] sm:$0xff] }
  0xcf   : > { %6387 = vst [vmem:[#allocation33_spill] sm:$0xff] %v4287_v43  ;;  %1086 = vmatmul.f32.gmra.mxu1 %v4280_v39  ;;  %1187 = vmatmul.f32.gmra.mxu2 %v4284_v30  ;;  %v4304_v43 = vsel %vm552_vm0, %v542_v20, %v543_v32  ;;  %v544_v20 = vrot.slane %v4311_v27, 1  ;;  %v4444_v30 = vld [vmem:[%s3814_s18 + $0xc8] sm:$0xff] }
  0xd0   : > { %6389 = vst [vmem:[#allocation35_spill] sm:$0xff] %v4304_v43  ;;  %1519 = vmatpush.msrb.mxu2 %v813_v8  ;;  %v845_v8 = vld [vmem:[%s6287_s2 + $0x2e8] sm:$0xff] }
  0xd1   : > { %1288 = vmatmul.f32.gmra.mxu3 %v4295_v48 }
  0xd2   : > { %v1140_v31 = vpop.f32.mrf.mxu2 }
  0xd3   : > { %v1141_v17 = vadd.f32 %v1140_v31, %v1040_v51  ;;  %v941_v15 = vpop.f32.mrf.mxu0  ;;  %v660_v31 = vrot.slane %v4311_v27, 3 }
  0xd4   : > { %v1042_v38 = vpop.f32.mrf.mxu1  ;;  %v1241_v36 = vpop.f32.mrf.mxu3 }
  0xd5   : > { %v4313_v62 = vadd.f32 %v1241_v36, %v1141_v17  ;;  %v1043_v36 = vadd.f32 %v1042_v38, %v941_v15  ;;  %v4336_v15 = vsel %vm552_vm0, %v543_v32, %v544_v20  ;;  %v882_v38 = vld [vmem:[%s6287_s2 + $0x410] sm:$0xff] }
  0xd6   : > { %988 = vmatmul.f32.gmra.mxu0 %v514_v63  ;;  %v847_v63 = vld [vmem:[%s6287_s2 + $0x2f8] sm:$0xff]  ;;  %6393 = vst [vmem:[#allocation39_spill] sm:$0xff] %v4336_v15 }
  0xd7   : > { %6391 = vst [vmem:[#allocation37_spill] sm:$0xff] %v4313_v62  ;;  %1089 = vmatmul.f32.gmra.mxu1 %v4304_v43  ;;  %1190 = vmatmul.f32.gmra.mxu2 %v4308_v56  ;;  %v755_v62 = vld [vmem:[%s6287_s2 + $0x18] sm:$0xff] }
  0xd8   : > { %1619 = vmatpush.msrb.mxu3 %v847_v63  ;;  %1330 = vmatpush.msrb.mxu0 %v882_v38  ;;  %v807_v38 = vld [vmem:[%s6287_s2 + $0x1b8] sm:$0xff] }
  0xd9   : > { %1291 = vmatmul.f32.gmra.mxu3 %v4318_v9  ;;  %v811_v9 = vld [vmem:[%s6287_s2 + $0x1d8] sm:$0xff]  ;;  %1431 = vmatpush.msrb.mxu1 %v755_v62  ;;  %v805_v62 = vld [vmem:[%s6287_s2 + $0x1a8] sm:$0xff] }
  0xda   : > { %v1143_v51 = vpop.f32.mrf.mxu2  ;;  %1520 = vmatpush.msrb.mxu2 %v811_v9  ;;  %1620 = vmatpush.msrb.mxu3 %v845_v8  ;;  %v4368_v9 = vsel %vm666_vm2, %v659_v14, %v660_v31  ;;  %v841_v8 = vld [vmem:[%s6287_s2 + $0x2c8] sm:$0xff] }
  0xdb   : > { %v1144_v17 = vadd.f32 %v1143_v51, %v1043_v36  ;;  %v944_v48 = vpop.f32.mrf.mxu0  ;;  %v4349_v36 = vsel %vm609_vm1, %v602_v3, %v603_v61  ;;  %v4352_v51 = vld [vmem:[%s3814_s18 + $0xb8] sm:$0xff]  ;;  %6396 = vst [vmem:[#allocation42_spill] sm:$0xff] %v4368_v9 }
  0xdc   : > { %v1045_v46 = vpop.f32.mrf.mxu1  ;;  %v1244_v63 = vpop.f32.mrf.mxu3  ;;  %6394 = vst [vmem:[#allocation40_spill] sm:$0xff] %v4349_v36  ;;  %v843_v3 = vld [vmem:[%s6287_s2 + $0x2d8] sm:$0xff]  ;;  %1521 = vmatpush.msrb.mxu2 %v809_v16 }
  0xdd   : > { %v4354_v32 = vadd.f32 %v1244_v63, %v1144_v17  ;;  %v545_v17 = vrot.slane %v4352_v51, 1  ;;  %1621 = vmatpush.msrb.mxu3 %v843_v3  ;;  %v1046_v14 = vadd.f32 %v1045_v46, %v944_v48  ;;  %v839_v63 = vld [vmem:[%s6287_s2 + $0x2b8] sm:$0xff] }
  0xde   : > { %991 = vmatmul.f32.gmra.mxu0 %v515_v53  ;;  %v604_v53 = vrot.slane %v4352_v51, 2  ;;  %1522 = vmatpush.msrb.mxu2 %v807_v38  ;;  %v837_v38 = vld [vmem:[%s6287_s2 + $0x2a8] sm:$0xff] }
  0xdf   : > { %6395 = vst [vmem:[#allocation41_spill] sm:$0xff] %v4354_v32  ;;  %1092 = vmatmul.f32.gmra.mxu1 %v4336_v15  ;;  %1193 = vmatmul.f32.gmra.mxu2 %v4349_v36  ;;  %v661_v36 = vrot.slane %v4352_v51, 3  ;;  %v4389_v48 = vsel %vm552_vm0, %v544_v20, %v545_v17  ;;  %v803_v20 = vld [vmem:[%s6287_s2 + $0x198] sm:$0xff] }
  0xe0   : > { %1622 = vmatpush.msrb.mxu3 %v841_v8  ;;  %6397 = vst [vmem:[#allocation43_spill] sm:$0xff] %v4389_v48  ;;  %v4393_v3 = vsel %vm609_vm1, %v603_v61, %v604_v53  ;;  %1523 = vmatpush.msrb.mxu2 %v805_v62 }
  0xe1   : > { %1294 = vmatmul.f32.gmra.mxu3 %v4368_v9  ;;  %6398 = vst [vmem:[#allocation44_spill] sm:$0xff] %v4393_v3  ;;  %v4396_v9 = vld [vmem:[%s3814_s18 + $0xc0] sm:$0xff]  ;;  %v4410_v61 = vsel %vm666_vm2, %v660_v31, %v661_v36  ;;  %v799_v31 = vld [vmem:[%s6287_s2 + $0x178] sm:$0xff] }
  0xe2   : > { %v1146_v32 = vpop.f32.mrf.mxu2  ;;  %6399 = vst [vmem:[#allocation45_spill] sm:$0xff] %v4396_v9  ;;  %1623 = vmatpush.msrb.mxu3 %v839_v63  ;;  %v546_v8 = vrot.slane %v4396_v9, 1  ;;  %1524 = vmatpush.msrb.mxu2 %v803_v20  ;;  %v833_v63 = vld [vmem:[%s6287_s2 + $0x288] sm:$0xff] }
  0xe3   : > { %v1147_v15 = vadd.f32 %v1146_v32, %v1046_v14  ;;  %v947_v16 = vpop.f32.mrf.mxu0  ;;  %6401 = vst [vmem:[#allocation47_spill] sm:$0xff] %v4410_v61  ;;  %v835_v14 = vld [vmem:[%s6287_s2 + $0x298] sm:$0xff] }
  0xe4   : > { %v1048_v56 = vpop.f32.mrf.mxu1  ;;  %v1247_v46 = vpop.f32.mrf.mxu3  ;;  %1624 = vmatpush.msrb.mxu3 %v837_v38 }
  0xe5   : > { %v4401_v32 = vadd.f32 %v1247_v46, %v1147_v15  ;;  %v801_v15 = vld [vmem:[%s6287_s2 + $0x188] sm:$0xff]  ;;  %v1049_v62 = vadd.f32 %v1048_v56, %v947_v16  ;;  %v880_v46 = vld [vmem:[%s6287_s2 + $0x400] sm:$0xff] }
  0xe6   : > { %994 = vmatmul.f32.gmra.mxu0 %v4311_v27  ;;  %v605_v27 = vrot.slane %v4396_v9, 2  ;;  %1525 = vmatpush.msrb.mxu2 %v801_v15  ;;  %v831_v15 = vld [vmem:[%s6287_s2 + $0x278] sm:$0xff] }
  0xe7   : > { %6400 = vst [vmem:[#allocation46_spill] sm:$0xff] %v4401_v32  ;;  %1095 = vmatmul.f32.gmra.mxu1 %v4389_v48  ;;  %1196 = vmatmul.f32.gmra.mxu2 %v4393_v3  ;;  %v662_v32 = vrot.slane %v4396_v9, 3  ;;  %v753_v3 = vld [vmem:[%s6287_s2 + $0x8] sm:$0xff] }
  0xe8   : > { %1625 = vmatpush.msrb.mxu3 %v835_v14  ;;  %1331 = vmatpush.msrb.mxu0 %v880_v46  ;;  %v4441_v43 = vsel %vm609_vm1, %v604_v53, %v605_v27  ;;  %v797_v14 = vld [vmem:[%s6287_s2 + $0x168] sm:$0xff]  ;;  %v827_v46 = vld [vmem:[%s6287_s2 + $0x258] sm:$0xff] }
  0xe9   : > { %1297 = vmatmul.f32.gmra.mxu3 %v4410_v61  ;;  %v4434_v61 = vsel %vm552_vm0, %v545_v17, %v546_v8  ;;  %6403 = vst [vmem:[#allocation49_spill] sm:$0xff] %v4441_v43  ;;  %1526 = vmatpush.msrb.mxu2 %v799_v31  ;;  %v4458_v53 = vsel %vm666_vm2, %v661_v36, %v662_v32  ;;  %v606_v31 = vrot.slane %v4444_v30, 2  ;;  %v793_v36 = vld [vmem:[%s6287_s2 + $0x148] sm:$0xff] }
  0xea   : > { %v1149_v38 = vpop.f32.mrf.mxu2  ;;  %6402 = vst [vmem:[#allocation48_spill] sm:$0xff] %v4434_v61  ;;  %1626 = vmatpush.msrb.mxu3 %v833_v63  ;;  %1432 = vmatpush.msrb.mxu1 %v753_v3  ;;  %v829_v3 = vld [vmem:[%s6287_s2 + $0x268] sm:$0xff] }
  0xeb   : > { %v1150_v56 = vadd.f32 %v1149_v38, %v1049_v62  ;;  %v950_v16 = vpop.f32.mrf.mxu0  ;;  %6405 = vst [vmem:[#allocation51_spill] sm:$0xff] %v4458_v53  ;;  %v547_v62 = vrot.slane %v4444_v30, 1  ;;  %1527 = vmatpush.msrb.mxu2 %v797_v14  ;;  %v4483_v14 = vsel %vm609_vm1, %v605_v27, %v606_v31 }
  0xec   : > { %v1051_v20 = vpop.f32.mrf.mxu1  ;;  %v1250_v48 = vpop.f32.mrf.mxu3  ;;  %1627 = vmatpush.msrb.mxu3 %v831_v15  ;;  %6407 = vst [vmem:[#allocation53_spill] sm:$0xff] %v4483_v14 }
  0xed   : > { %v4449_v17 = vadd.f32 %v1250_v48, %v1150_v56  ;;  %v795_v48 = vld [vmem:[%s6287_s2 + $0x158] sm:$0xff]  ;;  %v1052_v63 = vadd.f32 %v1051_v20, %v950_v16  ;;  %v663_v56 = vrot.slane %v4444_v30, 3  ;;  %v4479_v16 = vsel %vm552_vm0, %v546_v8, %v547_v62 }
  0xee   : > { %997 = vmatmul.f32.gmra.mxu0 %v4352_v51  ;;  %1528 = vmatpush.msrb.mxu2 %v795_v48  ;;  %6406 = vst [vmem:[#allocation52_spill] sm:$0xff] %v4479_v16  ;;  %v825_v48 = vld [vmem:[%s6287_s2 + $0x248] sm:$0xff]  ;;  %v791_v8 = vld [vmem:[%s6287_s2 + $0x138] sm:$0xff] }
  0xef   : > { %6404 = vst [vmem:[#allocation50_spill] sm:$0xff] %v4449_v17  ;;  %1098 = vmatmul.f32.gmra.mxu1 %v4434_v61  ;;  %1199 = vmatmul.f32.gmra.mxu2 %v4441_v43  ;;  %v4500_v27 = vsel %vm666_vm2, %v662_v32, %v663_v56 }
  0xf0   : > { %1628 = vmatpush.msrb.mxu3 %v829_v3  ;;  %1529 = vmatpush.msrb.mxu2 %v793_v36  ;;  %6409 = vst [vmem:[#allocation55_spill] sm:$0xff] %v4500_v27  ;;  %v789_v36 = vld [vmem:[%s6287_s2 + $0x128] sm:$0xff] }
  0xf1   : > { %1300 = vmatmul.f32.gmra.mxu3 %v4458_v53  ;;  %v4486_v53 = vld [vmem:[%s3814_s18 + $0xd0] sm:$0xff] }
  0xf2   : > { %v1152_v38 = vpop.f32.mrf.mxu2  ;;  %1629 = vmatpush.msrb.mxu3 %v827_v46  ;;  %v823_v46 = vld [vmem:[%s6287_s2 + $0x238] sm:$0xff]  ;;  %v607_v32 = vrot.slane %v4486_v53, 2  ;;  %1530 = vmatpush.msrb.mxu2 %v791_v8  ;;  %v664_v8 = vrot.slane %v4486_v53, 3 }
  0xf3   : > { %v1153_v15 = vadd.f32 %v1152_v38, %v1052_v63  ;;  %v953_v17 = vpop.f32.mrf.mxu0  ;;  %v548_v63 = vrot.slane %v4486_v53, 1  ;;  %v879_v38 = vld [vmem:[%s6287_s2 + $0x3f8] sm:$0xff] }
  0xf4   : > { %v1054_v43 = vpop.f32.mrf.mxu1  ;;  %v1253_v20 = vpop.f32.mrf.mxu3  ;;  %1630 = vmatpush.msrb.mxu3 %v825_v48  ;;  %1720 = vmatpush.msra.mxu0 %v879_v38  ;;  %v821_v48 = vld [vmem:[%s6287_s2 + $0x228] sm:$0xff]  ;;  %v4531_v61 = vsel %vm609_vm1, %v606_v31, %v607_v32  ;;  %v4548_v31 = vsel %vm666_vm2, %v663_v56, %v664_v8 }
  0xf5   : > { %v4491_v3 = vadd.f32 %v1253_v20, %v1153_v15  ;;  %v1055_v15 = vadd.f32 %v1054_v43, %v953_v17  ;;  %v787_v20 = vld [vmem:[%s6287_s2 + $0x118] sm:$0xff]  ;;  %1531 = vmatpush.msrb.mxu2 %v789_v36  ;;  %6411 = vst [vmem:[#allocation57_spill] sm:$0xff] %v4531_v61 }
  0xf6   : > { %1000 = vmatmul.f32.gmra.mxu0 %v4396_v9  ;;  %1631 = vmatpush.msrb.mxu3 %v823_v46  ;;  %v4534_v9 = vld [vmem:[%s3814_s18 + $0xd8] sm:$0xff]  ;;  %6413 = vst [vmem:[#allocation59_spill] sm:$0xff] %v4548_v31 }
  0xf7   : > { %6408 = vst [vmem:[#allocation54_spill] sm:$0xff] %v4491_v3  ;;  %1101 = vmatmul.f32.gmra.mxu1 %v4479_v16  ;;  %1202 = vmatmul.f32.gmra.mxu2 %v4483_v14  ;;  %v911_v3 = vld [vmem:[%s6287_s2 + $0x4f8] sm:$0xff]  ;;  %v608_v46 = vrot.slane %v4534_v9, 2 }
  0xf8   : > { %1821 = vmatpush.msra.mxu1 %v911_v3  ;;  %1532 = vmatpush.msrb.mxu2 %v787_v20  ;;  %v549_v3 = vrot.slane %v4534_v9, 1 }
  0xf9   : > { %1303 = vmatmul.f32.gmra.mxu3 %v4500_v27  ;;  %v4527_v27 = vsel %vm552_vm0, %v547_v62, %v548_v63  ;;  %v785_v62 = vld [vmem:[%s6287_s2 + $0x108] sm:$0xff] }
  0xfa   : > { %v1155_v14 = vpop.f32.mrf.mxu2  ;;  %6410 = vst [vmem:[#allocation56_spill] sm:$0xff] %v4527_v27  ;;  %1632 = vmatpush.msrb.mxu3 %v821_v48  ;;  %1533 = vmatpush.msrb.mxu2 %v785_v62  ;;  %v665_v48 = vrot.slane %v4534_v9, 3 }
  0xfb   : > { %v1156_v43 = vadd.f32 %v1155_v14, %v1055_v15  ;;  %v956_v17 = vpop.f32.mrf.mxu0  ;;  %v819_v14 = vld [vmem:[%s6287_s2 + $0x218] sm:$0xff] }
  0xfc   : > { %v1057_v38 = vpop.f32.mrf.mxu1  ;;  %v1256_v16 = vpop.f32.mrf.mxu3  ;;  %1633 = vmatpush.msrb.mxu3 %v819_v14  ;;  %v4560_v14 = vsel %vm552_vm0, %v548_v63, %v549_v3 }
  0xfd   : > { %v4539_v36 = vadd.f32 %v1256_v16, %v1156_v43  ;;  %v817_v16 = vld [vmem:[%s6287_s2 + $0x208] sm:$0xff]  ;;  %v1058_v15 = vadd.f32 %v1057_v38, %v956_v17  ;;  %v4575_v38 = vsel %vm666_vm2, %v664_v8, %v665_v48  ;;  %v6416_v8 = vrot.slane %v3843_v58, 1 }
  0xfe   : > { %1003 = vmatmul.f32.gmra.mxu0 %v4444_v30  ;;  %1634 = vmatpush.msrb.mxu3 %v817_v16  ;;  %v877_v17 = vld [vmem:[%s6287_s2 + $0x3e8] sm:$0xff]  ;;  %6415 = vst [vmem:[#allocation61_spill] sm:$0xff] %v4575_v38 }
  0xff   : > { %6412 = vst [vmem:[#allocation58_spill] sm:$0xff] %v4539_v36  ;;  %1104 = vmatmul.f32.gmra.mxu1 %v4527_v27  ;;  %1205 = vmatmul.f32.gmra.mxu2 %v4531_v61  ;;  %v4564_v27 = vsel %vm609_vm1, %v607_v32, %v608_v46 }
 0x100   : > { %1721 = vmatpush.msra.mxu0 %v877_v17 }
 0x101   : > { %1306 = vmatmul.f32.gmra.mxu3 %v4548_v31  ;;  %v6417_v31 = vrot.slane %v3843_v58, 2 }
 0x102   : > { %v1158_v20 = vpop.f32.mrf.mxu2 }
 0x103   : > { %v1159_v56 = vadd.f32 %v1158_v20, %v1058_v15  ;;  %v959_v43 = vpop.f32.mrf.mxu0 }
 0x104   : > { %v1060_v36 = vpop.f32.mrf.mxu1  ;;  %v1259_v61 = vpop.f32.mrf.mxu3 }
 0x105   : > { %v4566_v62 = vadd.f32 %v1259_v61, %v1159_v56  ;;  %v909_v61 = vld [vmem:[%s6287_s2 + $0x4e8] sm:$0xff]  ;;  %v1061_v63 = vadd.f32 %v1060_v36, %v959_v43  ;;  %v4586_v56 = vsel %vm552_vm0, %v549_v3, %v6416_v8  ;;  %v6419_v43 = vrot.slane %v3843_v58, 3  ;;  %v4606_v3 = vld [vmem:[%s3814_s18] sm:$0xff] }
 0x106   : > { %1006 = vmatmul.f32.gmra.mxu0 %v4486_v53  ;;  %1822 = vmatpush.msra.mxu1 %v909_v61  ;;  %v4592_v61 = vsel %vm609_vm1, %v608_v46, %v6417_v31  ;;  %v3441_v31 = vld [vmem:[%s3814_s18 + $0x8] sm:$0xff] }
 0x107   : > { %6414 = vst [vmem:[#allocation60_spill] sm:$0xff] %v4566_v62  ;;  %1107 = vmatmul.f32.gmra.mxu1 %v4560_v14  ;;  %1208 = vmatmul.f32.gmra.mxu2 %v4564_v27  ;;  %v696_v46 = vrot.slane %v3441_v31, 4 }
 0x109   : > { %1309 = vmatmul.f32.gmra.mxu3 %v4575_v38 }
 0x10a   : > { %v1161_v32 = vpop.f32.mrf.mxu2 }
 0x10b   : > { %v1162_v16 = vadd.f32 %v1161_v32, %v1061_v63  ;;  %v962_v15 = vpop.f32.mrf.mxu0  ;;  %v4602_v63 = vsel %vm666_vm2, %v665_v48, %v6419_v43  ;;  %v6344_v32 = vrot.slane %v4606_v3, 4  ;;  %v875_v43 = vld [vmem:[%s6287_s2 + $0x3d8] sm:$0xff] }
 0x10c   : > { %v1063_v20 = vpop.f32.mrf.mxu1  ;;  %v1262_v17 = vpop.f32.mrf.mxu3  ;;  %6420 = vst [vmem:[#allocation63_spill] sm:$0xff] %v4602_v63  ;;  %1722 = vmatpush.msra.mxu0 %v875_v43 }
 0x10d   : > { %v4594_v36 = vadd.f32 %v1262_v17, %v1162_v16  ;;  %v1064_v16 = vadd.f32 %v1063_v20, %v962_v15  ;;  %v4616_v48 = vsel %vm723_vm3, %v6344_v32, %v696_v46  ;;  %v907_v15 = vld [vmem:[%s6287_s2 + $0x4d8] sm:$0xff]  ;;  %v3442_v20 = vld [vmem:[%s3814_s18 + $0x10] sm:$0xff] }
 0x10e   : > { %1009 = vmatmul.f32.gmra.mxu0 %v4534_v9  ;;  %6421 = vst [vmem:[#allocation64_spill] sm:$0xff] %v4616_v48  ;;  %1823 = vmatpush.msra.mxu1 %v907_v15 }
 0x10f   : > { %6418 = vst [vmem:[#allocation62_spill] sm:$0xff] %v4594_v36  ;;  %1110 = vmatmul.f32.gmra.mxu1 %v4586_v56  ;;  %1211 = vmatmul.f32.gmra.mxu2 %v4592_v61 }
 0x111   : > { %1312 = vmatmul.f32.gmra.mxu3 %v4602_v63 }
 0x112   : > { %v1164_v8 = vpop.f32.mrf.mxu2 }
 0x113   : > { %v1165_v58 = vadd.f32 %v1164_v8, %v1064_v16  ;;  %v965_v17 = vpop.f32.mrf.mxu0  ;;  %v697_v16 = vrot.slane %v3442_v20, 4 }
 0x114   : > { %v1066_v38 = vpop.f32.mrf.mxu1  ;;  %v1265_v36 = vpop.f32.mrf.mxu3 }
 0x115   : > { %v4621_v62 = vadd.f32 %v1265_v36, %v1165_v58  ;;  %v1067_v8 = vadd.f32 %v1066_v38, %v965_v17  ;;  %v4633_v63 = vsel %vm723_vm3, %v696_v46, %v697_v16 }
 0x116   : > { %1332 = vmatmul.f32.vlgmr.msrb.gmra.mxu0 %v4616_v48 }
 0x117   : > { %6422 = vst [vmem:[#allocation65_spill] sm:$0xff] %v4621_v62  ;;  %1433 = vmatmul.f32.vlgmr.msrb.gmra.mxu1 %v4606_v3  ;;  %1534 = vmatmul.f32.vlgmr.msrb.gmra.mxu2 %v3884_v10  ;;  %v3443_v10 = vld [vmem:[%s3814_s18 + $0x18] sm:$0xff] }
 0x118   : > { %v698_v38 = vrot.slane %v3443_v10, 4 }
 0x119   : > { %1635 = vmatmul.f32.vlgmr.msrb.gmra.mxu3 %v3891_v11  ;;  %v873_v11 = vld [vmem:[%s6287_s2 + $0x3c8] sm:$0xff] }
 0x11a   : > { %v1167_v43 = vpop.f32.mrf.mxu2  ;;  %1723 = vmatpush.msra.mxu0 %v873_v11 }
 0x11b   : > { %v1168_v36 = vadd.f32 %v1167_v43, %v1067_v8  ;;  %v968_v58 = vpop.f32.mrf.mxu0  ;;  %v3444_v43 = vld [vmem:[%s3814_s18 + $0x20] sm:$0xff] }
 0x11c   : > { %v1069_v32 = vpop.f32.mrf.mxu1  ;;  %v1268_v62 = vpop.f32.mrf.mxu3 }
 0x11d   : > { %v4635_v48 = vadd.f32 %v1268_v62, %v1168_v36  ;;  %v1070_v17 = vadd.f32 %v1069_v32, %v968_v58  ;;  %v699_v36 = vrot.slane %v3444_v43, 4 }
 0x11e   : > { %1335 = vmatmul.f32.gmra.mxu0 %v4633_v63 }
 0x11f   : > { %1436 = vmatmul.f32.gmra.mxu1 %v3441_v31  ;;  %1537 = vmatmul.f32.gmra.mxu2 %v3927_v24  ;;  %v4646_v31 = vsel %vm723_vm3, %v697_v16, %v698_v38  ;;  %v905_v24 = vld [vmem:[%s6287_s2 + $0x4c8] sm:$0xff] }
 0x120   : > { %1824 = vmatpush.msra.mxu1 %v905_v24  ;;  %v4659_v24 = vsel %vm723_vm3, %v698_v38, %v699_v36  ;;  %v903_v38 = vld [vmem:[%s6287_s2 + $0x4b8] sm:$0xff] }
 0x121   : > { %1638 = vmatmul.f32.gmra.mxu3 %v3931_v25 }
 0x122   : > { %v1170_v46 = vpop.f32.mrf.mxu2  ;;  %1825 = vmatpush.msra.mxu1 %v903_v38 }
 0x123   : > { %v1171_v15 = vadd.f32 %v1170_v46, %v1070_v17  ;;  %v971_v62 = vpop.f32.mrf.mxu0 }
 0x124   : > { %v1072_v8 = vpop.f32.mrf.mxu1  ;;  %v1271_v32 = vpop.f32.mrf.mxu3 }
 0x125   : > { %v4651_v25 = vadd.f32 %v1271_v32, %v1171_v15  ;;  %v1073_v58 = vadd.f32 %v1072_v8, %v971_v62 }
 0x126   : > { %1338 = vmatmul.f32.gmra.mxu0 %v4646_v31 }
 0x127   : > { %6423 = vst [vmem:[#allocation66_spill] sm:$0xff] %v4651_v25  ;;  %1439 = vmatmul.f32.gmra.mxu1 %v3442_v20  ;;  %1540 = vmatmul.f32.gmra.mxu2 %v3950_v33  ;;  %v3445_v33 = vld [vmem:[%s3814_s18 + $0x28] sm:$0xff] }
 0x128   : > { %v700_v20 = vrot.slane %v3445_v33, 4  ;;  %v6460_v25 = vld [vmem:[#allocation13_spill] sm:$0xff] }
 0x129   : > { %1641 = vmatmul.f32.gmra.mxu3 %v3954_v34  ;;  %v871_v34 = vld [vmem:[%s6287_s2 + $0x3b8] sm:$0xff] }
 0x12a   : > { %v1173_v16 = vpop.f32.mrf.mxu2  ;;  %1724 = vmatpush.msra.mxu0 %v871_v34 }
 0x12b   : > { %v1174_v17 = vadd.f32 %v1173_v16, %v1073_v58  ;;  %v974_v11 = vpop.f32.mrf.mxu0  ;;  %v4675_v16 = vsel %vm723_vm3, %v699_v36, %v700_v20 }
 0x12c   : > { %v1075_v46 = vpop.f32.mrf.mxu1  ;;  %v1274_v15 = vpop.f32.mrf.mxu3 }
 0x12d   : > { %v4661_v32 = vadd.f32 %v1274_v15, %v1174_v17  ;;  %v1076_v62 = vadd.f32 %v1075_v46, %v974_v11 }
 0x12e   : > { %1341 = vmatmul.f32.gmra.mxu0 %v4659_v24 }
 0x12f   : > { %6424 = vst [vmem:[#allocation67_spill] sm:$0xff] %v4661_v32  ;;  %1442 = vmatmul.f32.gmra.mxu1 %v3443_v10  ;;  %1543 = vmatmul.f32.gmra.mxu2 %v3966_v40 }
 0x131   : > { %1644 = vmatmul.f32.gmra.mxu3 %v3970_v41  ;;  %v3446_v41 = vld [vmem:[%s3814_s18 + $0x30] sm:$0xff] }
 0x132   : > { %v1176_v8 = vpop.f32.mrf.mxu2  ;;  %v701_v11 = vrot.slane %v3446_v41, 4 }
 0x133   : > { %v1177_v10 = vadd.f32 %v1176_v8, %v1076_v62  ;;  %v977_v58 = vpop.f32.mrf.mxu0 }
 0x134   : > { %v1078_v40 = vpop.f32.mrf.mxu1  ;;  %v1277_v17 = vpop.f32.mrf.mxu3  ;;  %v4685_v36 = vsel %vm723_vm3, %v700_v20, %v701_v11  ;;  %v901_v20 = vld [vmem:[%s6287_s2 + $0x4a8] sm:$0xff] }
 0x135   : > { %v4677_v15 = vadd.f32 %v1277_v17, %v1177_v10  ;;  %v1079_v46 = vadd.f32 %v1078_v40, %v977_v58  ;;  %1826 = vmatpush.msra.mxu1 %v901_v20 }
 0x136   : > { %1344 = vmatmul.f32.gmra.mxu0 %v4675_v16 }
 0x137   : > { %6425 = vst [vmem:[#allocation68_spill] sm:$0xff] %v4677_v15  ;;  %1445 = vmatmul.f32.gmra.mxu1 %v3444_v43  ;;  %1546 = vmatmul.f32.gmra.mxu2 %v3988_v49  ;;  %v869_v49 = vld [vmem:[%s6287_s2 + $0x3a8] sm:$0xff] }
 0x138   : > { %1725 = vmatpush.msra.mxu0 %v869_v49  ;;  %v3448_v49 = vld [vmem:[%s3814_s18 + $0x40] sm:$0xff] }
 0x139   : > { %1647 = vmatmul.f32.gmra.mxu3 %v3992_v50  ;;  %v3447_v50 = vld [vmem:[%s3814_s18 + $0x38] sm:$0xff] }
 0x13a   : > { %v1179_v34 = vpop.f32.mrf.mxu2  ;;  %v702_v43 = vrot.slane %v3447_v50, 4 }
 0x13b   : > { %v1180_v62 = vadd.f32 %v1179_v34, %v1079_v46  ;;  %v980_v38 = vpop.f32.mrf.mxu0 }
 0x13c   : > { %v1081_v8 = vpop.f32.mrf.mxu1  ;;  %v1280_v10 = vpop.f32.mrf.mxu3 }
 0x13d   : > { %v4687_v17 = vadd.f32 %v1280_v10, %v1180_v62  ;;  %v1082_v58 = vadd.f32 %v1081_v8, %v980_v38  ;;  %v703_v38 = vrot.slane %v3448_v49, 4 }
 0x13e   : > { %1347 = vmatmul.f32.gmra.mxu0 %v4685_v36 }
 0x13f   : > { %6426 = vst [vmem:[#allocation69_spill] sm:$0xff] %v4687_v17  ;;  %1448 = vmatmul.f32.gmra.mxu1 %v3445_v33  ;;  %1549 = vmatmul.f32.gmra.mxu2 %v4007_v59  ;;  %v4701_v33 = vsel %vm723_vm3, %v701_v11, %v702_v43  ;;  %v4711_v11 = vsel %vm723_vm3, %v702_v43, %v703_v38  ;;  %v3449_v43 = vld [vmem:[%s3814_s18 + $0x48] sm:$0xff] }
 0x141   : > { %1650 = vmatmul.f32.gmra.mxu3 %v4011_v60 }
 0x142   : > { %v1182_v40 = vpop.f32.mrf.mxu2 }
 0x143   : > { %v1183_v46 = vadd.f32 %v1182_v40, %v1082_v58  ;;  %v983_v34 = vpop.f32.mrf.mxu0 }
 0x144   : > { %v1084_v62 = vpop.f32.mrf.mxu1  ;;  %v1283_v59 = vpop.f32.mrf.mxu3 }
 0x145   : > { %v4703_v10 = vadd.f32 %v1283_v59, %v1183_v46  ;;  %v1085_v60 = vadd.f32 %v1084_v62, %v983_v34  ;;  %v704_v34 = vrot.slane %v3449_v43, 4 }
 0x146   : > { %1350 = vmatmul.f32.gmra.mxu0 %v4701_v33 }
 0x147   : > { %6427 = vst [vmem:[#allocation70_spill] sm:$0xff] %v4703_v10  ;;  %1451 = vmatmul.f32.gmra.mxu1 %v3446_v41  ;;  %1552 = vmatmul.f32.gmra.mxu2 %v4026_v5  ;;  %v867_v41 = vld [vmem:[%s6287_s2 + $0x398] sm:$0xff] }
 0x148   : > { %1726 = vmatpush.msra.mxu0 %v867_v41  ;;  %v4727_v41 = vsel %vm723_vm3, %v703_v38, %v704_v34 }
 0x149   : > { %1653 = vmatmul.f32.gmra.mxu3 %v4030_v6  ;;  %v899_v6 = vld [vmem:[%s6287_s2 + $0x498] sm:$0xff] }
 0x14a   : > { %v1185_v8 = vpop.f32.mrf.mxu2  ;;  %1827 = vmatpush.msra.mxu1 %v899_v6 }
 0x14b   : > { %v1186_v20 = vadd.f32 %v1185_v8, %v1085_v60  ;;  %v986_v58 = vpop.f32.mrf.mxu0 }
 0x14c   : > { %v1087_v40 = vpop.f32.mrf.mxu1  ;;  %v1286_v46 = vpop.f32.mrf.mxu3 }
 0x14d   : > { %v4716_v5 = vadd.f32 %v1286_v46, %v1186_v20  ;;  %v1088_v62 = vadd.f32 %v1087_v40, %v986_v58 }
 0x14e   : > { %1353 = vmatmul.f32.gmra.mxu0 %v4711_v11 }
 0x14f   : > { %6428 = vst [vmem:[#allocation71_spill] sm:$0xff] %v4716_v5  ;;  %1454 = vmatmul.f32.gmra.mxu1 %v3447_v50  ;;  %1555 = vmatmul.f32.gmra.mxu2 %v4048_v18  ;;  %v3450_v18 = vld [vmem:[%s3814_s18 + $0x50] sm:$0xff] }
 0x150   : > { %v705_v50 = vrot.slane %v3450_v18, 4 }
 0x151   : > { %1656 = vmatmul.f32.gmra.mxu3 %v4052_v19  ;;  %v865_v19 = vld [vmem:[%s6287_s2 + $0x388] sm:$0xff] }
 0x152   : > { %v1188_v59 = vpop.f32.mrf.mxu2  ;;  %1727 = vmatpush.msra.mxu0 %v865_v19 }
 0x153   : > { %v1189_v60 = vadd.f32 %v1188_v59, %v1088_v62  ;;  %v989_v8 = vpop.f32.mrf.mxu0 }
 0x154   : > { %v1090_v20 = vpop.f32.mrf.mxu1  ;;  %v1289_v46 = vpop.f32.mrf.mxu3 }
 0x155   : > { %v4729_v5 = vadd.f32 %v1289_v46, %v1189_v60  ;;  %v1091_v58 = vadd.f32 %v1090_v20, %v989_v8  ;;  %v3451_v60 = vld [vmem:[%s3814_s18 + $0x58] sm:$0xff] }
 0x156   : > { %1356 = vmatmul.f32.gmra.mxu0 %v4727_v41  ;;  %v706_v8 = vrot.slane %v3451_v60, 4 }
 0x157   : > { %6429 = vst [vmem:[#allocation72_spill] sm:$0xff] %v4729_v5  ;;  %1457 = vmatmul.f32.gmra.mxu1 %v3448_v49  ;;  %1558 = vmatmul.f32.gmra.mxu2 %v4064_v28  ;;  %v4740_v49 = vsel %vm723_vm3, %v704_v34, %v705_v50  ;;  %v897_v28 = vld [vmem:[%s6287_s2 + $0x488] sm:$0xff] }
 0x158   : > { %1828 = vmatpush.msra.mxu1 %v897_v28 }
 0x159   : > { %1659 = vmatmul.f32.gmra.mxu3 %v4068_v29 }
 0x15a   : > { %v1191_v38 = vpop.f32.mrf.mxu2 }
 0x15b   : > { %v1192_v40 = vadd.f32 %v1191_v38, %v1091_v58  ;;  %v992_v6 = vpop.f32.mrf.mxu0  ;;  %v4753_v38 = vsel %vm723_vm3, %v705_v50, %v706_v8  ;;  %v895_v50 = vld [vmem:[%s6287_s2 + $0x478] sm:$0xff] }
 0x15c   : > { %v1093_v62 = vpop.f32.mrf.mxu1  ;;  %v1292_v59 = vpop.f32.mrf.mxu3  ;;  %1829 = vmatpush.msra.mxu1 %v895_v50 }
 0x15d   : > { %v4745_v29 = vadd.f32 %v1292_v59, %v1192_v40  ;;  %v1094_v20 = vadd.f32 %v1093_v62, %v992_v6 }
 0x15e   : > { %1359 = vmatmul.f32.gmra.mxu0 %v4740_v49 }
 0x15f   : > { %6430 = vst [vmem:[#allocation73_spill] sm:$0xff] %v4745_v29  ;;  %1460 = vmatmul.f32.gmra.mxu1 %v3449_v43  ;;  %1561 = vmatmul.f32.gmra.mxu2 %v4086_v42  ;;  %v3452_v42 = vld [vmem:[%s3814_s18 + $0x60] sm:$0xff] }
 0x160   : > { %v707_v43 = vrot.slane %v3452_v42, 4 }
 0x161   : > { %1662 = vmatmul.f32.gmra.mxu3 %v4090_v44  ;;  %v863_v44 = vld [vmem:[%s6287_s2 + $0x378] sm:$0xff] }
 0x162   : > { %v1194_v34 = vpop.f32.mrf.mxu2  ;;  %1728 = vmatpush.msra.mxu0 %v863_v44 }
 0x163   : > { %v1195_v46 = vadd.f32 %v1194_v34, %v1094_v20  ;;  %v995_v58 = vpop.f32.mrf.mxu0  ;;  %v4769_v20 = vsel %vm723_vm3, %v706_v8, %v707_v43 }
 0x164   : > { %v1096_v19 = vpop.f32.mrf.mxu1  ;;  %v1295_v40 = vpop.f32.mrf.mxu3 }
 0x165   : > { %v4755_v28 = vadd.f32 %v1295_v40, %v1195_v46  ;;  %v1097_v6 = vadd.f32 %v1096_v19, %v995_v58 }
 0x166   : > { %1362 = vmatmul.f32.gmra.mxu0 %v4753_v38 }
 0x167   : > { %6431 = vst [vmem:[#allocation74_spill] sm:$0xff] %v4755_v28  ;;  %1463 = vmatmul.f32.gmra.mxu1 %v3450_v18  ;;  %1564 = vmatmul.f32.gmra.mxu2 %v4102_v54  ;;  %v6447_v28 = vld [vmem:[#allocation49_spill] sm:$0xff] }
 0x169   : > { %1665 = vmatmul.f32.gmra.mxu3 %v4106_v55  ;;  %v3453_v55 = vld [vmem:[%s3814_s18 + $0x68] sm:$0xff] }
 0x16a   : > { %v1197_v62 = vpop.f32.mrf.mxu2  ;;  %v708_v58 = vrot.slane %v3453_v55, 4 }
 0x16b   : > { %v1198_v18 = vadd.f32 %v1197_v62, %v1097_v6  ;;  %v998_v59 = vpop.f32.mrf.mxu0 }
 0x16c   : > { %v1099_v54 = vpop.f32.mrf.mxu1  ;;  %v1298_v34 = vpop.f32.mrf.mxu3  ;;  %v4779_v8 = vsel %vm723_vm3, %v707_v43, %v708_v58  ;;  %v893_v43 = vld [vmem:[%s6287_s2 + $0x468] sm:$0xff] }
 0x16d   : > { %v4771_v46 = vadd.f32 %v1298_v34, %v1198_v18  ;;  %v1100_v19 = vadd.f32 %v1099_v54, %v998_v59  ;;  %1830 = vmatpush.msra.mxu1 %v893_v43 }
 0x16e   : > { %1365 = vmatmul.f32.gmra.mxu0 %v4769_v20 }
 0x16f   : > { %6432 = vst [vmem:[#allocation75_spill] sm:$0xff] %v4771_v46  ;;  %1466 = vmatmul.f32.gmra.mxu1 %v3451_v60  ;;  %1567 = vmatmul.f32.gmra.mxu2 %v4124_v7  ;;  %v861_v7 = vld [vmem:[%s6287_s2 + $0x368] sm:$0xff] }
 0x170   : > { %1729 = vmatpush.msra.mxu0 %v861_v7 }
 0x171   : > { %1668 = vmatmul.f32.gmra.mxu3 %v4128_v12  ;;  %v3454_v12 = vld [vmem:[%s3814_s18 + $0x70] sm:$0xff] }
 0x172   : > { %v1200_v40 = vpop.f32.mrf.mxu2  ;;  %v709_v60 = vrot.slane %v3454_v12, 4 }
 0x173   : > { %v1201_v44 = vadd.f32 %v1200_v40, %v1100_v19  ;;  %v1001_v6 = vpop.f32.mrf.mxu0 }
 0x174   : > { %v1102_v50 = vpop.f32.mrf.mxu1  ;;  %v1301_v62 = vpop.f32.mrf.mxu3 }
 0x175   : > { %v4781_v18 = vadd.f32 %v1301_v62, %v1201_v44  ;;  %v1103_v59 = vadd.f32 %v1102_v50, %v1001_v6  ;;  %v3455_v62 = vld [vmem:[%s3814_s18 + $0x78] sm:$0xff] }
 0x176   : > { %1368 = vmatmul.f32.gmra.mxu0 %v4779_v8  ;;  %v710_v6 = vrot.slane %v3455_v62, 4 }
 0x177   : > { %6433 = vst [vmem:[#allocation76_spill] sm:$0xff] %v4781_v18  ;;  %1469 = vmatmul.f32.gmra.mxu1 %v3452_v42  ;;  %1570 = vmatmul.f32.gmra.mxu2 %v4140_v22  ;;  %v4795_v42 = vsel %vm723_vm3, %v708_v58, %v709_v60 }
 0x178   : > { %v4805_v58 = vsel %vm723_vm3, %v709_v60, %v710_v6  ;;  %v3456_v60 = vld [vmem:[%s3814_s18 + $0x80] sm:$0xff] }
 0x179   : > { %1671 = vmatmul.f32.gmra.mxu3 %v4144_v23 }
 0x17a   : > { %v1203_v54 = vpop.f32.mrf.mxu2 }
 0x17b   : > { %v1204_v34 = vadd.f32 %v1203_v54, %v1103_v59  ;;  %v1004_v19 = vpop.f32.mrf.mxu0 }
 0x17c   : > { %v1105_v40 = vpop.f32.mrf.mxu1  ;;  %v1304_v22 = vpop.f32.mrf.mxu3 }
 0x17d   : > { %v4797_v44 = vadd.f32 %v1304_v22, %v1204_v34  ;;  %v1106_v23 = vadd.f32 %v1105_v40, %v1004_v19  ;;  %v711_v34 = vrot.slane %v3456_v60, 4 }
 0x17e   : > { %1371 = vmatmul.f32.gmra.mxu0 %v4795_v42 }
 0x17f   : > { %6434 = vst [vmem:[#allocation77_spill] sm:$0xff] %v4797_v44  ;;  %1472 = vmatmul.f32.gmra.mxu1 %v3453_v55  ;;  %1573 = vmatmul.f32.gmra.mxu2 %v4162_v45  ;;  %v859_v55 = vld [vmem:[%s6287_s2 + $0x358] sm:$0xff] }
 0x180   : > { %1730 = vmatpush.msra.mxu0 %v859_v55 }
 0x181   : > { %1674 = vmatmul.f32.gmra.mxu3 %v4166_v47  ;;  %v891_v47 = vld [vmem:[%s6287_s2 + $0x458] sm:$0xff] }
 0x182   : > { %v1206_v50 = vpop.f32.mrf.mxu2  ;;  %1831 = vmatpush.msra.mxu1 %v891_v47 }
 0x183   : > { %v1207_v7 = vadd.f32 %v1206_v50, %v1106_v23  ;;  %v1007_v43 = vpop.f32.mrf.mxu0 }
 0x184   : > { %v1108_v59 = vpop.f32.mrf.mxu1  ;;  %v1307_v54 = vpop.f32.mrf.mxu3 }
 0x185   : > { %v4810_v45 = vadd.f32 %v1307_v54, %v1207_v7  ;;  %v1109_v19 = vadd.f32 %v1108_v59, %v1007_v43  ;;  %v4821_v7 = vsel %vm723_vm3, %v710_v6, %v711_v34 }
 0x186   : > { %1374 = vmatmul.f32.gmra.mxu0 %v4805_v58 }
 0x187   : > { %6435 = vst [vmem:[#allocation78_spill] sm:$0xff] %v4810_v45  ;;  %1475 = vmatmul.f32.gmra.mxu1 %v3454_v12  ;;  %1576 = vmatmul.f32.gmra.mxu2 %v4178_v1  ;;  %v3457_v1 = vld [vmem:[%s3814_s18 + $0x88] sm:$0xff]  ;;  %v6440_v45 = vld [vmem:[#allocation36_spill] sm:$0xff] }
 0x188   : > { %v712_v12 = vrot.slane %v3457_v1, 4 }
 0x189   : > { %1677 = vmatmul.f32.gmra.mxu3 %v4185_v4  ;;  %v857_v4 = vld [vmem:[%s6287_s2 + $0x348] sm:$0xff] }
 0x18a   : > { %v1209_v40 = vpop.f32.mrf.mxu2  ;;  %1731 = vmatpush.msra.mxu0 %v857_v4 }
 0x18b   : > { %v1210_v22 = vadd.f32 %v1209_v40, %v1109_v19  ;;  %v1010_v23 = vpop.f32.mrf.mxu0 }
 0x18c   : > { %v1111_v50 = vpop.f32.mrf.mxu1  ;;  %v1310_v55 = vpop.f32.mrf.mxu3 }
 0x18d   : > { %v4823_v54 = vadd.f32 %v1310_v55, %v1210_v22  ;;  %v1112_v43 = vadd.f32 %v1111_v50, %v1010_v23  ;;  %v3458_v22 = vld [vmem:[%s3814_s18 + $0x90] sm:$0xff] }
 0x18e   : > { %1377 = vmatmul.f32.gmra.mxu0 %v4821_v7  ;;  %v713_v23 = vrot.slane %v3458_v22, 4 }
 0x18f   : > { %6436 = vst [vmem:[#allocation79_spill] sm:$0xff] %v4823_v54  ;;  %1478 = vmatmul.f32.gmra.mxu1 %v3455_v62  ;;  %1579 = vmatmul.f32.gmra.mxu2 %v4200_v37  ;;  %v4836_v62 = vsel %vm723_vm3, %v711_v34, %v712_v12  ;;  %v889_v37 = vld [vmem:[%s6287_s2 + $0x448] sm:$0xff] }
 0x190   : > { %1832 = vmatpush.msra.mxu1 %v889_v37  ;;  %v4851_v4 = vsel %vm723_vm3, %v712_v12, %v713_v23  ;;  %v887_v12 = vld [vmem:[%s6287_s2 + $0x438] sm:$0xff] }
 0x191   : > { %1680 = vmatmul.f32.gmra.mxu3 %v4204_v26 }
 0x192   : > { %v1212_v6 = vpop.f32.mrf.mxu2  ;;  %1833 = vmatpush.msra.mxu1 %v887_v12 }
 0x193   : > { %v1213_v59 = vadd.f32 %v1212_v6, %v1112_v43  ;;  %v4832_v47 = vpop.f32.mrf.mxu0 }
 0x194   : > { %v1434_v19 = vpop.f32.mrf.mxu1  ;;  %v1313_v40 = vpop.f32.mrf.mxu3 }
 0x195   : > { %v4841_v26 = vadd.f32 %v1313_v40, %v1213_v59 }
 0x196   : > { %1380 = vmatmul.f32.gmra.mxu0 %v4836_v62 }
 0x197   : > { %6437 = vst [vmem:[#allocation80_spill] sm:$0xff] %v4841_v26  ;;  %1481 = vmatmul.f32.gmra.mxu1 %v3456_v60  ;;  %1582 = vmatmul.f32.gmra.mxu2 %v4219_v2  ;;  %v3459_v2 = vld [vmem:[%s3814_s18 + $0x98] sm:$0xff] }
 0x198   : > { %v714_v60 = vrot.slane %v3459_v2, 4 }
 0x199   : > { %1683 = vmatmul.f32.gmra.mxu3 %v4226_v0  ;;  %v855_v0 = vld [vmem:[%s6287_s2 + $0x338] sm:$0xff] }
 0x19a   : > { %v1535_v34 = vpop.f32.mrf.mxu2  ;;  %1732 = vmatpush.msra.mxu0 %v855_v0  ;;  %v4869_v40 = vsel %vm723_vm3, %v713_v23, %v714_v60 }
 0x19b   : > { %v1536_v50 = vadd.f32 %v1535_v34, %v1434_v19  ;;  %v4847_v55 = vpop.f32.mrf.mxu0 }
 0x19c   : > { %v1437_v43 = vpop.f32.mrf.mxu1  ;;  %v1636_v6 = vpop.f32.mrf.mxu3 }
 0x19d   : > { %v4853_v59 = vadd.f32 %v1636_v6, %v1536_v50 }
 0x19e   : > { %1383 = vmatmul.f32.gmra.mxu0 %v4851_v4 }
 0x19f   : > { %1484 = vmatmul.f32.gmra.mxu1 %v3457_v1  ;;  %1585 = vmatmul.f32.gmra.mxu2 %v4238_v13 }
 0x1a1   : > { %1686 = vmatmul.f32.gmra.mxu3 %v4242_v35  ;;  %v3460_v35 = vld [vmem:[%s3814_s18 + $0xa0] sm:$0xff] }
 0x1a2   : > { %v1538_v19 = vpop.f32.mrf.mxu2  ;;  %v715_v6 = vrot.slane %v3460_v35, 4 }
 0x1a3   : > { %v1539_v37 = vadd.f32 %v1538_v19, %v1437_v43  ;;  %v4865_v1 = vpop.f32.mrf.mxu0 }
 0x1a4   : > { %v1440_v13 = vpop.f32.mrf.mxu1  ;;  %v1639_v34 = vpop.f32.mrf.mxu3  ;;  %v4881_v23 = vsel %vm723_vm3, %v714_v60, %v715_v6  ;;  %v885_v60 = vld [vmem:[%s6287_s2 + $0x428] sm:$0xff] }
 0x1a5   : > { %v4871_v50 = vadd.f32 %v1639_v34, %v1539_v37  ;;  %1834 = vmatpush.msra.mxu1 %v885_v60  ;;  %v3462_v60 = vld [vmem:[%s3814_s18 + $0xb0] sm:$0xff] }
 0x1a6   : > { %1386 = vmatmul.f32.gmra.mxu0 %v4869_v40 }
 0x1a7   : > { %1487 = vmatmul.f32.gmra.mxu1 %v3458_v22  ;;  %1588 = vmatmul.f32.gmra.mxu2 %v4262_v21  ;;  %v853_v21 = vld [vmem:[%s6287_s2 + $0x328] sm:$0xff] }
 0x1a8   : > { %1733 = vmatpush.msra.mxu0 %v853_v21  ;;  %v6439_v21 = vld [vmem:[#allocation35_spill] sm:$0xff] }
 0x1a9   : > { %1689 = vmatmul.f32.gmra.mxu3 %v4266_v57  ;;  %v3461_v57 = vld [vmem:[%s3814_s18 + $0xa8] sm:$0xff] }
 0x1aa   : > { %v1541_v43 = vpop.f32.mrf.mxu2  ;;  %v716_v22 = vrot.slane %v3461_v57, 4 }
 0x1ab   : > { %v1542_v0 = vadd.f32 %v1541_v43, %v1440_v13  ;;  %v4877_v12 = vpop.f32.mrf.mxu0  ;;  %v6438_v13 = vld [vmem:[#allocation32_spill] sm:$0xff] }
 0x1ac   : > { %v1443_v19 = vpop.f32.mrf.mxu1  ;;  %v1642_v37 = vpop.f32.mrf.mxu3 }
 0x1ad   : > { %v4883_v34 = vadd.f32 %v1642_v37, %v1542_v0 }
 0x1ae   : > { %1389 = vmatmul.f32.gmra.mxu0 %v4881_v23 }
 0x1af   : > { %1490 = vmatmul.f32.gmra.mxu1 %v3459_v2  ;;  %1591 = vmatmul.f32.gmra.mxu2 %v4280_v39  ;;  %v4901_v39 = vsel %vm723_vm3, %v715_v6, %v716_v22 }
 0x1b1   : > { %1692 = vmatmul.f32.gmra.mxu3 %v6438_v13  ;;  %v717_v13 = vrot.slane %v3462_v60, 4 }
 0x1b2   : > { %v1544_v43 = vpop.f32.mrf.mxu2 }
 0x1b3   : > { %v1545_v0 = vadd.f32 %v1544_v43, %v1443_v19  ;;  %v4895_v37 = vpop.f32.mrf.mxu0  ;;  %v4915_v6 = vsel %vm723_vm3, %v716_v22, %v717_v13 }
 0x1b4   : > { %v4897_v26 = vpop.f32.mrf.mxu1  ;;  %v1645_v2 = vpop.f32.mrf.mxu3 }
 0x1b5   : > { %v4903_v54 = vadd.f32 %v1645_v2, %v1545_v0  ;;  %v851_v0 = vld [vmem:[%s6287_s2 + $0x318] sm:$0xff]  ;;  %v718_v2 = vrot.slane %v4352_v51, 4 }
 0x1b6   : > { %1392 = vmatmul.f32.gmra.mxu0 %v4901_v39  ;;  %v6445_v51 = vld [vmem:[#allocation44_spill] sm:$0xff] }
 0x1b7   : > { %1493 = vmatmul.f32.gmra.mxu1 %v3460_v35  ;;  %1594 = vmatmul.f32.gmra.mxu2 %v6439_v21  ;;  %v883_v35 = vld [vmem:[%s6287_s2 + $0x418] sm:$0xff] }
 0x1b8   : > { %1734 = vmatpush.msra.mxu0 %v851_v0  ;;  %1835 = vmatpush.msra.mxu1 %v883_v35  ;;  %v6442_v21 = vld [vmem:[#allocation40_spill] sm:$0xff]  ;;  %v4933_v0 = vsel %vm723_vm3, %v717_v13, %v718_v2  ;;  %v849_v35 = vld [vmem:[%s6287_s2 + $0x308] sm:$0xff] }
 0x1b9   : > { %1695 = vmatmul.f32.gmra.mxu3 %v6440_v45  ;;  %v6441_v45 = vld [vmem:[#allocation39_spill] sm:$0xff] }
 0x1ba   : > { %1735 = vmatpush.msra.mxu0 %v849_v35  ;;  %v720_v35 = vrot.slane %v4444_v30, 4 }
 0x1bb   : > { %v4909_v19 = vpop.f32.mrf.mxu0 }
 0x1bc   : > { %v4911_v43 = vpop.f32.mrf.mxu1 }
 0x1be   : > { %1395 = vmatmul.f32.gmra.mxu0 %v4915_v6 }
 0x1bf   : > { %1496 = vmatmul.f32.gmra.mxu1 %v3461_v57  ;;  %1597 = vmatmul.f32.gmra.mxu2 %v6441_v45  ;;  %v6443_v57 = vld [vmem:[#allocation43_spill] sm:$0xff]  ;;  %v6444_v45 = vld [vmem:[#allocation45_spill] sm:$0xff] }
 0x1c0   : > { %v719_v18 = vrot.slane %v6444_v45, 4 }
 0x1c1   : > { %1698 = vmatmul.f32.gmra.mxu3 %v6442_v21 }
 0x1c2   : > { %v4948_v13 = vsel %vm723_vm3, %v718_v2, %v719_v18  ;;  %v4964_v2 = vsel %vm723_vm3, %v719_v18, %v720_v35  ;;  %v6450_v18 = vld [vmem:[#allocation56_spill] sm:$0xff] }
 0x1c3   : > { %v4927_v22 = vpop.f32.mrf.mxu0 }
 0x1c4   : > { %v4929_v44 = vpop.f32.mrf.mxu1 }
 0x1c6   : > { %1398 = vmatmul.f32.gmra.mxu0 %v4933_v0 }
 0x1c7   : > { %1499 = vmatmul.f32.gmra.mxu1 %v3462_v60  ;;  %1600 = vmatmul.f32.gmra.mxu2 %v6443_v57  ;;  %v881_v60 = vld [vmem:[%s6287_s2 + $0x408] sm:$0xff]  ;;  %v3463_v57 = vld [vmem:[%s3814_s18 + $0xb8] sm:$0xff]  ;;  %s3393_s18 = sshll.u32 %s6615_s14, 3 }
 0x1c8   : > { %1836 = vmatpush.msra.mxu1 %v881_v60  ;;  %v6448_v60 = vld [vmem:[#allocation52_spill] sm:$0xff]  ;;  %s489_s22 = scalar_lea.vmem %s6286_s1, %s3393_s18 }
 0x1c9   : > { %1701 = vmatmul.f32.gmra.mxu3 %v6445_v51  ;;  %v6446_v51 = vld [vmem:[#allocation48_spill] sm:$0xff] }
 0x1cb   : > { %v4942_v21 = vpop.f32.mrf.mxu0 }
 0x1cc   : > { %v4944_v46 = vpop.f32.mrf.mxu1 }
 0x1ce   : > { %1401 = vmatmul.f32.gmra.mxu0 %v4948_v13 }
 0x1cf   : > { %1502 = vmatmul.f32.gmra.mxu1 %v3463_v57  ;;  %1603 = vmatmul.f32.gmra.mxu2 %v6446_v51  ;;  %v721_v57 = vrot.slane %v4486_v53, 4  ;;  %v6449_v51 = vld [vmem:[#allocation53_spill] sm:$0xff] }
 0x1d1   : > { %1704 = vmatmul.f32.gmra.mxu3 %v6447_v28  ;;  %v4977_v17 = vsel %vm723_vm3, %v720_v35, %v721_v57 }
 0x1d3   : > { %v4958_v29 = vpop.f32.mrf.mxu0 }
 0x1d4   : > { %v4960_v5 = vpop.f32.mrf.mxu1 }
 0x1d6   : > { %1404 = vmatmul.f32.gmra.mxu0 %v4964_v2 }
 0x1d7   : > { %1505 = vmatmul.f32.gmra.mxu1 %v6444_v45  ;;  %1606 = vmatmul.f32.gmra.mxu2 %v6448_v60  ;;  %v722_v45 = vrot.slane %v4534_v9, 4  ;;  %v6451_v60 = vld [vmem:[#allocation57_spill] sm:$0xff] }
 0x1d9   : > { %1707 = vmatmul.f32.gmra.mxu3 %v6449_v51  ;;  %v4990_v32 = vsel %vm723_vm3, %v721_v57, %v722_v45  ;;  %v6454_v57 = vld [vmem:[#allocation64_spill] sm:$0xff] }
 0x1db   : > { %v4971_v10 = vpop.f32.mrf.mxu0 }
 0x1dc   : > { %v4973_v28 = vpop.f32.mrf.mxu1 }
 0x1de   : > { %1407 = vmatmul.f32.gmra.mxu0 %v4977_v17 }
 0x1df   : > { %1508 = vmatmul.f32.gmra.mxu1 %v4444_v30  ;;  %1609 = vmatmul.f32.gmra.mxu2 %v6450_v18  ;;  %v6452_v18 = vrot.slane %v4606_v3, 4 }
 0x1e1   : > { %1710 = vmatmul.f32.gmra.mxu3 %v6451_v60  ;;  %v5004_v60 = vsel %vm723_vm3, %v722_v45, %v6452_v18  ;;  %v6457_v18 = vld [vmem:[#allocation12_spill] sm:$0xff] }
 0x1e3   : > { %v4984_v15 = vpop.f32.mrf.mxu0 }
 0x1e4   : > { %v4986_v51 = vpop.f32.mrf.mxu1 }
 0x1e6   : > { %1410 = vmatmul.f32.gmra.mxu0 %v4990_v32 }
 0x1e7   : > { %1511 = vmatmul.f32.gmra.mxu1 %v4486_v53  ;;  %1612 = vmatmul.f32.gmra.mxu2 %v4560_v14  ;;  %v6453_v14 = vld [vmem:[#allocation11_spill] sm:$0xff] }
 0x1e9   : > { %1713 = vmatmul.f32.gmra.mxu3 %v4564_v27 }
 0x1eb   : > { %v4996_v30 = vpop.f32.mrf.mxu0 }
 0x1ec   : > { %v4998_v35 = vpop.f32.mrf.mxu1 }
 0x1ee   : > { %1413 = vmatmul.f32.gmra.mxu0 %v5004_v60 }
 0x1ef   : > { %1514 = vmatmul.f32.gmra.mxu1 %v4534_v9  ;;  %1615 = vmatmul.f32.gmra.mxu2 %v4586_v56 }
 0x1f1   : > { %1716 = vmatmul.f32.gmra.mxu3 %v4592_v61  ;;  %v2263_v61 = vld [vmem:[#allocation5 + $0xf0] sm:$0xff] }
 0x1f2   : > { %2393 = vmatpush.msra.mxu2 %v2263_v61 }
 0x1f3   : > { %v5010_v53 = vpop.f32.mrf.mxu0 }
 0x1f4   : > { %v5012_v27 = vpop.f32.mrf.mxu1 }
 0x1f6   : > { %1736 = vmatmul.f32.vlgmr.msra.gmra.mxu0 %v6453_v14  ;;  %v2295_v14 = vld [vmem:[#allocation5 + $0x1f0] sm:$0xff] }
 0x1f7   : > { %1837 = vmatmul.f32.vlgmr.msra.gmra.mxu1 %v6454_v57  ;;  %2452 = vmatpush.msra.mxu3 %v2295_v14  ;;  %v6466_v14 = vld [vmem:[#allocation16_spill] sm:$0xff] }
 0x1fb   : > { %v5016_v3 = vpop.f32.mrf.mxu0 }
 0x1fc   : > { %6455 = vst [vmem:[#allocation32_spill] sm:$0xff] %v5016_v3  ;;  %v5018_v45 = vpop.f32.mrf.mxu1 }
 0x1fd   : > { %6456 = vst [vmem:[#allocation35_spill] sm:$0xff] %v5018_v45  ;;  %v6461_v45 = vld [vmem:[#allocation14_spill] sm:$0xff] }
 0x1fe   : > { %1739 = vmatmul.f32.gmra.mxu0 %v6457_v18 }
 0x1ff   : > { %1840 = vmatmul.f32.gmra.mxu1 %v4633_v63 }
 0x203   : > { %v5022_v9 = vpop.f32.mrf.mxu0 }
 0x204   : > { %6458 = vst [vmem:[#allocation36_spill] sm:$0xff] %v5022_v9  ;;  %v5024_v56 = vpop.f32.mrf.mxu1  ;;  %v2261_v9 = vld [vmem:[#allocation5 + $0xe0] sm:$0xff] }
 0x205   : > { %6459 = vst [vmem:[#allocation39_spill] sm:$0xff] %v5024_v56  ;;  %2394 = vmatpush.msra.mxu2 %v2261_v9  ;;  %v6463_v56 = vld [vmem:[#allocation15_spill] sm:$0xff]  ;;  %v2291_v9 = vld [vmem:[#allocation5 + $0x1d0] sm:$0xff] }
 0x206   : > { %1742 = vmatmul.f32.gmra.mxu0 %v6460_v25  ;;  %v2293_v25 = vld [vmem:[#allocation5 + $0x1e0] sm:$0xff] }
 0x207   : > { %1843 = vmatmul.f32.gmra.mxu1 %v4646_v31  ;;  %2453 = vmatpush.msra.mxu3 %v2293_v25 }
 0x209   : > { %2454 = vmatpush.msra.mxu3 %v2291_v9  ;;  %v6475_v9 = vld [vmem:[#allocation19_spill] sm:$0xff] }
 0x20b   : > { %v5028_v57 = vpop.f32.mrf.mxu0 }
 0x20c   : > { %v5030_v3 = vpop.f32.mrf.mxu1 }
 0x20e   : > { %1745 = vmatmul.f32.gmra.mxu0 %v6461_v45 }
 0x20f   : > { %1846 = vmatmul.f32.gmra.mxu1 %v4659_v24  ;;  %v2259_v24 = vld [vmem:[#allocation5 + $0xd0] sm:$0xff] }
 0x210   : > { %2395 = vmatpush.msra.mxu2 %v2259_v24 }
 0x213   : > { %v5034_v63 = vpop.f32.mrf.mxu0 }
 0x214   : > { %6462 = vst [vmem:[#allocation40_spill] sm:$0xff] %v5034_v63  ;;  %v5036_v18 = vpop.f32.mrf.mxu1 }
 0x216   : > { %1748 = vmatmul.f32.gmra.mxu0 %v6463_v56  ;;  %v6469_v56 = vld [vmem:[#allocation17_spill] sm:$0xff] }
 0x217   : > { %1849 = vmatmul.f32.gmra.mxu1 %v4675_v16 }
 0x21b   : > { %v5040_v31 = vpop.f32.mrf.mxu0 }
 0x21c   : > { %6464 = vst [vmem:[#allocation43_spill] sm:$0xff] %v5040_v31  ;;  %v5042_v61 = vpop.f32.mrf.mxu1  ;;  %v6472_v31 = vld [vmem:[#allocation18_spill] sm:$0xff] }
 0x21d   : > { %6465 = vst [vmem:[#allocation45_spill] sm:$0xff] %v5042_v61  ;;  %v2271_v61 = vld [vmem:[#allocation5 + $0x130] sm:$0xff] }
 0x21e   : > { %1751 = vmatmul.f32.gmra.mxu0 %v6466_v14  ;;  %v2289_v14 = vld [vmem:[#allocation5 + $0x1c0] sm:$0xff] }
 0x21f   : > { %1852 = vmatmul.f32.gmra.mxu1 %v4685_v36  ;;  %v2257_v36 = vld [vmem:[#allocation5 + $0xc0] sm:$0xff]  ;;  %2455 = vmatpush.msra.mxu3 %v2289_v14 }
 0x220   : > { %2396 = vmatpush.msra.mxu2 %v2257_v36 }
 0x223   : > { %v5046_v45 = vpop.f32.mrf.mxu0 }
 0x224   : > { %6467 = vst [vmem:[#allocation44_spill] sm:$0xff] %v5046_v45  ;;  %v5048_v63 = vpop.f32.mrf.mxu1 }
 0x225   : > { %6468 = vst [vmem:[#allocation48_spill] sm:$0xff] %v5048_v63 }
 0x226   : > { %1754 = vmatmul.f32.gmra.mxu0 %v6469_v56 }
 0x227   : > { %1855 = vmatmul.f32.gmra.mxu1 %v4701_v33 }
 0x22b   : > { %v5052_v16 = vpop.f32.mrf.mxu0 }
 0x22c   : > { %6470 = vst [vmem:[#allocation49_spill] sm:$0xff] %v5052_v16  ;;  %v5054_v25 = vpop.f32.mrf.mxu1  ;;  %v2255_v16 = vld [vmem:[#allocation5 + $0xb0] sm:$0xff] }
 0x22d   : > { %6471 = vst [vmem:[#allocation52_spill] sm:$0xff] %v5054_v25  ;;  %2397 = vmatpush.msra.mxu2 %v2255_v16  ;;  %v2233_v25 = vld [vmem:[#allocation5] sm:$0xff] }
 0x22e   : > { %1757 = vmatmul.f32.gmra.mxu0 %v6472_v31  ;;  %v6478_v31 = vld [vmem:[#allocation20_spill] sm:$0xff] }
 0x22f   : > { %1858 = vmatmul.f32.gmra.mxu1 %v4711_v11  ;;  %v2287_v11 = vld [vmem:[#allocation5 + $0x1b0] sm:$0xff] }
 0x230   : > { %2456 = vmatpush.msra.mxu3 %v2287_v11  ;;  %v6487_v11 = vld [vmem:[#allocation23_spill] sm:$0xff] }
 0x233   : > { %v5058_v24 = vpop.f32.mrf.mxu0 }
 0x234   : > { %6473 = vst [vmem:[#allocation53_spill] sm:$0xff] %v5058_v24  ;;  %v5060_v45 = vpop.f32.mrf.mxu1  ;;  %v6481_v24 = vld [vmem:[#allocation21_spill] sm:$0xff] }
 0x235   : > { %6474 = vst [vmem:[#allocation56_spill] sm:$0xff] %v5060_v45  ;;  %v2235_v45 = vld [vmem:[#allocation5 + $0x10] sm:$0xff] }
 0x236   : > { %1760 = vmatmul.f32.gmra.mxu0 %v6475_v9 }
 0x237   : > { %1861 = vmatmul.f32.gmra.mxu1 %v4727_v41 }
 0x23b   : > { %v5064_v33 = vpop.f32.mrf.mxu0 }
 0x23c   : > { %6476 = vst [vmem:[#allocation57_spill] sm:$0xff] %v5064_v33  ;;  %v5066_v56 = vpop.f32.mrf.mxu1  ;;  %v2253_v33 = vld [vmem:[#allocation5 + $0xa0] sm:$0xff] }
 0x23d   : > { %6477 = vst [vmem:[#allocation11_spill] sm:$0xff] %v5066_v56  ;;  %2398 = vmatpush.msra.mxu2 %v2253_v33  ;;  %v6484_v56 = vld [vmem:[#allocation22_spill] sm:$0xff]  ;;  %v5092_v33 = vpop.f32.mrf.mxu2 }
 0x23e   : > { %1763 = vmatmul.f32.gmra.mxu0 %v6478_v31  ;;  %v2285_v31 = vld [vmem:[#allocation5 + $0x1a0] sm:$0xff] }
 0x23f   : > { %1864 = vmatmul.f32.gmra.mxu1 %v4740_v49  ;;  %2457 = vmatpush.msra.mxu3 %v2285_v31 }
 0x243   : > { %v5070_v36 = vpop.f32.mrf.mxu0 }
 0x244   : > { %6479 = vst [vmem:[#allocation64_spill] sm:$0xff] %v5070_v36  ;;  %v5072_v14 = vpop.f32.mrf.mxu1 }
 0x245   : > { %6480 = vst [vmem:[#allocation12_spill] sm:$0xff] %v5072_v14 }
 0x246   : > { %1766 = vmatmul.f32.gmra.mxu0 %v6481_v24  ;;  %v2283_v24 = vld [vmem:[#allocation5 + $0x190] sm:$0xff] }
 0x247   : > { %1867 = vmatmul.f32.gmra.mxu1 %v4753_v38  ;;  %v2251_v38 = vld [vmem:[#allocation5 + $0x90] sm:$0xff]  ;;  %2458 = vmatpush.msra.mxu3 %v2283_v24  ;;  %v2249_v24 = vld [vmem:[#allocation5 + $0x80] sm:$0xff] }
 0x248   : > { %2399 = vmatpush.msra.mxu2 %v2251_v38 }
 0x24a   : > { %2400 = vmatpush.msra.mxu2 %v2249_v24 }
 0x24b   : > { %v5076_v41 = vpop.f32.mrf.mxu0 }
 0x24c   : > { %6482 = vst [vmem:[#allocation13_spill] sm:$0xff] %v5076_v41  ;;  %v5078_v9 = vpop.f32.mrf.mxu1 }
 0x24d   : > { %6483 = vst [vmem:[#allocation14_spill] sm:$0xff] %v5078_v9 }
 0x24e   : > { %1769 = vmatmul.f32.gmra.mxu0 %v6484_v56  ;;  %v5096_v56 = vpop.f32.mrf.mxu3 }
 0x24f   : > { %1870 = vmatmul.f32.gmra.mxu1 %v4769_v20  ;;  %v6490_v20 = vld [vmem:[#allocation24_spill] sm:$0xff] }
 0x253   : > { %v5082_v49 = vpop.f32.mrf.mxu0 }
 0x254   : > { %6485 = vst [vmem:[#allocation15_spill] sm:$0xff] %v5082_v49  ;;  %v5084_v16 = vpop.f32.mrf.mxu1  ;;  %v6493_v49 = vld [vmem:[#allocation25_spill] sm:$0xff] }
 0x255   : > { %6486 = vst [vmem:[#allocation16_spill] sm:$0xff] %v5084_v16  ;;  %v2241_v16 = vld [vmem:[#allocation5 + $0x40] sm:$0xff] }
 0x256   : > { %1772 = vmatmul.f32.gmra.mxu0 %v6487_v11  ;;  %v5106_v38 = vpop.f32.mrf.mxu3 }
 0x257   : > { %1873 = vmatmul.f32.gmra.mxu1 %v4779_v8  ;;  %v5102_v8 = vpop.f32.mrf.mxu2 }
 0x25b   : > { %v5088_v41 = vpop.f32.mrf.mxu0 }
 0x25c   : > { %6488 = vst [vmem:[#allocation17_spill] sm:$0xff] %v5088_v41  ;;  %v5090_v9 = vpop.f32.mrf.mxu1 }
 0x25d   : > { %6489 = vst [vmem:[#allocation18_spill] sm:$0xff] %v5090_v9  ;;  %v6496_v9 = vld [vmem:[#allocation26_spill] sm:$0xff] }
 0x25e   : > { %1775 = vmatmul.f32.gmra.mxu0 %v6490_v20 }
 0x25f   : > { %1876 = vmatmul.f32.gmra.mxu1 %v4795_v42  ;;  %v2247_v42 = vld [vmem:[#allocation5 + $0x70] sm:$0xff] }
 0x260   : > { %2401 = vmatpush.msra.mxu2 %v2247_v42  ;;  %v2239_v42 = vld [vmem:[#allocation5 + $0x30] sm:$0xff] }
 0x263   : > { %v5098_v31 = vpop.f32.mrf.mxu0 }
 0x264   : > { %6491 = vst [vmem:[#allocation19_spill] sm:$0xff] %v5098_v31  ;;  %v5100_v11 = vpop.f32.mrf.mxu1  ;;  %v2245_v31 = vld [vmem:[#allocation5 + $0x60] sm:$0xff] }
 0x265   : > { %6492 = vst [vmem:[#allocation20_spill] sm:$0xff] %v5100_v11  ;;  %v2281_v11 = vld [vmem:[#allocation5 + $0x180] sm:$0xff]  ;;  %2402 = vmatpush.msra.mxu2 %v2245_v31 }
 0x266   : > { %1778 = vmatmul.f32.gmra.mxu0 %v6493_v49  ;;  %v5114_v49 = vpop.f32.mrf.mxu2  ;;  %2459 = vmatpush.msra.mxu3 %v2281_v11  ;;  %v6498_v31 = vld [vmem:[#allocation27_spill] sm:$0xff] }
 0x267   : > { %1879 = vmatmul.f32.gmra.mxu1 %v4805_v58  ;;  %v2243_v58 = vld [vmem:[#allocation5 + $0x50] sm:$0xff]  ;;  %v2237_v11 = vld [vmem:[#allocation5 + $0x20] sm:$0xff] }
 0x268   : > { %2403 = vmatpush.msra.mxu2 %v2243_v58 }
 0x26a   : > { %2404 = vmatpush.msra.mxu2 %v2241_v16 }
 0x26b   : > { %v5108_v41 = vpop.f32.mrf.mxu0 }
 0x26c   : > { %6494 = vst [vmem:[#allocation21_spill] sm:$0xff] %v5108_v41  ;;  %v5110_v20 = vpop.f32.mrf.mxu1  ;;  %2405 = vmatpush.msra.mxu2 %v2239_v42 }
 0x26d   : > { %6495 = vst [vmem:[#allocation22_spill] sm:$0xff] %v5110_v20  ;;  %v5116_v20 = vpop.f32.mrf.mxu3 }
 0x26e   : > { %1781 = vmatmul.f32.gmra.mxu0 %v6496_v9  ;;  %v6497_v9 = vld [vmem:[#allocation28_spill] sm:$0xff]  ;;  %2406 = vmatpush.msra.mxu2 %v2237_v11  ;;  %v5125_v16 = vpop.f32.mrf.mxu2 }
 0x26f   : > { %1882 = vmatmul.f32.gmra.mxu1 %v4821_v7  ;;  %v1334_v7 = vadd.f32 %v4832_v47, %v6497_v9  ;;  %v6499_v47 = vld [vmem:[#allocation30_spill] sm:$0xff]  ;;  %v6500_v9 = vld [vmem:[#allocation29_spill] sm:$0xff] }
 0x270   : > { %2407 = vmatpush.msra.mxu2 %v2235_v45 }
 0x272   : > { %2408 = vmatpush.msra.mxu2 %v2233_v25 }
 0x273   : > { %v1737_v36 = vpop.f32.mrf.mxu0 }
 0x274   : > { %v1838_v41 = vpop.f32.mrf.mxu1  ;;  %v1738_v24 = vadd.f32 %v1737_v36, %v4853_v59 }
 0x276   : > { %v1839_v14 = vadd.f32 %v1838_v41, %v1738_v24  ;;  %1784 = vmatmul.f32.gmra.mxu0 %v6498_v31  ;;  %v1337_v41 = vadd.f32 %v4847_v55, %v6499_v47  ;;  %v5130_v24 = vpop.f32.mrf.mxu3  ;;  %v5135_v63 = vpop.f32.mrf.mxu2  ;;  %v6501_v47 = vld [vmem:[#allocation33_spill] sm:$0xff] }
 0x277   : > { %1885 = vmatmul.f32.gmra.mxu1 %v4836_v62 }
 0x278   : > { %v5123_v58 = vmax.f32 %v1334_v7, %v1839_v14  ;;  %v2279_v14 = vld [vmem:[#allocation5 + $0x170] sm:$0xff]  ;;  %v2277_v7 = vld [vmem:[#allocation5 + $0x160] sm:$0xff] }
 0x279   : > { %2460 = vmatpush.msra.mxu3 %v2279_v14  ;;  %v2391_v14 = vld [vmem:[#allocation5 + $0x4f0] sm:$0xff] }
 0x27a   : > { %v6347_v31 = vrot.slane %v5123_v58, 1  ;;  %2629 = vmatpush.msrb.mxu0 %v2391_v14  ;;  %v6504_v14 = vld [vmem:[#allocation34_spill] sm:$0xff] }
 0x27b   : > { %v1740_v59 = vpop.f32.mrf.mxu0  ;;  %2461 = vmatpush.msra.mxu3 %v2277_v7  ;;  %v2264_v7 = vld [vmem:[#allocation5 + $0xf8] sm:$0xff] }
 0x27c   : > { %v1841_v36 = vpop.f32.mrf.mxu1  ;;  %v1741_v42 = vadd.f32 %v1740_v59, %v4871_v50  ;;  %v2275_v59 = vld [vmem:[#allocation5 + $0x150] sm:$0xff]  ;;  %2688 = vmatpush.msrb.mxu1 %v2264_v7 }
 0x27d   : > { %2462 = vmatpush.msra.mxu3 %v2275_v59 }
 0x27e   : > { %v1842_v62 = vadd.f32 %v1841_v36, %v1741_v42  ;;  %1787 = vmatmul.f32.gmra.mxu0 %v6500_v9  ;;  %v2273_v42 = vld [vmem:[#allocation5 + $0x140] sm:$0xff] }
 0x27f   : > { %1888 = vmatmul.f32.gmra.mxu1 %v4851_v4  ;;  %v6502_v9 = vld [vmem:[#allocation31_spill] sm:$0xff]  ;;  %2463 = vmatpush.msra.mxu3 %v2273_v42 }
 0x280   : > { %v1923_v45 = vmax.f32 %v1337_v41, %v1842_v62  ;;  %v1340_v41 = vadd.f32 %v4865_v1, %v6501_v47  ;;  %v2265_v42 = vld [vmem:[#allocation5 + $0x100] sm:$0xff]  ;;  %v6503_v47 = vld [vmem:[#allocation37_spill] sm:$0xff] }
 0x281   : > { %2464 = vmatpush.msra.mxu3 %v2271_v61  ;;  %v1548_v61 = vadd.f32 %v5092_v33, %v4897_v26  ;;  %v5166_v26 = vld [vmem:[%s6289_s4] ss:$0 sm:$0xff] }
 0x282   : > { %v1951_v11 = vrot.slane %v1923_v45, 1 }
 0x283   : > { %v1743_v25 = vpop.f32.mrf.mxu0 }
 0x284   : > { %v1844_v50 = vpop.f32.mrf.mxu1  ;;  %v2004_v55 = vsel %vm552_vm0, %v6347_v31, %v1951_v11  ;;  %v1744_v4 = vadd.f32 %v1743_v25, %v4883_v34  ;;  %v5147_v31 = vpop.f32.mrf.mxu3  ;;  %v2269_v25 = vld [vmem:[#allocation5 + $0x120] sm:$0xff] }
 0x285   : > { %v2006_v36 = vmax.f32 %v5123_v58, %v2004_v55  ;;  %2465 = vmatpush.msra.mxu3 %v2269_v25 }
 0x286   : > { %v1845_v62 = vadd.f32 %v1844_v50, %v1744_v4  ;;  %1790 = vmatmul.f32.gmra.mxu0 %v6502_v9  ;;  %v2267_v50 = vld [vmem:[#allocation5 + $0x110] sm:$0xff] }
 0x287   : > { %1891 = vmatmul.f32.gmra.mxu1 %v4869_v40  ;;  %2034 = vst [vmem:[#allocation2] sm:$0xff] %v2006_v36  ;;  %2466 = vmatpush.msra.mxu3 %v2267_v50 }
 0x288   : > { %v1924_v34 = vmax.f32 %v1340_v41, %v1845_v62  ;;  %v1343_v41 = vadd.f32 %v4877_v12, %v6503_v47  ;;  %v5156_v62 = vpop.f32.mrf.mxu2  ;;  %v2389_v47 = vld [vmem:[#allocation5 + $0x4e0] sm:$0xff] }
 0x289   : > { %2467 = vmatpush.msra.mxu3 %v2265_v42  ;;  %2630 = vmatpush.msrb.mxu0 %v2389_v47 }
 0x28a   : > { %v1952_v59 = vrot.slane %v1924_v34, 1 }
 0x28b   : > { %v1746_v55 = vpop.f32.mrf.mxu0 }
 0x28c   : > { %v1847_v1 = vpop.f32.mrf.mxu1  ;;  %v2003_v40 = vsel %vm552_vm0, %v1951_v11, %v1952_v59  ;;  %v1747_v4 = vadd.f32 %v1746_v55, %v4903_v54  ;;  %v1649_v54 = vadd.f32 %v5096_v56, %v1548_v61  ;;  %v1551_v56 = vadd.f32 %v5102_v8, %v4911_v43 }
 0x28d   : > { %v2007_v36 = vmax.f32 %v1923_v45, %v2003_v40  ;;  %v5161_v45 = vpop.f32.mrf.mxu3 }
 0x28e   : > { %v1848_v9 = vadd.f32 %v1847_v1, %v1747_v4  ;;  %1793 = vmatmul.f32.gmra.mxu0 %v6504_v14  ;;  %v6505_v1 = vld [vmem:[#allocation41_spill] sm:$0xff]  ;;  %v6506_v4 = vld [vmem:[#allocation38_spill] sm:$0xff]  ;;  %v1652_v43 = vadd.f32 %v5106_v38, %v1551_v56 }
 0x28f   : > { %1894 = vmatmul.f32.gmra.mxu1 %v4881_v23  ;;  %2035 = vst [vmem:[#allocation2 + $0x8] sm:$0xff] %v2007_v36  ;;  %v1346_v50 = vadd.f32 %v4895_v37, %v6505_v1  ;;  %v2260_v14 = vld [vmem:[#allocation5 + $0xd8] sm:$0xff] }
 0x290   : > { %v1925_v11 = vmax.f32 %v1343_v41, %v1848_v9  ;;  %v2262_v41 = vld [vmem:[#allocation5 + $0xe8] sm:$0xff]  ;;  %v6507_v1 = vld [vmem:[#allocation46_spill] sm:$0xff] }
 0x291   : > { %2689 = vmatpush.msrb.mxu1 %v2262_v41  ;;  %v1349_v38 = vadd.f32 %v4909_v19, %v6507_v1  ;;  %v6510_v1 = vld [vmem:[#allocation47_spill] sm:$0xff] }
 0x292   : > { %v1953_v7 = vrot.slane %v1925_v11, 1 }
 0x293   : > { %v1749_v25 = vpop.f32.mrf.mxu0  ;;  %2690 = vmatpush.msrb.mxu1 %v2260_v14  ;;  %v2377_v14 = vld [vmem:[#allocation5 + $0x480] sm:$0xff] }
 0x294   : > { %v1850_v12 = vpop.f32.mrf.mxu1  ;;  %v2002_v33 = vsel %vm552_vm0, %v1952_v59, %v1953_v7  ;;  %v1750_v55 = vadd.f32 %v1749_v25, %v1649_v54  ;;  %v5177_v59 = vpop.f32.mrf.mxu2 }
 0x295   : > { %v2008_v23 = vmax.f32 %v1924_v34, %v2002_v33  ;;  %v5183_v54 = vpop.f32.mrf.mxu3 }
 0x296   : > { %v1851_v40 = vadd.f32 %v1850_v12, %v1750_v55  ;;  %1796 = vmatmul.f32.gmra.mxu0 %v6506_v4  ;;  %v2062_v36 = vld [vmem:[#allocation2] ss:$2 sm:$0xff]  ;;  %v2385_v55 = vld [vmem:[#allocation5 + $0x4c0] sm:$0xff] }
 0x297   : > { %1897 = vmatmul.f32.gmra.mxu1 %v4901_v39  ;;  %2036 = vst [vmem:[#allocation2 + $0x10] sm:$0xff] %v2008_v23  ;;  %v2093_v42 = vadd.f32 %v5166_v26, %v2062_v36  ;;  %v2387_v39 = vld [vmem:[#allocation5 + $0x4d0] sm:$0xff]  ;;  %v2258_v23 = vld [vmem:[#allocation5 + $0xc8] sm:$0xff]  ;;  %v2256_v4 = vld [vmem:[#allocation5 + $0xb8] sm:$0xff] }
 0x298   : > { %v1926_v34 = vmax.f32 %v1346_v50, %v1851_v40  ;;  %2631 = vmatpush.msrb.mxu0 %v2387_v39  ;;  %v1554_v50 = vadd.f32 %v5114_v49, %v4929_v44  ;;  %v6508_v40 = vld [vmem:[#allocation42_spill] sm:$0xff]  ;;  %2691 = vmatpush.msrb.mxu1 %v2258_v23 }
 0x299   : > { %v5179_v37 = vmax.f32 %v2093_v42, 0.0  ;;  %v2254_v42 = vld [vmem:[#allocation5 + $0xa8] sm:$0xff] }
 0x29a   : > { %v1954_v8 = vrot.slane %v1926_v34, 1  ;;  %2632 = vmatpush.msrb.mxu0 %v2385_v55  ;;  %2692 = vmatpush.msrb.mxu1 %v2256_v4  ;;  %v1655_v19 = vadd.f32 %v5116_v20, %v1554_v50  ;;  %v6509_v20 = vld [vmem:[#allocation50_spill] sm:$0xff] }
 0x29b   : > { %v1752_v61 = vpop.f32.mrf.mxu0  ;;  %2409 = vmatmul.f32.vlgmr.msra.gmra.mxu2 %v5179_v37  ;;  %v2248_v50 = vld [vmem:[#allocation5 + $0x78] sm:$0xff] }
 0x29c   : > { %v1853_v9 = vpop.f32.mrf.mxu1  ;;  %v2001_v25 = vsel %vm552_vm0, %v1953_v7, %v1954_v8  ;;  %v1753_v12 = vadd.f32 %v1752_v61, %v1652_v43  ;;  %v2383_v7 = vld [vmem:[#allocation5 + $0x4b0] sm:$0xff]  ;;  %v5196_v47 = vpop.f32.mrf.mxu2  ;;  %2693 = vmatpush.msrb.mxu1 %v2254_v42  ;;  %v2252_v43 = vld [vmem:[#allocation5 + $0x98] sm:$0xff] }
 0x29d   : > { %v2009_v33 = vmax.f32 %v1925_v11, %v2001_v25  ;;  %2633 = vmatpush.msrb.mxu0 %v2383_v7  ;;  %v2381_v11 = vld [vmem:[#allocation5 + $0x4a0] sm:$0xff]  ;;  %v2250_v25 = vld [vmem:[#allocation5 + $0x88] sm:$0xff]  ;;  %v5205_v55 = vpop.f32.mrf.mxu3 }
 0x29e   : > { %v1854_v56 = vadd.f32 %v1853_v9, %v1753_v12  ;;  %1799 = vmatmul.f32.gmra.mxu0 %v6508_v40  ;;  %2694 = vmatpush.msrb.mxu1 %v2252_v43  ;;  %v1352_v12 = vadd.f32 %v4927_v22, %v6509_v20  ;;  %v6512_v20 = vld [vmem:[#allocation51_spill] sm:$0xff] }
 0x29f   : > { %1900 = vmatmul.f32.gmra.mxu1 %v4915_v6  ;;  %2037 = vst [vmem:[#allocation2 + $0x18] sm:$0xff] %v2009_v33  ;;  %2634 = vmatpush.msrb.mxu0 %v2381_v11  ;;  %v2379_v6 = vld [vmem:[#allocation5 + $0x490] sm:$0xff]  ;;  %v1557_v33 = vadd.f32 %v5125_v16, %v4944_v46  ;;  %v2373_v46 = vld [vmem:[#allocation5 + $0x460] sm:$0xff]  ;;  %v2246_v16 = vld [vmem:[#allocation5 + $0x68] sm:$0xff]  ;;  %v6350_v11 = vrot.slane %v5179_v37, 1 }
 0x2a0   : > { %v5193_v36 = vmax.f32 %v1349_v38, %v1854_v56  ;;  %2695 = vmatpush.msrb.mxu1 %v2250_v25  ;;  %v2375_v38 = vld [vmem:[#allocation5 + $0x470] sm:$0xff] }
 0x2a1   : > { %2635 = vmatpush.msrb.mxu0 %v2379_v6  ;;  %v1658_v40 = vadd.f32 %v5130_v24, %v1557_v33  ;;  %v2244_v24 = vld [vmem:[#allocation5 + $0x58] sm:$0xff] }
 0x2a2   : > { %v1955_v44 = vrot.slane %v5193_v36, 1  ;;  %2696 = vmatpush.msrb.mxu1 %v2248_v50 }
 0x2a3   : > { %v1755_v49 = vpop.f32.mrf.mxu0  ;;  %2636 = vmatpush.msrb.mxu0 %v2377_v14 }
 0x2a4   : > { %v1856_v41 = vpop.f32.mrf.mxu1  ;;  %v2000_v61 = vsel %vm552_vm0, %v1954_v8, %v1955_v44  ;;  %v1756_v9 = vadd.f32 %v1755_v49, %v1655_v19  ;;  %v2371_v19 = vld [vmem:[#allocation5 + $0x450] sm:$0xff]  ;;  %v5219_v49 = vpop.f32.mrf.mxu2  ;;  %2697 = vmatpush.msrb.mxu1 %v2246_v16  ;;  %v2236_v16 = vld [vmem:[#allocation5 + $0x18] sm:$0xff] }
 0x2a5   : > { %v2010_v39 = vmax.f32 %v1926_v34, %v2000_v61  ;;  %2637 = vmatpush.msrb.mxu0 %v2375_v38  ;;  %v5239_v33 = vpop.f32.mrf.mxu3 }
 0x2a6   : > { %v1857_v23 = vadd.f32 %v1856_v41, %v1756_v9  ;;  %1802 = vmatmul.f32.gmra.mxu0 %v6510_v1  ;;  %v2064_v8 = vld [vmem:[#allocation2 + $0x10] ss:$2 sm:$0xff]  ;;  %2698 = vmatpush.msrb.mxu1 %v2244_v24 }
 0x2a7   : > { %1903 = vmatmul.f32.gmra.mxu1 %v4933_v0  ;;  %2038 = vst [vmem:[#allocation2 + $0x20] sm:$0xff] %v2010_v39  ;;  %v2094_v34 = vadd.f32 %v5166_v26, %v2064_v8  ;;  %2638 = vmatpush.msrb.mxu0 %v2373_v46  ;;  %v2369_v9 = vld [vmem:[#allocation5 + $0x440] sm:$0xff]  ;;  %v6511_v39 = vld [vmem:[#allocation54_spill] sm:$0xff]  ;;  %v2238_v8 = vld [vmem:[#allocation5 + $0x28] sm:$0xff] }
 0x2a8   : > { %v5210_v56 = vmax.f32 %v1352_v12, %v1857_v23  ;;  %v1355_v14 = vadd.f32 %v4942_v21, %v6511_v39  ;;  %v2367_v12 = vld [vmem:[#allocation5 + $0x430] sm:$0xff]  ;;  %v2240_v1 = vld [vmem:[#allocation5 + $0x38] sm:$0xff]  ;;  %v2365_v21 = vld [vmem:[#allocation5 + $0x420] sm:$0xff] }
 0x2a9   : > { %v5212_v22 = vmax.f32 %v2094_v34, 0.0  ;;  %2639 = vmatpush.msrb.mxu0 %v2371_v19  ;;  %v2363_v46 = vld [vmem:[#allocation5 + $0x410] sm:$0xff]  ;;  %v2361_v24 = vld [vmem:[#allocation5 + $0x400] sm:$0xff] }
 0x2aa   : > { %v1956_v0 = vrot.slane %v5210_v56, 1 }
 0x2ab   : > { %v1758_v7 = vpop.f32.mrf.mxu0  ;;  %2412 = vmatmul.f32.gmra.mxu2 %v5212_v22  ;;  %v2122_v42 = vrot.slane %v5212_v22, 1  ;;  %2640 = vmatpush.msrb.mxu0 %v2369_v9 }
 0x2ac   : > { %v1859_v4 = vpop.f32.mrf.mxu1  ;;  %v1999_v41 = vsel %vm552_vm0, %v1955_v44, %v1956_v0  ;;  %v1759_v6 = vadd.f32 %v1758_v7, %v1658_v40  ;;  %v1560_v44 = vadd.f32 %v5135_v63, %v4960_v5  ;;  %v6513_v7 = vld [vmem:[#allocation58_spill] sm:$0xff]  ;;  %v5249_v19 = vpop.f32.mrf.mxu2 }
 0x2ad   : > { %v2011_v43 = vmax.f32 %v5193_v36, %v1999_v41  ;;  %v5230_v61 = vsel %vm552_vm0, %v6350_v11, %v2122_v42  ;;  %v2242_v36 = vld [vmem:[#allocation5 + $0x48] sm:$0xff]  ;;  %2641 = vmatpush.msrb.mxu0 %v2367_v12 }
 0x2ae   : > { %v1860_v25 = vadd.f32 %v1859_v4, %v1759_v6  ;;  %1805 = vmatmul.f32.gmra.mxu0 %v6512_v20  ;;  %2468 = vmatmul.f32.vlgmr.msra.gmra.mxu3 %v5230_v61  ;;  %v1661_v5 = vadd.f32 %v5147_v31, %v1560_v44  ;;  %v1358_v4 = vadd.f32 %v4958_v29, %v6513_v7  ;;  %v6514_v6 = vld [vmem:[#allocation55_spill] sm:$0xff] }
 0x2af   : > { %1906 = vmatmul.f32.gmra.mxu1 %v4948_v13  ;;  %2039 = vst [vmem:[#allocation2 + $0x28] sm:$0xff] %v2011_v43  ;;  %2642 = vmatpush.msrb.mxu0 %v2365_v21  ;;  %v1563_v31 = vadd.f32 %v5156_v62, %v4973_v28  ;;  %v2234_v43 = vld [vmem:[#allocation5 + $0x8] sm:$0xff]  ;;  %v5257_v62 = vpop.f32.mrf.mxu3 }
 0x2b0   : > { %v1929_v23 = vmax.f32 %v1355_v14, %v1860_v25  ;;  %2699 = vmatpush.msrb.mxu1 %v2242_v36  ;;  %v6351_v25 = vrot.slane %v5212_v22, 2  ;;  %v6515_v21 = vld [vmem:[#allocation60_spill] sm:$0xff] }
 0x2b1   : > { %2643 = vmatpush.msrb.mxu0 %v2363_v46  ;;  %v1664_v28 = vadd.f32 %v5161_v45, %v1563_v31  ;;  %v6348_v45 = vrot.slane %v5212_v22, 3  ;;  %v6517_v31 = vld [vmem:[#allocation62_spill] sm:$0xff] }
 0x2b2   : > { %v1957_v63 = vrot.slane %v1929_v23, 1  ;;  %2700 = vmatpush.msrb.mxu1 %v2240_v1 }
 0x2b3   : > { %v1761_v34 = vpop.f32.mrf.mxu0  ;;  %2644 = vmatpush.msrb.mxu0 %v2361_v24  ;;  %v6518_v24 = vld [vmem:[#allocation61_spill] sm:$0xff] }
 0x2b4   : > { %v1862_v13 = vpop.f32.mrf.mxu1  ;;  %v1998_v38 = vsel %vm552_vm0, %v1956_v0, %v1957_v63  ;;  %v1762_v50 = vadd.f32 %v1761_v34, %v1661_v5  ;;  %2701 = vmatpush.msrb.mxu1 %v2238_v8  ;;  %v1361_v5 = vadd.f32 %v4971_v10, %v6515_v21  ;;  %v6519_v21 = vld [vmem:[#allocation65_spill] sm:$0xff] }
 0x2b5   : > { %v2012_v40 = vmax.f32 %v5210_v56, %v1998_v38 }
 0x2b6   : > { %v1863_v41 = vadd.f32 %v1862_v13, %v1762_v50  ;;  %1808 = vmatmul.f32.gmra.mxu0 %v6514_v6  ;;  %v2066_v0 = vld [vmem:[#allocation2 + $0x20] ss:$2 sm:$0xff]  ;;  %2702 = vmatpush.msrb.mxu1 %v2236_v16  ;;  %v6516_v50 = vld [vmem:[#allocation59_spill] sm:$0xff]  ;;  %v1569_v6 = vadd.f32 %v5196_v47, %v4998_v35 }
 0x2b7   : > { %1909 = vmatmul.f32.gmra.mxu1 %v4964_v2  ;;  %2040 = vst [vmem:[#allocation2 + $0x30] sm:$0xff] %v2012_v40  ;;  %v2095_v56 = vadd.f32 %v5166_v26, %v2066_v0  ;;  %v5295_v40 = vpop.f32.mrf.mxu3 }
 0x2b8   : > { %v1930_v9 = vmax.f32 %v1358_v4, %v1863_v41  ;;  %2703 = vmatpush.msrb.mxu1 %v2234_v43  ;;  %v1364_v41 = vadd.f32 %v4984_v15, %v6517_v31  ;;  %v6521_v31 = vld [vmem:[#allocation35_spill] sm:$0xff] }
 0x2b9   : > { %v5254_v29 = vmax.f32 %v2095_v56, 0.0 }
 0x2ba   : > { %v1958_v39 = vrot.slane %v1930_v9, 1 }
 0x2bb   : > { %v1764_v14 = vpop.f32.mrf.mxu0  ;;  %2415 = vmatmul.f32.gmra.mxu2 %v5254_v29  ;;  %v2123_v44 = vrot.slane %v5254_v29, 1  ;;  %v2151_v20 = vrot.slane %v5254_v29, 2  ;;  %v2179_v36 = vrot.slane %v5254_v29, 3 }
 0x2bc   : > { %v1865_v2 = vpop.f32.mrf.mxu1  ;;  %v1997_v12 = vsel %vm552_vm0, %v1957_v63, %v1958_v39  ;;  %v1765_v1 = vadd.f32 %v1764_v14, %v1664_v28  ;;  %v1566_v63 = vadd.f32 %v5177_v59, %v4986_v51 }
 0x2bd   : > { %v2013_v8 = vmax.f32 %v1929_v23, %v1997_v12  ;;  %v5273_v34 = vsel %vm552_vm0, %v2122_v42, %v2123_v44  ;;  %v5279_v13 = vsel %vm609_vm1, %v6351_v25, %v2151_v20  ;;  %v5289_v10 = vsel %vm666_vm2, %v6348_v45, %v2179_v36  ;;  %v5292_v42 = vpop.f32.mrf.mxu2  ;;  %v6551_v25 = vld [vmem:[#allocation14_spill] sm:$0xff] }
 0x2be   : > { %v1866_v38 = vadd.f32 %v1865_v2, %v1765_v1  ;;  %1811 = vmatmul.f32.gmra.mxu0 %v6516_v50  ;;  %2471 = vmatmul.f32.gmra.mxu3 %v5273_v34  ;;  %v1667_v46 = vadd.f32 %v5183_v54, %v1566_v63 }
 0x2bf   : > { %1912 = vmatmul.f32.gmra.mxu1 %v4977_v17  ;;  %2041 = vst [vmem:[#allocation2 + $0x38] sm:$0xff] %v2013_v8  ;;  %v5329_v50 = vpop.f32.mrf.mxu3 }
 0x2c0   : > { %v1931_v23 = vmax.f32 %v1361_v5, %v1866_v38  ;;  %v1572_v38 = vadd.f32 %v5219_v49, %v5012_v27 }
 0x2c2   : > { %v1959_v51 = vrot.slane %v1931_v23, 1 }
 0x2c3   : > { %v1767_v59 = vpop.f32.mrf.mxu0 }
 0x2c4   : > { %v1868_v16 = vpop.f32.mrf.mxu1  ;;  %v1996_v17 = vsel %vm552_vm0, %v1958_v39, %v1959_v51  ;;  %v1768_v7 = vadd.f32 %v1767_v59, %v1667_v46 }
 0x2c5   : > { %v2014_v4 = vmax.f32 %v1930_v9, %v1996_v17  ;;  %v1670_v9 = vadd.f32 %v5205_v55, %v1569_v6  ;;  %v5309_v39 = vpop.f32.mrf.mxu2  ;;  %v1367_v55 = vadd.f32 %v4996_v30, %v6519_v21  ;;  %v6523_v21 = vld [vmem:[#allocation32_spill] sm:$0xff] }
 0x2c6   : > { %v1869_v0 = vadd.f32 %v1868_v16, %v1768_v7  ;;  %1814 = vmatmul.f32.gmra.mxu0 %v6518_v24  ;;  %v2068_v54 = vld [vmem:[#allocation2 + $0x30] ss:$2 sm:$0xff]  ;;  %v6349_v16 = vrot.slane %v5179_v37, 4 }
 0x2c7   : > { %1915 = vmatmul.f32.gmra.mxu1 %v4990_v32  ;;  %2042 = vst [vmem:[#allocation2 + $0x40] sm:$0xff] %v2014_v4  ;;  %v2096_v43 = vadd.f32 %v5166_v26, %v2068_v54  ;;  %v5358_v54 = vpop.f32.mrf.mxu3 }
 0x2c8   : > { %v1932_v56 = vmax.f32 %v1364_v41, %v1869_v0  ;;  %v1575_v41 = vadd.f32 %v5249_v19, %v6521_v31 }
 0x2c9   : > { %v5306_v28 = vmax.f32 %v2096_v43, 0.0 }
 0x2ca   : > { %v1960_v15 = vrot.slane %v1932_v56, 1 }
 0x2cb   : > { %v1770_v14 = vpop.f32.mrf.mxu0  ;;  %2418 = vmatmul.f32.gmra.mxu2 %v5306_v28  ;;  %v2124_v35 = vrot.slane %v5306_v28, 1  ;;  %v2152_v32 = vrot.slane %v5306_v28, 2  ;;  %v2180_v47 = vrot.slane %v5306_v28, 3 }
 0x2cc   : > { %v1871_v2 = vpop.f32.mrf.mxu1  ;;  %v1995_v12 = vsel %vm552_vm0, %v1959_v51, %v1960_v15  ;;  %v1771_v1 = vadd.f32 %v1770_v14, %v1670_v9  ;;  %v6520_v51 = vld [vmem:[#allocation63_spill] sm:$0xff]  ;;  %v2207_v9 = vrot.slane %v5254_v29, 4 }
 0x2cd   : > { %v2015_v5 = vmax.f32 %v1931_v23, %v1995_v12  ;;  %v5321_v8 = vsel %vm552_vm0, %v2123_v44, %v2124_v35  ;;  %v5325_v63 = vsel %vm609_vm1, %v2151_v20, %v2152_v32  ;;  %v5335_v30 = vsel %vm666_vm2, %v2179_v36, %v2180_v47  ;;  %v5341_v17 = vpop.f32.mrf.mxu2 }
 0x2ce   : > { %v1872_v46 = vadd.f32 %v1871_v2, %v1771_v1  ;;  %1817 = vmatmul.f32.gmra.mxu0 %v6520_v51  ;;  %2474 = vmatmul.f32.gmra.mxu3 %v5321_v8  ;;  %v2206_v20 = vrot.slane %v5212_v22, 4  ;;  %v1673_v23 = vadd.f32 %v5239_v33, %v1572_v38  ;;  %v1370_v33 = vadd.f32 %v5010_v53, %v4635_v48  ;;  %v6522_v1 = vld [vmem:[#allocation66_spill] sm:$0xff] }
 0x2cf   : > { %1918 = vmatmul.f32.gmra.mxu1 %v5004_v60  ;;  %2043 = vst [vmem:[#allocation2 + $0x48] sm:$0xff] %v2015_v5  ;;  %v1676_v48 = vadd.f32 %v5257_v62, %v1575_v41 }
 0x2d0   : > { %v1933_v44 = vmax.f32 %v1367_v55, %v1872_v46  ;;  %v5349_v4 = vsel %vm723_vm3, %v6349_v16, %v2206_v20  ;;  %v1373_v55 = vadd.f32 %v6523_v21, %v6522_v1  ;;  %v5378_v51 = vsel %vm723_vm3, %v2206_v20, %v2207_v9 }
 0x2d2   : > { %v1961_v27 = vrot.slane %v1933_v44, 1 }
 0x2d3   : > { %v1773_v49 = vpop.f32.mrf.mxu0 }
 0x2d4   : > { %v1874_v59 = vpop.f32.mrf.mxu1  ;;  %v1994_v60 = vsel %vm552_vm0, %v1960_v15, %v1961_v27  ;;  %v1774_v36 = vadd.f32 %v1773_v49, %v1673_v23  ;;  %v6524_v49 = vld [vmem:[#allocation39_spill] sm:$0xff] }
 0x2d5   : > { %v2016_v7 = vmax.f32 %v1932_v56, %v1994_v60  ;;  %v5386_v60 = vpop.f32.mrf.mxu2 }
 0x2d6   : > { %v1875_v6 = vadd.f32 %v1874_v59, %v1774_v36  ;;  %2645 = vmatmul.f32.vlgmr.msrb.gmra.mxu0 %v5349_v4  ;;  %v2070_v0 = vld [vmem:[#allocation2 + $0x40] ss:$2 sm:$0xff]  ;;  %v1578_v59 = vadd.f32 %v5292_v42, %v6524_v49  ;;  %v5397_v42 = vpop.f32.mrf.mxu3 }
 0x2d7   : > { %2704 = vmatmul.f32.vlgmr.msrb.gmra.mxu1 %v5179_v37  ;;  %2044 = vst [vmem:[#allocation2 + $0x50] sm:$0xff] %v2016_v7  ;;  %v2097_v24 = vadd.f32 %v5166_v26, %v2070_v0  ;;  %v6525_v0 = vld [vmem:[#allocation67_spill] sm:$0xff]  ;;  %v6527_v49 = vld [vmem:[#allocation68_spill] sm:$0xff] }
 0x2d8   : > { %v1934_v43 = vmax.f32 %v1370_v33, %v1875_v6  ;;  %v1679_v20 = vadd.f32 %v5295_v40, %v1578_v59  ;;  %v1581_v40 = vadd.f32 %v5309_v39, %v5030_v3  ;;  %v1379_v59 = vadd.f32 %v5028_v57, %v6527_v49 }
 0x2d9   : > { %v5360_v56 = vmax.f32 %v2097_v24, 0.0  ;;  %v6526_v24 = vld [vmem:[#allocation36_spill] sm:$0xff] }
 0x2da   : > { %v1962_v53 = vrot.slane %v1934_v43, 1 }
 0x2db   : > { %v1776_v19 = vpop.f32.mrf.mxu0  ;;  %2421 = vmatmul.f32.gmra.mxu2 %v5360_v56  ;;  %v2125_v14 = vrot.slane %v5360_v56, 1  ;;  %v2153_v2 = vrot.slane %v5360_v56, 2  ;;  %v2181_v12 = vrot.slane %v5360_v56, 3  ;;  %v2209_v21 = vrot.slane %v5360_v56, 4 }
 0x2dc   : > { %v1877_v15 = vpop.f32.mrf.mxu1  ;;  %v1993_v5 = vsel %vm552_vm0, %v1961_v27, %v1962_v53  ;;  %v1777_v38 = vadd.f32 %v1776_v19, %v1676_v48  ;;  %v1376_v48 = vadd.f32 %v6526_v24, %v6525_v0 }
 0x2dd   : > { %v2017_v46 = vmax.f32 %v1933_v44, %v1993_v5  ;;  %v5374_v62 = vsel %vm552_vm0, %v2124_v35, %v2125_v14  ;;  %v5382_v23 = vsel %vm609_vm1, %v2152_v32, %v2153_v2  ;;  %v5392_v35 = vsel %vm666_vm2, %v2180_v47, %v2181_v12 }
 0x2de   : > { %v1878_v27 = vadd.f32 %v1877_v15, %v1777_v38  ;;  %2477 = vmatmul.f32.gmra.mxu3 %v5374_v62  ;;  %2648 = vmatmul.f32.gmra.mxu0 %v5378_v51  ;;  %v2208_v32 = vrot.slane %v5306_v28, 4 }
 0x2df   : > { %2045 = vst [vmem:[#allocation2 + $0x58] sm:$0xff] %v2017_v46  ;;  %2707 = vmatmul.f32.gmra.mxu1 %v5212_v22 }
 0x2e0   : > { %v1935_v44 = vmax.f32 %v1373_v55, %v1878_v27  ;;  %v5403_v47 = vsel %vm723_vm3, %v2207_v9, %v2208_v32  ;;  %v1682_v55 = vadd.f32 %v5329_v50, %v1581_v40  ;;  %v5424_v27 = vpop.f32.mrf.mxu3 }
 0x2e2   : > { %v1963_v36 = vrot.slane %v1935_v44, 1 }
 0x2e3   : > { %v1779_v7 = vpop.f32.mrf.mxu0 }
 0x2e4   : > { %v1880_v33 = vpop.f32.mrf.mxu1  ;;  %v1992_v31 = vsel %vm552_vm0, %v1962_v53, %v1963_v36  ;;  %v1780_v41 = vadd.f32 %v1779_v7, %v1679_v20 }
 0x2e5   : > { %v2018_v6 = vmax.f32 %v1934_v43, %v1992_v31  ;;  %v5412_v43 = vpop.f32.mrf.mxu2  ;;  %v5436_v31 = vsel %vm723_vm3, %v2208_v32, %v2209_v21  ;;  %v2327_v32 = vld [vmem:[#allocation5 + $0x2f0] sm:$0xff] }
 0x2e6   : > { %v1881_v19 = vadd.f32 %v1880_v33, %v1780_v41  ;;  %2651 = vmatmul.f32.gmra.mxu0 %v5403_v47  ;;  %v2072_v15 = vld [vmem:[#allocation2 + $0x50] ss:$2 sm:$0xff]  ;;  %2511 = vmatpush.msrb.mxu2 %v2327_v32 }
 0x2e7   : > { %2046 = vst [vmem:[#allocation2 + $0x60] sm:$0xff] %v2018_v6  ;;  %2710 = vmatmul.f32.gmra.mxu1 %v5254_v29  ;;  %v2098_v53 = vadd.f32 %v5166_v26, %v2072_v15  ;;  %v6528_v15 = vld [vmem:[#allocation69_spill] sm:$0xff] }
 0x2e8   : > { %v1936_v1 = vmax.f32 %v1376_v48, %v1881_v19 }
 0x2e9   : > { %v5414_v9 = vmax.f32 %v2098_v53, 0.0  ;;  %v6529_v53 = vld [vmem:[#allocation40_spill] sm:$0xff] }
 0x2ea   : > { %v1964_v5 = vrot.slane %v1936_v1, 1 }
 0x2eb   : > { %v1782_v3 = vpop.f32.mrf.mxu0  ;;  %2424 = vmatmul.f32.gmra.mxu2 %v5414_v9  ;;  %v2126_v38 = vrot.slane %v5414_v9, 1  ;;  %v2154_v29 = vrot.slane %v5414_v9, 2  ;;  %v2182_v46 = vrot.slane %v5414_v9, 3 }
 0x2ec   : > { %v1883_v39 = vpop.f32.mrf.mxu1  ;;  %v1991_v20 = vsel %vm552_vm0, %v1963_v36, %v1964_v5  ;;  %v1783_v50 = vadd.f32 %v1782_v3, %v1682_v55  ;;  %v1584_v36 = vadd.f32 %v5341_v17, %v5036_v18  ;;  %v2210_v18 = vrot.slane %v5414_v9, 4  ;;  %v6530_v3 = vld [vmem:[#allocation45_spill] sm:$0xff] }
 0x2ed   : > { %v2019_v7 = vmax.f32 %v1935_v44, %v1991_v20  ;;  %v5432_v33 = vsel %vm552_vm0, %v2125_v14, %v2126_v38  ;;  %v5442_v57 = vsel %vm609_vm1, %v2153_v2, %v2154_v29  ;;  %v5452_v14 = vsel %vm666_vm2, %v2181_v12, %v2182_v46  ;;  %v2359_v2 = vld [vmem:[#allocation5 + $0x3f0] sm:$0xff]  ;;  %v5457_v6 = vpop.f32.mrf.mxu2 }
 0x2ee   : > { %v1884_v44 = vadd.f32 %v1883_v39, %v1783_v50  ;;  %2480 = vmatmul.f32.gmra.mxu3 %v5432_v33  ;;  %2654 = vmatmul.f32.gmra.mxu0 %v5436_v31  ;;  %v1685_v17 = vadd.f32 %v5358_v54, %v1584_v36  ;;  %v1382_v55 = vadd.f32 %v6529_v53, %v6528_v15  ;;  %v5469_v39 = vpop.f32.mrf.mxu3  ;;  %v2323_v20 = vld [vmem:[#allocation5 + $0x2d0] sm:$0xff] }
 0x2ef   : > { %2047 = vst [vmem:[#allocation2 + $0x68] sm:$0xff] %v2019_v7  ;;  %2713 = vmatmul.f32.gmra.mxu1 %v5306_v28  ;;  %2570 = vmatpush.msrb.mxu3 %v2359_v2  ;;  %v5463_v28 = vsel %vm723_vm3, %v2209_v21, %v2210_v18  ;;  %v1587_v54 = vadd.f32 %v5386_v60, %v6530_v3  ;;  %v2357_v21 = vld [vmem:[#allocation5 + $0x3e0] sm:$0xff] }
 0x2f0   : > { %v1937_v41 = vmax.f32 %v1379_v59, %v1884_v44 }
 0x2f1   : > { %2571 = vmatpush.msrb.mxu3 %v2357_v21  ;;  %v1688_v60 = vadd.f32 %v5397_v42, %v1587_v54 }
 0x2f2   : > { %v1965_v0 = vrot.slane %v1937_v41, 1 }
 0x2f3   : > { %v1785_v24 = vpop.f32.mrf.mxu0 }
 0x2f4   : > { %v1886_v48 = vpop.f32.mrf.mxu1  ;;  %v1990_v12 = vsel %vm552_vm0, %v1964_v5, %v1965_v0  ;;  %v1786_v40 = vadd.f32 %v1785_v24, %v1685_v17  ;;  %v2325_v5 = vld [vmem:[#allocation5 + $0x2e0] sm:$0xff] }
 0x2f5   : > { %v2020_v19 = vmax.f32 %v1936_v1, %v1990_v12  ;;  %2512 = vmatpush.msrb.mxu2 %v2325_v5  ;;  %v6532_v12 = vld [vmem:[#allocation43_spill] sm:$0xff] }
 0x2f6   : > { %v1887_v49 = vadd.f32 %v1886_v48, %v1786_v40  ;;  %2657 = vmatmul.f32.gmra.mxu0 %v5463_v28  ;;  %v2074_v59 = vld [vmem:[#allocation2 + $0x60] ss:$2 sm:$0xff] }
 0x2f7   : > { %2048 = vst [vmem:[#allocation2 + $0x70] sm:$0xff] %v2020_v19  ;;  %2716 = vmatmul.f32.gmra.mxu1 %v5360_v56  ;;  %v2099_v1 = vadd.f32 %v5166_v26, %v2074_v59  ;;  %2513 = vmatpush.msrb.mxu2 %v2323_v20  ;;  %v6531_v48 = vld [vmem:[#allocation70_spill] sm:$0xff]  ;;  %v1595_v19 = vpop.f32.mrf.mxu2  ;;  %v1696_v59 = vpop.f32.mrf.mxu3 }
 0x2f8   : > { %v1938_v50 = vmax.f32 %v1382_v55, %v1887_v49  ;;  %v1385_v40 = vadd.f32 %v6532_v12, %v6531_v48  ;;  %v6536_v48 = vld [vmem:[#allocation44_spill] sm:$0xff] }
 0x2f9   : > { %v5474_v7 = vmax.f32 %v2099_v1, 0.0 }
 0x2fa   : > { %v1966_v36 = vrot.slane %v1938_v50, 1 }
 0x2fb   : > { %v1788_v44 = vpop.f32.mrf.mxu0  ;;  %2427 = vmatmul.f32.gmra.mxu2 %v5474_v7  ;;  %v2127_v56 = vrot.slane %v5474_v7, 1  ;;  %v2211_v2 = vrot.slane %v5474_v7, 4  ;;  %v2155_v17 = vrot.slane %v5474_v7, 2  ;;  %v2183_v24 = vrot.slane %v5474_v7, 3 }
 0x2fc   : > { %v1889_v32 = vpop.f32.mrf.mxu1  ;;  %v1989_v42 = vsel %vm552_vm0, %v1965_v0, %v1966_v36  ;;  %v1789_v15 = vadd.f32 %v1788_v44, %v1688_v60  ;;  %v6534_v0 = vld [vmem:[#allocation48_spill] sm:$0xff] }
 0x2fd   : > { %v2021_v53 = vmax.f32 %v1937_v41, %v1989_v42  ;;  %v5492_v55 = vsel %vm552_vm0, %v2126_v38, %v2127_v56  ;;  %v5498_v3 = vsel %vm723_vm3, %v2210_v18, %v2211_v2  ;;  %v5506_v41 = vsel %vm609_vm1, %v2154_v29, %v2155_v17  ;;  %v2355_v29 = vld [vmem:[#allocation5 + $0x3d0] sm:$0xff]  ;;  %v2321_v18 = vld [vmem:[#allocation5 + $0x2c0] sm:$0xff] }
 0x2fe   : > { %6533 = vst [vmem:[#allocation23_spill] sm:$0xff] %v5492_v55  ;;  %v1590_v54 = vadd.f32 %v5412_v43, %v6534_v0  ;;  %v1890_v49 = vadd.f32 %v1889_v32, %v1789_v15  ;;  %2483 = vmatmul.f32.gmra.mxu3 %v5492_v55  ;;  %2660 = vmatmul.f32.gmra.mxu0 %v5498_v3  ;;  %v6535_v32 = vld [vmem:[#allocation71_spill] sm:$0xff] }
 0x2ff   : > { %v5518_v38 = vsel %vm666_vm2, %v2182_v46, %v2183_v24  ;;  %2049 = vst [vmem:[#allocation2 + $0x78] sm:$0xff] %v2021_v53  ;;  %2719 = vmatmul.f32.gmra.mxu1 %v5414_v9  ;;  %2572 = vmatpush.msrb.mxu3 %v2355_v29  ;;  %v1388_v12 = vadd.f32 %v6536_v48, %v6535_v32  ;;  %v6537_v9 = vld [vmem:[#allocation52_spill] sm:$0xff]  ;;  %v1598_v15 = vpop.f32.mrf.mxu2  ;;  %v2353_v0 = vld [vmem:[#allocation5 + $0x3c0] sm:$0xff]  ;;  %v6539_v48 = vld [vmem:[#allocation49_spill] sm:$0xff] }
 0x300   : > { %v1939_v43 = vmax.f32 %v1385_v40, %v1890_v49  ;;  %2514 = vmatpush.msrb.mxu2 %v2321_v18  ;;  %v1691_v1 = vadd.f32 %v5424_v27, %v1590_v54  ;;  %v1593_v42 = vadd.f32 %v5457_v6, %v6537_v9  ;;  %v2319_v54 = vld [vmem:[#allocation5 + $0x2b0] sm:$0xff]  ;;  %v1699_v18 = vpop.f32.mrf.mxu3  ;;  %v6538_v32 = vld [vmem:[#allocation72_spill] sm:$0xff] }
 0x301   : > { %v2351_v49 = vld [vmem:[#allocation5 + $0x3b0] sm:$0xff]  ;;  %2573 = vmatpush.msrb.mxu3 %v2353_v0 }
 0x302   : > { %v1967_v5 = vrot.slane %v1939_v43, 1  ;;  %2515 = vmatpush.msrb.mxu2 %v2319_v54  ;;  %v1694_v29 = vadd.f32 %v5469_v39, %v1593_v42 }
 0x303   : > { %v1791_v21 = vpop.f32.mrf.mxu0  ;;  %2574 = vmatpush.msrb.mxu3 %v2351_v49 }
 0x304   : > { %v1892_v20 = vpop.f32.mrf.mxu1  ;;  %v1988_v60 = vsel %vm552_vm0, %v1966_v36, %v1967_v5  ;;  %v1792_v44 = vadd.f32 %v1791_v21, %v1691_v1 }
 0x305   : > { %v2022_v46 = vmax.f32 %v1938_v50, %v1988_v60 }
 0x306   : > { %v1893_v40 = vadd.f32 %v1892_v20, %v1792_v44  ;;  %v2076_v53 = vld [vmem:[#allocation2 + $0x70] ss:$2 sm:$0xff] }
 0x307   : > { %2050 = vst [vmem:[#allocation2 + $0x80] sm:$0xff] %v2022_v46  ;;  %2722 = vmatmul.f32.gmra.mxu1 %v5474_v7  ;;  %v2100_v27 = vadd.f32 %v5166_v26, %v2076_v53  ;;  %v1601_v54 = vpop.f32.mrf.mxu2 }
 0x308   : > { %v1940_v36 = vmax.f32 %v1388_v12, %v1893_v40  ;;  %v1391_v12 = vadd.f32 %v6539_v48, %v6538_v32  ;;  %v1702_v32 = vpop.f32.mrf.mxu3 }
 0x309   : > { %v5530_v50 = vmax.f32 %v2100_v27, 0.0 }
 0x30a   : > { %v1968_v6 = vrot.slane %v1940_v36, 1 }
 0x30b   : > { %v1794_v1 = vpop.f32.mrf.mxu0  ;;  %2430 = vmatmul.f32.gmra.mxu2 %v5530_v50  ;;  %v2128_v20 = vrot.slane %v5530_v50, 1  ;;  %v2212_v60 = vrot.slane %v5530_v50, 4  ;;  %v2156_v44 = vrot.slane %v5530_v50, 2  ;;  %v2184_v46 = vrot.slane %v5530_v50, 3 }
 0x30c   : > { %v1895_v21 = vpop.f32.mrf.mxu1  ;;  %v1987_v39 = vsel %vm552_vm0, %v1967_v5, %v1968_v6  ;;  %v1795_v9 = vadd.f32 %v1794_v1, %v1694_v29  ;;  %v6541_v5 = vld [vmem:[#allocation56_spill] sm:$0xff] }
 0x30d   : > { %v2023_v42 = vmax.f32 %v1939_v43, %v1987_v39  ;;  %v5546_v40 = vsel %vm552_vm0, %v2127_v56, %v2128_v20  ;;  %v5552_v53 = vsel %vm723_vm3, %v2211_v2, %v2212_v60  ;;  %v5558_v27 = vsel %vm609_vm1, %v2155_v17, %v2156_v44  ;;  %v2317_v2 = vld [vmem:[#allocation5 + $0x2a0] sm:$0xff]  ;;  %v6542_v39 = vld [vmem:[#allocation73_spill] sm:$0xff] }
 0x30e   : > { %6540 = vst [vmem:[#allocation24_spill] sm:$0xff] %v5546_v40  ;;  %v1596_v43 = vadd.f32 %v1595_v19, %v6541_v5  ;;  %v1896_v0 = vadd.f32 %v1895_v21, %v1795_v9  ;;  %2486 = vmatmul.f32.gmra.mxu3 %v5546_v40  ;;  %2663 = vmatmul.f32.gmra.mxu0 %v5552_v53  ;;  %v2349_v17 = vld [vmem:[#allocation5 + $0x3a0] sm:$0xff]  ;;  %v6543_v9 = vld [vmem:[#allocation53_spill] sm:$0xff] }
 0x30f   : > { %v5569_v56 = vsel %vm666_vm2, %v2183_v24, %v2184_v46  ;;  %2051 = vst [vmem:[#allocation2 + $0x88] sm:$0xff] %v2023_v42  ;;  %2725 = vmatmul.f32.gmra.mxu1 %v5530_v50  ;;  %2516 = vmatpush.msrb.mxu2 %v2317_v2  ;;  %v1394_v42 = vadd.f32 %v6543_v9, %v6542_v39  ;;  %v6544_v5 = vld [vmem:[#allocation11_spill] sm:$0xff] }
 0x310   : > { %v1941_v19 = vmax.f32 %v1391_v12, %v1896_v0  ;;  %2575 = vmatpush.msrb.mxu3 %v2349_v17  ;;  %v1697_v49 = vadd.f32 %v1696_v59, %v1596_v43  ;;  %v1599_v45 = vadd.f32 %v1598_v15, %v6544_v5  ;;  %v2315_v59 = vld [vmem:[#allocation5 + $0x290] sm:$0xff]  ;;  %v1604_v17 = vpop.f32.mrf.mxu2 }
 0x311   : > { %v2347_v43 = vld [vmem:[#allocation5 + $0x390] sm:$0xff]  ;;  %2517 = vmatpush.msrb.mxu2 %v2315_v59 }
 0x312   : > { %v1969_v29 = vrot.slane %v1941_v19, 1  ;;  %2576 = vmatpush.msrb.mxu3 %v2347_v43  ;;  %v1705_v43 = vpop.f32.mrf.mxu3 }
 0x313   : > { %v1797_v1 = vpop.f32.mrf.mxu0 }
 0x314   : > { %v1898_v21 = vpop.f32.mrf.mxu1  ;;  %v1986_v7 = vsel %vm552_vm0, %v1968_v6, %v1969_v29  ;;  %v1798_v48 = vadd.f32 %v1797_v1, %v1697_v49  ;;  %v1700_v6 = vadd.f32 %v1699_v18, %v1599_v45 }
 0x315   : > { %v2024_v24 = vmax.f32 %v1940_v36, %v1986_v7  ;;  %v6545_v7 = vld [vmem:[#allocation74_spill] sm:$0xff] }
 0x316   : > { %v1899_v16 = vadd.f32 %v1898_v21, %v1798_v48  ;;  %v2078_v11 = vld [vmem:[#allocation2 + $0x80] ss:$2 sm:$0xff] }
 0x317   : > { %2052 = vst [vmem:[#allocation2 + $0x90] sm:$0xff] %v2024_v24  ;;  %v2101_v12 = vadd.f32 %v5166_v26, %v2078_v11  ;;  %v6546_v48 = vld [vmem:[#allocation57_spill] sm:$0xff] }
 0x318   : > { %v1942_v0 = vmax.f32 %v1394_v42, %v1899_v16  ;;  %v1397_v24 = vadd.f32 %v6546_v48, %v6545_v7 }
 0x319   : > { %v5578_v2 = vmax.f32 %v2101_v12, 0.0  ;;  %v6548_v12 = vld [vmem:[#allocation12_spill] sm:$0xff] }
 0x31a   : > { %v1970_v36 = vrot.slane %v1942_v0, 1  ;;  %v1602_v59 = vadd.f32 %v1601_v54, %v6548_v12  ;;  %v6550_v12 = vld [vmem:[#allocation64_spill] sm:$0xff] }
 0x31b   : > { %v1800_v49 = vpop.f32.mrf.mxu0  ;;  %2433 = vmatmul.f32.gmra.mxu2 %v5578_v2  ;;  %2728 = vmatmul.f32.gmra.mxu1 %v5578_v2  ;;  %v2129_v15 = vrot.slane %v5578_v2, 1  ;;  %v2213_v11 = vrot.slane %v5578_v2, 4  ;;  %v2157_v21 = vrot.slane %v5578_v2, 2  ;;  %v6352_v16 = vrot.slane %v5578_v2, 3 }
 0x31c   : > { %v1901_v1 = vpop.f32.mrf.mxu1  ;;  %v1985_v45 = vsel %vm552_vm0, %v1969_v29, %v1970_v36  ;;  %v1801_v18 = vadd.f32 %v1800_v49, %v1700_v6  ;;  %v1703_v54 = vadd.f32 %v1702_v32, %v1602_v59  ;;  %v2311_v32 = vld [vmem:[#allocation5 + $0x270] sm:$0xff] }
 0x31d   : > { %v2025_v39 = vmax.f32 %v1941_v19, %v1985_v45  ;;  %v5592_v9 = vsel %vm552_vm0, %v2128_v20, %v2129_v15  ;;  %v5596_v42 = vsel %vm723_vm3, %v2212_v60, %v2213_v11  ;;  %v5600_v5 = vsel %vm609_vm1, %v2156_v44, %v2157_v21  ;;  %v2313_v60 = vld [vmem:[#allocation5 + $0x280] sm:$0xff]  ;;  %v2343_v59 = vld [vmem:[#allocation5 + $0x370] sm:$0xff] }
 0x31e   : > { %6547 = vst [vmem:[#allocation25_spill] sm:$0xff] %v5592_v9  ;;  %v1902_v7 = vadd.f32 %v1901_v1, %v1801_v18  ;;  %2489 = vmatmul.f32.gmra.mxu3 %v5592_v9  ;;  %2666 = vmatmul.f32.gmra.mxu0 %v5596_v42  ;;  %v5611_v20 = vsel %vm666_vm2, %v2184_v46, %v6352_v16  ;;  %v2345_v44 = vld [vmem:[#allocation5 + $0x380] sm:$0xff]  ;;  %v1607_v1 = vpop.f32.mrf.mxu2 }
 0x31f   : > { %2053 = vst [vmem:[#allocation2 + $0x98] sm:$0xff] %v2025_v39  ;;  %2518 = vmatpush.msrb.mxu2 %v2313_v60  ;;  %2577 = vmatpush.msrb.mxu3 %v2345_v44  ;;  %v6549_v18 = vld [vmem:[#allocation75_spill] sm:$0xff]  ;;  %v1605_v39 = vadd.f32 %v1604_v17, %v6551_v25 }
 0x320   : > { %v1943_v19 = vmax.f32 %v1397_v24, %v1902_v7  ;;  %v1400_v46 = vadd.f32 %v6550_v12, %v6549_v18  ;;  %v1708_v7 = vpop.f32.mrf.mxu3 }
 0x321   : > { %2519 = vmatpush.msrb.mxu2 %v2311_v32  ;;  %2578 = vmatpush.msrb.mxu3 %v2343_v59 }
 0x322   : > { %v1971_v29 = vrot.slane %v1943_v19, 1 }
 0x323   : > { %v1803_v6 = vpop.f32.mrf.mxu0 }
 0x324   : > { %v1904_v49 = vpop.f32.mrf.mxu1  ;;  %v1984_v48 = vsel %vm552_vm0, %v1970_v36, %v1971_v29  ;;  %v1804_v45 = vadd.f32 %v1803_v6, %v1703_v54  ;;  %v1706_v36 = vadd.f32 %v1705_v43, %v1605_v39 }
 0x325   : > { %v2026_v50 = vmax.f32 %v1942_v0, %v1984_v48 }
 0x326   : > { %v1905_v16 = vadd.f32 %v1904_v49, %v1804_v45  ;;  %v2080_v9 = vld [vmem:[#allocation2 + $0x90] ss:$2 sm:$0xff]  ;;  %v6553_v49 = vld [vmem:[#allocation13_spill] sm:$0xff] }
 0x327   : > { %2054 = vst [vmem:[#allocation2 + $0xa0] sm:$0xff] %v2026_v50  ;;  %v2102_v24 = vadd.f32 %v5166_v26, %v2080_v9  ;;  %v6552_v9 = vld [vmem:[#allocation76_spill] sm:$0xff]  ;;  %v2392_v50 = vld [vmem:[#allocation5 + $0x4f8] sm:$0xff] }
 0x328   : > { %v1944_v60 = vmax.f32 %v1400_v46, %v1905_v16  ;;  %v1403_v48 = vadd.f32 %v6553_v49, %v6552_v9  ;;  %2924 = vmatpush.msra.mxu1 %v2392_v50  ;;  %v1711_v49 = vpop.f32.mrf.mxu3 }
 0x329   : > { %v5619_v44 = vmax.f32 %v2102_v24, 0.0  ;;  %v1610_v24 = vpop.f32.mrf.mxu2 }
 0x32a   : > { %v1972_v0 = vrot.slane %v1944_v60, 1 }
 0x32b   : > { %v1806_v54 = vpop.f32.mrf.mxu0  ;;  %2436 = vmatmul.f32.gmra.mxu2 %v5619_v44  ;;  %2731 = vmatmul.f32.gmra.mxu1 %v5619_v44  ;;  %v6357_v25 = vrot.slane %v5619_v44, 1  ;;  %v6356_v26 = vrot.slane %v5619_v44, 4  ;;  %v6355_v17 = vrot.slane %v5619_v44, 2  ;;  %v6354_v16 = vrot.slane %v5619_v44, 3 }
 0x32c   : > { %v1907_v6 = vpop.f32.mrf.mxu1  ;;  %v1983_v43 = vsel %vm552_vm0, %v1971_v29, %v1972_v0  ;;  %v1807_v45 = vadd.f32 %v1806_v54, %v1706_v36  ;;  %v2341_v36 = vld [vmem:[#allocation5 + $0x360] sm:$0xff]  ;;  %v2307_v54 = vld [vmem:[#allocation5 + $0x250] sm:$0xff] }
 0x32d   : > { %v2027_v18 = vmax.f32 %v1943_v19, %v1983_v43  ;;  %v5635_v12 = vsel %vm552_vm0, %v2129_v15, %v6357_v25  ;;  %v5641_v46 = vsel %vm723_vm3, %v2213_v11, %v6356_v26  ;;  %v5647_v29 = vsel %vm609_vm1, %v2157_v21, %v6355_v17  ;;  %v6555_v19 = vld [vmem:[#allocation16_spill] sm:$0xff]  ;;  %v2309_v21 = vld [vmem:[#allocation5 + $0x260] sm:$0xff]  ;;  %2579 = vmatpush.msrb.mxu3 %v2341_v36  ;;  %v6559_v36 = vld [vmem:[#allocation18_spill] sm:$0xff] }
 0x32e   : > { %6554 = vst [vmem:[#allocation26_spill] sm:$0xff] %v5635_v12  ;;  %v1608_v39 = vadd.f32 %v1607_v1, %v6555_v19  ;;  %v1908_v32 = vadd.f32 %v1907_v6, %v1807_v45  ;;  %2492 = vmatmul.f32.gmra.mxu3 %v5635_v12  ;;  %2669 = vmatmul.f32.gmra.mxu0 %v5641_v46  ;;  %v2390_v15 = vld [vmem:[#allocation5 + $0x4e8] sm:$0xff]  ;;  %v6556_v11 = vrot.slane %v5578_v2, 3  ;;  %v2388_v6 = vld [vmem:[#allocation5 + $0x4d8] sm:$0xff]  ;;  %v6564_v12 = vrot.slane %v5619_v44, 1 }
 0x32f   : > { %2055 = vst [vmem:[#allocation2 + $0xa8] sm:$0xff] %v2027_v18  ;;  %2925 = vmatpush.msra.mxu1 %v2390_v15  ;;  %2520 = vmatpush.msrb.mxu2 %v2309_v21  ;;  %v2386_v2 = vld [vmem:[#allocation5 + $0x4c8] sm:$0xff]  ;;  %v2384_v15 = vld [vmem:[#allocation5 + $0x4b8] sm:$0xff] }
 0x330   : > { %v5658_v59 = vsel %vm666_vm2, %v6556_v11, %v6354_v16  ;;  %v5660_v1 = vmax.f32 %v1403_v48, %v1908_v32  ;;  %v1709_v9 = vadd.f32 %v1708_v7, %v1608_v39  ;;  %v6557_v32 = vld [vmem:[#allocation77_spill] sm:$0xff]  ;;  %v6558_v11 = vld [vmem:[#allocation15_spill] sm:$0xff]  ;;  %v1611_v7 = vadd.f32 %v1610_v24, %v6559_v36  ;;  %v2382_v16 = vld [vmem:[#allocation5 + $0x4a8] sm:$0xff]  ;;  %v1714_v25 = vpop.f32.mrf.mxu3 }
 0x331   : > { %2926 = vmatpush.msra.mxu1 %v2388_v6  ;;  %2521 = vmatpush.msrb.mxu2 %v2307_v54  ;;  %v1406_v21 = vadd.f32 %v6558_v11, %v6557_v32  ;;  %v5671_v54 = vld [vmem:[%s6289_s4] ss:$0 sm:$0xff]  ;;  %v6560_v32 = vld [vmem:[#allocation78_spill] sm:$0xff]  ;;  %v6561_v11 = vld [vmem:[#allocation17_spill] sm:$0xff] }
 0x332   : > { %v1973_v43 = vrot.slane %v5660_v1, 1  ;;  %v1409_v36 = vadd.f32 %v6561_v11, %v6560_v32  ;;  %v2335_v11 = vld [vmem:[#allocation5 + $0x330] sm:$0xff]  ;;  %v2376_v26 = vld [vmem:[#allocation5 + $0x478] sm:$0xff] }
 0x333   : > { %v1809_v45 = vpop.f32.mrf.mxu0  ;;  %2927 = vmatpush.msra.mxu1 %v2386_v2 }
 0x334   : > { %v1910_v50 = vpop.f32.mrf.mxu1  ;;  %v1982_v18 = vsel %vm552_vm0, %v1972_v0, %v1973_v43  ;;  %v1810_v19 = vadd.f32 %v1809_v45, %v1709_v9  ;;  %v2360_v9 = vld [vmem:[#allocation5 + $0x3f8] sm:$0xff]  ;;  %v2339_v45 = vld [vmem:[#allocation5 + $0x350] sm:$0xff] }
 0x335   : > { %v2028_v48 = vmax.f32 %v1944_v60, %v1982_v18  ;;  %2928 = vmatpush.msra.mxu1 %v2384_v15  ;;  %v1613_v60 = vpop.f32.mrf.mxu2  ;;  %v2305_v18 = vld [vmem:[#allocation5 + $0x240] sm:$0xff]  ;;  %2865 = vmatpush.msra.mxu0 %v2360_v9 }
 0x336   : > { %v1911_v39 = vadd.f32 %v1910_v50, %v1810_v19  ;;  %v2082_v6 = vld [vmem:[#allocation2 + $0xa0] ss:$2 sm:$0xff]  ;;  %v2337_v15 = vld [vmem:[#allocation5 + $0x340] sm:$0xff]  ;;  %2580 = vmatpush.msrb.mxu3 %v2339_v45  ;;  %2522 = vmatpush.msrb.mxu2 %v2305_v18 }
 0x337   : > { %2056 = vst [vmem:[#allocation2 + $0xb0] sm:$0xff] %v2028_v48  ;;  %v2103_v0 = vadd.f32 %v5671_v54, %v2082_v6  ;;  %2929 = vmatpush.msra.mxu1 %v2382_v16  ;;  %v2303_v50 = vld [vmem:[#allocation5 + $0x230] sm:$0xff]  ;;  %v2380_v19 = vld [vmem:[#allocation5 + $0x498] sm:$0xff]  ;;  %v2358_v48 = vld [vmem:[#allocation5 + $0x3e8] sm:$0xff]  ;;  %v1712_v6 = vadd.f32 %v1711_v49, %v1611_v7 }
 0x338   : > { %v5674_v2 = vmax.f32 %v1406_v21, %v1911_v39  ;;  %2866 = vmatpush.msra.mxu0 %v2358_v48  ;;  %v2378_v21 = vld [vmem:[#allocation5 + $0x488] sm:$0xff]  ;;  %v2356_v45 = vld [vmem:[#allocation5 + $0x3d8] sm:$0xff]  ;;  %2581 = vmatpush.msrb.mxu3 %v2337_v15 }
 0x339   : > { %v5676_v24 = vmax.f32 %v2103_v0, 0.0  ;;  %2930 = vmatpush.msra.mxu1 %v2380_v19  ;;  %v6562_v7 = vld [vmem:[#allocation20_spill] sm:$0xff]  ;;  %2523 = vmatpush.msrb.mxu2 %v2303_v50 }
 0x33a   : > { %v1974_v16 = vrot.slane %v5674_v2, 1  ;;  %v1614_v32 = vadd.f32 %v1613_v60, %v6562_v7  ;;  %2867 = vmatpush.msra.mxu0 %v2356_v45  ;;  %v2354_v50 = vld [vmem:[#allocation5 + $0x3c8] sm:$0xff]  ;;  %2582 = vmatpush.msrb.mxu3 %v2335_v11  ;;  %v2352_v45 = vld [vmem:[#allocation5 + $0x3b8] sm:$0xff] }
 0x33b   : > { %v1812_v39 = vpop.f32.mrf.mxu0  ;;  %2439 = vmatmul.f32.gmra.mxu2 %v5676_v24  ;;  %2734 = vmatmul.f32.gmra.mxu1 %v5676_v24  ;;  %v6359_v18 = vrot.slane %v5676_v24, 2  ;;  %v6563_v9 = vrot.slane %v5676_v24, 1  ;;  %v6566_v60 = vrot.slane %v5676_v24, 4  ;;  %v6569_v7 = vrot.slane %v5676_v24, 3  ;;  %v2368_v11 = vld [vmem:[#allocation5 + $0x438] sm:$0xff] }
 0x33c   : > { %v1913_v17 = vpop.f32.mrf.mxu1  ;;  %v1981_v19 = vsel %vm552_vm0, %v1973_v43, %v1974_v16  ;;  %v1813_v48 = vadd.f32 %v1812_v39, %v1712_v6  ;;  %v6567_v43 = vrot.slane %v5619_v44, 4  ;;  %2931 = vmatpush.msra.mxu1 %v2378_v21  ;;  %v2374_v6 = vld [vmem:[#allocation5 + $0x468] sm:$0xff]  ;;  %v2301_v39 = vld [vmem:[#allocation5 + $0x220] sm:$0xff]  ;;  %v6570_v21 = vrot.slane %v5619_v44, 3  ;;  %2868 = vmatpush.msra.mxu0 %v2354_v50 }
 0x33d   : > { %v2029_v0 = vmax.f32 %v5660_v1, %v1981_v19  ;;  %v5697_v49 = vsel %vm552_vm0, %v6564_v12, %v6563_v9  ;;  %v6568_v12 = vrot.slane %v5619_v44, 2  ;;  %2524 = vmatpush.msrb.mxu2 %v2301_v39  ;;  %v2333_v44 = vld [vmem:[#allocation5 + $0x320] sm:$0xff]  ;;  %v6573_v39 = vld [vmem:[#allocation22_spill] sm:$0xff] }
 0x33e   : > { %6565 = vst [vmem:[#allocation28_spill] sm:$0xff] %v5697_v49  ;;  %v5705_v15 = vsel %vm723_vm3, %v6567_v43, %v6566_v60  ;;  %v1914_v1 = vadd.f32 %v1913_v17, %v1813_v48  ;;  %2495 = vmatmul.f32.gmra.mxu3 %v5697_v49  ;;  %v5723_v17 = vsel %vm666_vm2, %v6570_v21, %v6569_v7  ;;  %v2372_v48 = vld [vmem:[#allocation5 + $0x458] sm:$0xff]  ;;  %v2350_v60 = vld [vmem:[#allocation5 + $0x3a8] sm:$0xff] }
 0x33f   : > { %2672 = vmatmul.f32.gmra.mxu0 %v5705_v15  ;;  %v5715_v9 = vsel %vm609_vm1, %v6568_v12, %v6359_v18  ;;  %2057 = vst [vmem:[#allocation2 + $0xb8] sm:$0xff] %v2029_v0  ;;  %2932 = vmatpush.msra.mxu1 %v2376_v26  ;;  %v1715_v43 = vadd.f32 %v1714_v25, %v1614_v32  ;;  %v1616_v12 = vpop.f32.mrf.mxu2  ;;  %v2370_v49 = vld [vmem:[#allocation5 + $0x448] sm:$0xff]  ;;  %v2348_v26 = vld [vmem:[#allocation5 + $0x398] sm:$0xff]  ;;  %v6571_v32 = vld [vmem:[#allocation79_spill] sm:$0xff] }
 0x340   : > { %v5725_v19 = vmax.f32 %v1409_v36, %v1914_v1  ;;  %2869 = vmatpush.msra.mxu0 %v2352_v45  ;;  %2583 = vmatpush.msrb.mxu3 %v2333_v44  ;;  %v2346_v25 = vld [vmem:[#allocation5 + $0x388] sm:$0xff]  ;;  %v6572_v1 = vld [vmem:[#allocation19_spill] sm:$0xff]  ;;  %v1617_v45 = vadd.f32 %v1616_v12, %v6573_v39  ;;  %v1717_v44 = vpop.f32.mrf.mxu3  ;;  %v2364_v12 = vld [vmem:[#allocation5 + $0x418] sm:$0xff] }
 0x341   : > { %2933 = vmatpush.msra.mxu1 %v2374_v6  ;;  %v1412_v6 = vadd.f32 %v6572_v1, %v6571_v32  ;;  %v2340_v39 = vld [vmem:[#allocation5 + $0x358] sm:$0xff] }
 0x342   : > { %v1975_v18 = vrot.slane %v5725_v19, 1  ;;  %2870 = vmatpush.msra.mxu0 %v2350_v60  ;;  %v2299_v60 = vld [vmem:[#allocation5 + $0x210] sm:$0xff] }
 0x343   : > { %v1815_v7 = vpop.f32.mrf.mxu0  ;;  %2934 = vmatpush.msra.mxu1 %v2372_v48  ;;  %v2366_v48 = vld [vmem:[#allocation5 + $0x428] sm:$0xff]  ;;  %2525 = vmatpush.msrb.mxu2 %v2299_v60  ;;  %v6575_v60 = vrot.slane %v5676_v24, 4 }
 0x344   : > { %v1916_v21 = vpop.f32.mrf.mxu1  ;;  %v1980_v36 = vsel %vm552_vm0, %v1974_v16, %v1975_v18  ;;  %v1816_v0 = vadd.f32 %v1815_v7, %v1715_v43  ;;  %2871 = vmatpush.msra.mxu0 %v2348_v26  ;;  %v2344_v43 = vld [vmem:[#allocation5 + $0x378] sm:$0xff]  ;;  %v2331_v7 = vld [vmem:[#allocation5 + $0x310] sm:$0xff]  ;;  %v1718_v26 = vadd.f32 %v1717_v44, %v1617_v45  ;;  %v6574_v44 = vrot.slane %v5676_v24, 1 }
 0x345   : > { %v2030_v50 = vmax.f32 %v5674_v2, %v1980_v36  ;;  %2935 = vmatpush.msra.mxu1 %v2370_v49  ;;  %v2297_v49 = vld [vmem:[#allocation5 + $0x200] sm:$0xff]  ;;  %2584 = vmatpush.msrb.mxu3 %v2331_v7 }
 0x346   : > { %v1917_v40 = vadd.f32 %v1916_v21, %v1816_v0  ;;  %v2084_v55 = vld [vmem:[#allocation2 + $0xb0] ss:$2 sm:$0xff]  ;;  %2872 = vmatpush.msra.mxu0 %v2346_v25  ;;  %2526 = vmatpush.msrb.mxu2 %v2297_v49  ;;  %v6578_v49 = vld [vmem:[#allocation21_spill] sm:$0xff] }
 0x347   : > { %2058 = vst [vmem:[#allocation2 + $0xc0] sm:$0xff] %v2030_v50  ;;  %v2104_v16 = vadd.f32 %v5671_v54, %v2084_v55  ;;  %2936 = vmatpush.msra.mxu1 %v2368_v11  ;;  %v2342_v21 = vld [vmem:[#allocation5 + $0x368] sm:$0xff] }
 0x348   : > { %v1948_v2 = vmax.f32 %v1412_v6, %v1917_v40  ;;  %2873 = vmatpush.msra.mxu0 %v2344_v43  ;;  %v2362_v6 = vld [vmem:[#allocation5 + $0x408] sm:$0xff] }
 0x349   : > { %v5735_v36 = vmax.f32 %v2104_v16, 0.0  ;;  %2937 = vmatpush.msra.mxu1 %v2366_v48 }
 0x34a   : > { %v1976_v0 = vrot.slane %v1948_v2, 1  ;;  %2874 = vmatpush.msra.mxu0 %v2342_v21 }
 0x34b   : > { %v1818_v50 = vpop.f32.mrf.mxu0  ;;  %2442 = vmatmul.f32.gmra.mxu2 %v5735_v36  ;;  %2737 = vmatmul.f32.gmra.mxu1 %v5735_v36  ;;  %v2132_v55 = vrot.slane %v5735_v36, 1  ;;  %v2216_v40 = vrot.slane %v5735_v36, 4  ;;  %v2160_v11 = vrot.slane %v5735_v36, 2  ;;  %v2188_v25 = vrot.slane %v5735_v36, 3  ;;  %v2324_v36 = vld [vmem:[#allocation5 + $0x2d8] sm:$0xff] }
 0x34c   : > { %v1979_v32 = vsel %vm552_vm0, %v1975_v18, %v1976_v0  ;;  %v1819_v1 = vadd.f32 %v1818_v50, %v1718_v26  ;;  %2938 = vmatpush.msra.mxu1 %v2364_v12  ;;  %v1919_v48 = vpop.f32.mrf.mxu1  ;;  %v6576_v18 = vrot.slane %v5676_v24, 2  ;;  %v2338_v26 = vld [vmem:[#allocation5 + $0x348] sm:$0xff]  ;;  %v6579_v50 = vrot.slane %v5676_v24, 3  ;;  %2875 = vmatpush.msra.mxu0 %v2340_v39 }
 0x34d   : > { %v2031_v45 = vmax.f32 %v5725_v19, %v1979_v32  ;;  %v5750_v16 = vsel %vm552_vm0, %v6574_v44, %v2132_v55  ;;  %v5756_v43 = vsel %vm723_vm3, %v6575_v60, %v2216_v40  ;;  %v6577_v19 = vld [vmem:[#allocation80_spill] sm:$0xff]  ;;  %v2329_v44 = vld [vmem:[#allocation5 + $0x300] sm:$0xff]  ;;  %v6580_v24 = vrot.slane %v5123_v58, 1 }
 0x34e   : > { %v5762_v7 = vsel %vm609_vm1, %v6576_v18, %v2160_v11  ;;  %v1415_v12 = vadd.f32 %v6578_v49, %v6577_v19  ;;  %v1920_v21 = vadd.f32 %v1919_v48, %v1819_v1  ;;  %2498 = vmatmul.f32.gmra.mxu3 %v5750_v16  ;;  %2675 = vmatmul.f32.gmra.mxu0 %v5756_v43  ;;  %v2336_v1 = vld [vmem:[#allocation5 + $0x338] sm:$0xff]  ;;  %v2334_v18 = vld [vmem:[#allocation5 + $0x328] sm:$0xff] }
 0x34f   : > { %v5774_v32 = vsel %vm666_vm2, %v6579_v50, %v2188_v25  ;;  %2059 = vst [vmem:[#allocation2 + $0xc8] sm:$0xff] %v2031_v45  ;;  %2939 = vmatpush.msra.mxu1 %v2362_v6  ;;  %2585 = vmatpush.msrb.mxu3 %v2329_v44  ;;  %v2332_v50 = vld [vmem:[#allocation5 + $0x318] sm:$0xff] }
 0x350   : > { %v1949_v60 = vmax.f32 %v1415_v12, %v1920_v21  ;;  %2876 = vmatpush.msra.mxu0 %v2338_v26  ;;  %v2296_v45 = vld [vmem:[#allocation5 + $0x1f8] sm:$0xff]  ;;  %v2330_v21 = vld [vmem:[#allocation5 + $0x308] sm:$0xff] }
 0x351   : > { %2747 = vmatpush.msra.mxu2 %v2296_v45  ;;  %v2328_v44 = vld [vmem:[#allocation5 + $0x2f8] sm:$0xff] }
 0x352   : > { %v1977_v48 = vrot.slane %v1949_v60, 1  ;;  %2877 = vmatpush.msra.mxu0 %v2336_v1  ;;  %2806 = vmatpush.msra.mxu3 %v2328_v44 }
 0x354   : > { %v1978_v19 = vsel %vm552_vm0, %v1976_v0, %v1977_v48  ;;  %v2005_v49 = vsel %vm552_vm0, %v1977_v48, %v6580_v24  ;;  %2878 = vmatpush.msra.mxu0 %v2334_v18  ;;  %v2326_v18 = vld [vmem:[#allocation5 + $0x2e8] sm:$0xff] }
 0x355   : > { %v2032_v6 = vmax.f32 %v1948_v2, %v1978_v19  ;;  %v2033_v39 = vmax.f32 %v1949_v60, %v2005_v49  ;;  %v2294_v60 = vld [vmem:[#allocation5 + $0x1e8] sm:$0xff]  ;;  %2807 = vmatpush.msra.mxu3 %v2326_v18 }
 0x356   : > { %v2086_v12 = vld [vmem:[#allocation2 + $0xc0] ss:$2 sm:$0xff]  ;;  %2879 = vmatpush.msra.mxu0 %v2332_v50  ;;  %2748 = vmatpush.msra.mxu2 %v2294_v60 }
 0x357   : > { %2060 = vst [vmem:[#allocation2 + $0xd0] sm:$0xff] %v2032_v6  ;;  %v2105_v26 = vadd.f32 %v5671_v54, %v2086_v12  ;;  %v2292_v6 = vld [vmem:[#allocation5 + $0x1d8] sm:$0xff]  ;;  %2808 = vmatpush.msra.mxu3 %v2324_v36  ;;  %v6584_v36 = vrot.slane %v5212_v22, 3 }
 0x358   : > { %2061 = vst [vmem:[#allocation2 + $0xd8] sm:$0xff] %v2033_v39  ;;  %2880 = vmatpush.msra.mxu0 %v2330_v21  ;;  %2749 = vmatpush.msra.mxu2 %v2292_v6  ;;  %v2288_v6 = vld [vmem:[#allocation5 + $0x1b8] sm:$0xff] }
 0x359   : > { %v2119_v0 = vmax.f32 %v2105_v26, 0.0  ;;  %v2290_v26 = vld [vmem:[#allocation5 + $0x1c8] sm:$0xff] }
 0x35a   : > { %2750 = vmatpush.msra.mxu2 %v2290_v26  ;;  %v2286_v26 = vld [vmem:[#allocation5 + $0x1a8] sm:$0xff] }
 0x35b   : > { %2445 = vmatmul.f32.gmra.mxu2 %v2119_v0  ;;  %2740 = vmatmul.f32.gmra.mxu1 %v2119_v0  ;;  %v2133_v58 = vrot.slane %v2119_v0, 1  ;;  %v2217_v1 = vrot.slane %v2119_v0, 4  ;;  %v2161_v48 = vrot.slane %v2119_v0, 2  ;;  %v2189_v2 = vrot.slane %v2119_v0, 3 }
 0x35c   : > { %2751 = vmatpush.msra.mxu2 %v2288_v6  ;;  %v5880_v6 = vpop.f32.mrf.mxu3 }
 0x35d   : > { %v5785_v19 = vsel %vm552_vm0, %v2132_v55, %v2133_v58  ;;  %v5789_v24 = vsel %vm723_vm3, %v2216_v40, %v2217_v1  ;;  %v5793_v49 = vsel %vm609_vm1, %v2160_v11, %v2161_v48  ;;  %v5801_v55 = vsel %vm666_vm2, %v2188_v25, %v2189_v2 }
 0x35e   : > { %2501 = vmatmul.f32.gmra.mxu3 %v5785_v19  ;;  %2678 = vmatmul.f32.gmra.mxu0 %v5789_v24 }
 0x35f   : > { %v2088_v50 = vld [vmem:[#allocation2 + $0xd0] ss:$2 sm:$0xff]  ;;  %2752 = vmatpush.msra.mxu2 %v2286_v26 }
 0x360   : > { %v2106_v40 = vadd.f32 %v5671_v54, %v2088_v50  ;;  %v6583_v50 = vrot.slane %v5179_v37, 4  ;;  %v2276_v26 = vld [vmem:[#allocation5 + $0x158] sm:$0xff] }
 0x362   : > { %v5804_v45 = vmax.f32 %v2106_v40, 0.0 }
 0x364   : > { %2448 = vmatmul.f32.gmra.mxu2 %v5804_v45  ;;  %2743 = vmatmul.f32.gmra.mxu1 %v5804_v45  ;;  %v2134_v11 = vrot.slane %v5804_v45, 1  ;;  %v2218_v39 = vrot.slane %v5804_v45, 4  ;;  %v2162_v12 = vrot.slane %v5804_v45, 2  ;;  %v2190_v25 = vrot.slane %v5804_v45, 3 }
 0x366   : > { %v5814_v54 = vsel %vm552_vm0, %v2133_v58, %v2134_v11  ;;  %v5818_v21 = vsel %vm723_vm3, %v2217_v1, %v2218_v39  ;;  %v5826_v44 = vsel %vm609_vm1, %v2161_v48, %v2162_v12  ;;  %v5832_v0 = vsel %vm666_vm2, %v2189_v2, %v2190_v25  ;;  %v2322_v48 = vld [vmem:[#allocation5 + $0x2c8] sm:$0xff] }
 0x367   : > { %2504 = vmatmul.f32.gmra.mxu3 %v5814_v54  ;;  %2681 = vmatmul.f32.gmra.mxu0 %v5818_v21  ;;  %v2149_v58 = vrot.slane %v5179_v37, 2  ;;  %v6581_v1 = vrot.slane %v5212_v22, 2  ;;  %v6582_v2 = vrot.slane %v5179_v37, 1  ;;  %v5855_v40 = vsel %vm723_vm3, %v2218_v39, %v6583_v50  ;;  %v2284_v22 = vld [vmem:[#allocation5 + $0x198] sm:$0xff] }
 0x368   : > { %2809 = vmatpush.msra.mxu3 %v2322_v48  ;;  %v2316_v48 = vld [vmem:[#allocation5 + $0x298] sm:$0xff]  ;;  %2753 = vmatpush.msra.mxu2 %v2284_v22 }
 0x369   : > { %v5841_v60 = vsel %vm609_vm1, %v2149_v58, %v6581_v1  ;;  %v5849_v18 = vsel %vm552_vm0, %v2134_v11, %v6582_v2  ;;  %v2177_v11 = vrot.slane %v5179_v37, 3  ;;  %v2318_v1 = vld [vmem:[#allocation5 + $0x2a8] sm:$0xff] }
 0x36a   : > { %v2282_v2 = vld [vmem:[#allocation5 + $0x188] sm:$0xff] }
 0x36b   : > { %v2203_v39 = vsel %vm666_vm2, %v2177_v11, %v6584_v36  ;;  %2754 = vmatpush.msra.mxu2 %v2282_v2  ;;  %v5888_v36 = vpop.f32.mrf.mxu3 }
 0x36c   : > { %2527 = vmatmul.f32.vlgmr.msrb.gmra.mxu2 %v5841_v60  ;;  %2940 = vmatmul.f32.vlgmr.msra.gmra.mxu1 %v5349_v4  ;;  %v2320_v4 = vld [vmem:[#allocation5 + $0x2b8] sm:$0xff] }
 0x36d   : > { %2810 = vmatpush.msra.mxu3 %v2320_v4 }
 0x36f   : > { %2507 = vmatmul.f32.gmra.mxu3 %v5849_v18  ;;  %2684 = vmatmul.f32.gmra.mxu0 %v5855_v40 }
 0x370   : > { %2811 = vmatpush.msra.mxu3 %v2318_v1  ;;  %v2308_v1 = vld [vmem:[#allocation5 + $0x258] sm:$0xff] }
 0x372   : > { %2812 = vmatpush.msra.mxu3 %v2316_v48  ;;  %v2274_v48 = vld [vmem:[#allocation5 + $0x148] sm:$0xff] }
 0x374   : > { %2530 = vmatmul.f32.gmra.mxu2 %v5279_v13  ;;  %2943 = vmatmul.f32.gmra.mxu1 %v5378_v51  ;;  %v5870_v51 = vpop.f32.mrf.mxu2 }
 0x377   : > { %2586 = vmatmul.f32.vlgmr.msrb.gmra.mxu3 %v2203_v39  ;;  %2881 = vmatmul.f32.vlgmr.msra.gmra.mxu0 %v2203_v39  ;;  %v2310_v39 = vld [vmem:[#allocation5 + $0x268] sm:$0xff] }
 0x37c   : > { %2533 = vmatmul.f32.gmra.mxu2 %v5325_v63  ;;  %2946 = vmatmul.f32.gmra.mxu1 %v5403_v47  ;;  %v5876_v50 = vpop.f32.mrf.mxu2  ;;  %v2314_v47 = vld [vmem:[#allocation5 + $0x288] sm:$0xff] }
 0x37d   : > { %2813 = vmatpush.msra.mxu3 %v2314_v47  ;;  %v2304_v47 = vld [vmem:[#allocation5 + $0x238] sm:$0xff] }
 0x37f   : > { %2589 = vmatmul.f32.gmra.mxu3 %v5289_v10  ;;  %2884 = vmatmul.f32.gmra.mxu0 %v5289_v10  ;;  %v2280_v10 = vld [vmem:[#allocation5 + $0x178] sm:$0xff] }
 0x380   : > { %2755 = vmatpush.msra.mxu2 %v2280_v10 }
 0x384   : > { %2536 = vmatmul.f32.gmra.mxu2 %v5382_v23  ;;  %2949 = vmatmul.f32.gmra.mxu1 %v5436_v31  ;;  %v5884_v4 = vpop.f32.mrf.mxu2  ;;  %v2312_v31 = vld [vmem:[#allocation5 + $0x278] sm:$0xff] }
 0x385   : > { %2814 = vmatpush.msra.mxu3 %v2312_v31 }
 0x387   : > { %2592 = vmatmul.f32.gmra.mxu3 %v5335_v30  ;;  %2887 = vmatmul.f32.gmra.mxu0 %v5335_v30  ;;  %v2278_v30 = vld [vmem:[#allocation5 + $0x168] sm:$0xff] }
 0x388   : > { %2756 = vmatpush.msra.mxu2 %v2278_v30  ;;  %2815 = vmatpush.msra.mxu3 %v2310_v39  ;;  %v5924_v30 = vpop.f32.mrf.mxu1 }
 0x38a   : > { %2757 = vmatpush.msra.mxu2 %v2276_v26  ;;  %2816 = vmatpush.msra.mxu3 %v2308_v1  ;;  %v2266_v26 = vld [vmem:[#allocation5 + $0x108] sm:$0xff] }
 0x38c   : > { %2539 = vmatmul.f32.gmra.mxu2 %v5442_v57  ;;  %2952 = vmatmul.f32.gmra.mxu1 %v5463_v28  ;;  %v5892_v28 = vpop.f32.mrf.mxu2 }
 0x38d   : > { %2758 = vmatpush.msra.mxu2 %v2274_v48  ;;  %v2298_v48 = vld [vmem:[#allocation5 + $0x208] sm:$0xff] }
 0x38f   : > { %2595 = vmatmul.f32.gmra.mxu3 %v5392_v35  ;;  %2890 = vmatmul.f32.gmra.mxu0 %v5392_v35  ;;  %v5896_v35 = vpop.f32.mrf.mxu3 }
 0x394   : > { %2542 = vmatmul.f32.gmra.mxu2 %v5506_v41  ;;  %2955 = vmatmul.f32.gmra.mxu1 %v5498_v3  ;;  %v5900_v3 = vpop.f32.mrf.mxu2 }
 0x397   : > { %2598 = vmatmul.f32.gmra.mxu3 %v5452_v14  ;;  %2893 = vmatmul.f32.gmra.mxu0 %v5452_v14  ;;  %v5904_v22 = vpop.f32.mrf.mxu3  ;;  %v2306_v14 = vld [vmem:[#allocation5 + $0x248] sm:$0xff] }
 0x398   : > { %2817 = vmatpush.msra.mxu3 %v2306_v14  ;;  %v5940_v14 = vpop.f32.mrf.mxu0 }
 0x39a   : > { %2818 = vmatpush.msra.mxu3 %v2304_v47 }
 0x39c   : > { %2545 = vmatmul.f32.gmra.mxu2 %v5558_v27  ;;  %2958 = vmatmul.f32.gmra.mxu1 %v5552_v53  ;;  %v5908_v2 = vpop.f32.mrf.mxu2  ;;  %v2272_v53 = vld [vmem:[#allocation5 + $0x138] sm:$0xff] }
 0x39d   : > { %2759 = vmatpush.msra.mxu2 %v2272_v53 }
 0x39f   : > { %2601 = vmatmul.f32.gmra.mxu3 %v5518_v38  ;;  %2896 = vmatmul.f32.gmra.mxu0 %v5518_v38  ;;  %v5912_v10 = vpop.f32.mrf.mxu3 }
 0x3a4   : > { %2548 = vmatmul.f32.gmra.mxu2 %v5600_v5  ;;  %2961 = vmatmul.f32.gmra.mxu1 %v5596_v42  ;;  %v5916_v38 = vpop.f32.mrf.mxu2  ;;  %v2270_v42 = vld [vmem:[#allocation5 + $0x128] sm:$0xff] }
 0x3a5   : > { %2760 = vmatpush.msra.mxu2 %v2270_v42  ;;  %v5954_v42 = vpop.f32.mrf.mxu0 }
 0x3a7   : > { %2604 = vmatmul.f32.gmra.mxu3 %v5569_v56  ;;  %2899 = vmatmul.f32.gmra.mxu0 %v5569_v56  ;;  %v5920_v31 = vpop.f32.mrf.mxu3  ;;  %v2302_v56 = vld [vmem:[#allocation5 + $0x228] sm:$0xff] }
 0x3a8   : > { %2819 = vmatpush.msra.mxu3 %v2302_v56 }
 0x3ac   : > { %2551 = vmatmul.f32.gmra.mxu2 %v5647_v29  ;;  %2964 = vmatmul.f32.gmra.mxu1 %v5641_v46  ;;  %v5926_v39 = vpop.f32.mrf.mxu2  ;;  %v2268_v46 = vld [vmem:[#allocation5 + $0x118] sm:$0xff] }
 0x3ad   : > { %2761 = vmatpush.msra.mxu2 %v2268_v46 }
 0x3af   : > { %2607 = vmatmul.f32.gmra.mxu3 %v5611_v20  ;;  %2902 = vmatmul.f32.gmra.mxu0 %v5611_v20  ;;  %v2300_v20 = vld [vmem:[#allocation5 + $0x218] sm:$0xff]  ;;  %v5930_v1 = vpop.f32.mrf.mxu3 }
 0x3b0   : > { %6585 = vst [vmem:[#allocation27_spill] sm:$0xff] %v5930_v1  ;;  %2820 = vmatpush.msra.mxu3 %v2300_v20  ;;  %2762 = vmatpush.msra.mxu2 %v2266_v26 }
 0x3b2   : > { %2821 = vmatpush.msra.mxu3 %v2298_v48 }
 0x3b4   : > { %2554 = vmatmul.f32.gmra.mxu2 %v5715_v9  ;;  %2967 = vmatmul.f32.gmra.mxu1 %v5705_v15  ;;  %v5934_v15 = vpop.f32.mrf.mxu2 }
 0x3b7   : > { %2610 = vmatmul.f32.gmra.mxu3 %v5658_v59  ;;  %2905 = vmatmul.f32.gmra.mxu0 %v5658_v59  ;;  %v5938_v59 = vpop.f32.mrf.mxu1  ;;  %v5942_v53 = vpop.f32.mrf.mxu3 }
 0x3bc   : > { %2557 = vmatmul.f32.gmra.mxu2 %v5762_v7  ;;  %2970 = vmatmul.f32.gmra.mxu1 %v5756_v43  ;;  %v5946_v47 = vpop.f32.mrf.mxu2 }
 0x3bf   : > { %2613 = vmatmul.f32.gmra.mxu3 %v5723_v17  ;;  %2908 = vmatmul.f32.gmra.mxu0 %v5723_v17  ;;  %v5950_v43 = vpop.f32.mrf.mxu3  ;;  %v5952_v17 = vpop.f32.mrf.mxu1 }
 0x3c4   : > { %2560 = vmatmul.f32.gmra.mxu2 %v5793_v49  ;;  %2973 = vmatmul.f32.gmra.mxu1 %v5789_v24  ;;  %v5958_v56 = vpop.f32.mrf.mxu2 }
 0x3c7   : > { %2616 = vmatmul.f32.gmra.mxu3 %v5774_v32  ;;  %2911 = vmatmul.f32.gmra.mxu0 %v5774_v32  ;;  %v5962_v24 = vpop.f32.mrf.mxu3  ;;  %v5970_v32 = vsel %vm609_vm1, %v2162_v12, %v2149_v58  ;;  %v5972_v46 = vpop.f32.mrf.mxu1  ;;  %v2204_v12 = vsel %vm666_vm2, %v2190_v25, %v2177_v11  ;;  %v2470_v11 = vadd.f32 %v5880_v6, %v5870_v51 }
 0x3cc   : > { %2563 = vmatmul.f32.gmra.mxu2 %v5826_v44  ;;  %2976 = vmatmul.f32.gmra.mxu1 %v5818_v21  ;;  %v5976_v21 = vpop.f32.mrf.mxu0 }
 0x3ce   : > { %v2443_v20 = vpop.f32.mrf.mxu2 }
 0x3cf   : > { %2619 = vmatmul.f32.gmra.mxu3 %v5801_v55  ;;  %2914 = vmatmul.f32.gmra.mxu0 %v5801_v55 }
 0x3d1   : > { %v5980_v55 = vpop.f32.mrf.mxu3 }
 0x3d4   : > { %2566 = vmatmul.f32.gmra.mxu2 %v5970_v32  ;;  %2979 = vmatmul.f32.gmra.mxu1 %v5855_v40  ;;  %v5989_v58 = vpop.f32.mrf.mxu0 }
 0x3d7   : > { %2622 = vmatmul.f32.gmra.mxu3 %v5832_v0  ;;  %2917 = vmatmul.f32.gmra.mxu0 %v5832_v0 }
 0x3dc   : > { %2763 = vmatmul.f32.vlgmr.msra.gmra.mxu2 %v5230_v61 }
 0x3de   : > { %v2446_v26 = vpop.f32.mrf.mxu2 }
 0x3df   : > { %2625 = vmatmul.f32.gmra.mxu3 %v2204_v12  ;;  %2920 = vmatmul.f32.gmra.mxu0 %v2204_v12 }
 0x3e1   : > { %v2502_v40 = vpop.f32.mrf.mxu3 }
 0x3e2   : > { %v5991_v48 = vadd.f32 %v2502_v40, %v2443_v20 }
 0x3e4   : > { %2766 = vmatmul.f32.gmra.mxu2 %v5273_v34 }
 0x3e7   : > { %v2449_v0 = vpop.f32.mrf.mxu2  ;;  %2822 = vmatmul.f32.vlgmr.msra.gmra.mxu3 %v5841_v60  ;;  %v6005_v60 = vpop.f32.mrf.mxu0 }
 0x3ea   : > { %v2505_v61 = vpop.f32.mrf.mxu3 }
 0x3eb   : > { %v5995_v1 = vadd.f32 %v2505_v61, %v2446_v26  ;;  %v6007_v26 = vpop.f32.mrf.mxu1  ;;  %v6586_v61 = vld [vmem:[#allocation23_spill] sm:$0xff] }
 0x3ec   : > { %2769 = vmatmul.f32.gmra.mxu2 %v5321_v8 }
 0x3ef   : > { %v2528_v37 = vpop.f32.mrf.mxu2  ;;  %2825 = vmatmul.f32.gmra.mxu3 %v5279_v13  ;;  %v2473_v13 = vadd.f32 %v5888_v36, %v5876_v50 }
 0x3f0   : > { %v2529_v20 = vadd.f32 %v2528_v37, %v2470_v11  ;;  %v2476_v37 = vadd.f32 %v5896_v35, %v5884_v4  ;;  %v6587_v11 = vld [vmem:[#allocation24_spill] sm:$0xff] }
 0x3f2   : > { %v2508_v45 = vpop.f32.mrf.mxu3 }
 0x3f3   : > { %v5999_v25 = vadd.f32 %v2508_v45, %v2449_v0  ;;  %v6019_v0 = vpop.f32.mrf.mxu1 }
 0x3f4   : > { %2772 = vmatmul.f32.gmra.mxu2 %v5374_v62 }
 0x3f7   : > { %v2531_v34 = vpop.f32.mrf.mxu2  ;;  %2828 = vmatmul.f32.gmra.mxu3 %v5325_v63  ;;  %v6017_v63 = vpop.f32.mrf.mxu0 }
 0x3f8   : > { %v2532_v51 = vadd.f32 %v2531_v34, %v2473_v13 }
 0x3fa   : > { %v2587_v8 = vpop.f32.mrf.mxu3 }
 0x3fb   : > { %v6009_v12 = vadd.f32 %v2587_v8, %v2529_v20  ;;  %v6030_v34 = vpop.f32.mrf.mxu1  ;;  %v2479_v20 = vadd.f32 %v5904_v22, %v5892_v28  ;;  %v6589_v22 = vld [vmem:[#allocation26_spill] sm:$0xff] }
 0x3fc   : > { %2775 = vmatmul.f32.gmra.mxu2 %v5432_v33 }
 0x3ff   : > { %v2534_v62 = vpop.f32.mrf.mxu2  ;;  %2831 = vmatmul.f32.gmra.mxu3 %v5382_v23  ;;  %v6027_v23 = vpop.f32.mrf.mxu0 }
 0x400   : > { %v2535_v50 = vadd.f32 %v2534_v62, %v2476_v37  ;;  %v6588_v62 = vld [vmem:[#allocation25_spill] sm:$0xff] }
 0x402   : > { %v2590_v6 = vpop.f32.mrf.mxu3 }
 0x403   : > { %v6015_v40 = vadd.f32 %v2590_v6, %v2532_v51  ;;  %v6045_v6 = vpop.f32.mrf.mxu1 }
 0x404   : > { %2778 = vmatmul.f32.gmra.mxu2 %v6586_v61 }
 0x407   : > { %v2537_v33 = vpop.f32.mrf.mxu2  ;;  %2834 = vmatmul.f32.gmra.mxu3 %v5442_v57  ;;  %v6039_v13 = vpop.f32.mrf.mxu0 }
 0x408   : > { %v2538_v4 = vadd.f32 %v2537_v33, %v2479_v20 }
 0x40a   : > { %v2593_v36 = vpop.f32.mrf.mxu3 }
 0x40b   : > { %v6025_v45 = vadd.f32 %v2593_v36, %v2535_v50  ;;  %v6055_v37 = vpop.f32.mrf.mxu1  ;;  %v6591_v36 = vld [vmem:[#allocation28_spill] sm:$0xff] }
 0x40c   : > { %2781 = vmatmul.f32.gmra.mxu2 %v6587_v11 }
 0x40f   : > { %v6034_v8 = vpop.f32.mrf.mxu2  ;;  %2837 = vmatmul.f32.gmra.mxu3 %v5506_v41  ;;  %v6049_v28 = vpop.f32.mrf.mxu0 }
 0x412   : > { %v2596_v35 = vpop.f32.mrf.mxu3 }
 0x413   : > { %v6037_v57 = vadd.f32 %v2596_v35, %v2538_v4  ;;  %v6063_v11 = vpop.f32.mrf.mxu1 }
 0x414   : > { %2784 = vmatmul.f32.gmra.mxu2 %v6588_v62  ;;  %6592 = vst [vmem:[#allocation29_spill] sm:$0xff] %v6063_v11 }
 0x417   : > { %v6042_v51 = vpop.f32.mrf.mxu2  ;;  %2840 = vmatmul.f32.gmra.mxu3 %v5558_v27  ;;  %v6059_v50 = vpop.f32.mrf.mxu0 }
 0x418   : > { %6590 = vst [vmem:[#allocation30_spill] sm:$0xff] %v6059_v50 }
 0x41a   : > { %v6047_v61 = vpop.f32.mrf.mxu3 }
 0x41b   : > { %v6073_v62 = vpop.f32.mrf.mxu1 }
 0x41c   : > { %2787 = vmatmul.f32.gmra.mxu2 %v6589_v22 }
 0x41f   : > { %v6052_v41 = vpop.f32.mrf.mxu2  ;;  %2843 = vmatmul.f32.gmra.mxu3 %v5600_v5  ;;  %v6067_v4 = vpop.f32.mrf.mxu0  ;;  %v2491_v5 = vadd.f32 %v5942_v53, %v5926_v39 }
 0x420   : > { %6593 = vst [vmem:[#allocation33_spill] sm:$0xff] %v6067_v4  ;;  %v2494_v4 = vadd.f32 %v5950_v43, %v5934_v15 }
 0x422   : > { %v6057_v33 = vpop.f32.mrf.mxu3 }
 0x423   : > { %v6083_v39 = vpop.f32.mrf.mxu1 }
 0x424   : > { %2790 = vmatmul.f32.gmra.mxu2 %v6591_v36 }
 0x427   : > { %v2549_v27 = vpop.f32.mrf.mxu2  ;;  %2846 = vmatmul.f32.gmra.mxu3 %v5647_v29  ;;  %v6077_v29 = vpop.f32.mrf.mxu0 }
 0x428   : > { %v2550_v22 = vadd.f32 %v2549_v27, %v2491_v5  ;;  %6594 = vst [vmem:[#allocation31_spill] sm:$0xff] %v6077_v29  ;;  %v2500_v27 = vadd.f32 %v5980_v55, %v5958_v56 }
 0x42a   : > { %v6065_v20 = vpop.f32.mrf.mxu3 }
 0x42c   : > { %2793 = vmatmul.f32.gmra.mxu2 %v5750_v16 }
 0x42f   : > { %v2552_v35 = vpop.f32.mrf.mxu2  ;;  %2849 = vmatmul.f32.gmra.mxu3 %v5715_v9  ;;  %v6090_v5 = vpop.f32.mrf.mxu0 }
 0x430   : > { %v2553_v53 = vadd.f32 %v2552_v35, %v2494_v4  ;;  %6595 = vst [vmem:[#allocation37_spill] sm:$0xff] %v6090_v5  ;;  %v3094_v5 = vld [vmem:[#allocation7 + $0xf0] sm:$0xff] }
 0x432   : > { %v2608_v36 = vpop.f32.mrf.mxu3 }
 0x433   : > { %v6075_v50 = vadd.f32 %v2608_v36, %v2550_v22 }
 0x434   : > { %2796 = vmatmul.f32.gmra.mxu2 %v5785_v19  ;;  %v2497_v19 = vadd.f32 %v5962_v24, %v5946_v47 }
 0x437   : > { %v2555_v16 = vpop.f32.mrf.mxu2  ;;  %2852 = vmatmul.f32.gmra.mxu3 %v5762_v7  ;;  %v6095_v7 = vpop.f32.mrf.mxu1 }
 0x438   : > { %6596 = vst [vmem:[#allocation34_spill] sm:$0xff] %v6095_v7  ;;  %v2556_v4 = vadd.f32 %v2555_v16, %v2497_v19  ;;  %v6101_v56 = vpop.f32.mrf.mxu0 }
 0x439   : > { %6597 = vst [vmem:[#allocation41_spill] sm:$0xff] %v6101_v56 }
 0x43a   : > { %v2611_v9 = vpop.f32.mrf.mxu3 }
 0x43b   : > { %v6085_v11 = vadd.f32 %v2611_v9, %v2553_v53 }
 0x43c   : > { %2799 = vmatmul.f32.gmra.mxu2 %v5814_v54 }
 0x43f   : > { %v2558_v15 = vpop.f32.mrf.mxu2  ;;  %2855 = vmatmul.f32.gmra.mxu3 %v5793_v49  ;;  %v6104_v47 = vpop.f32.mrf.mxu1 }
 0x440   : > { %v2559_v43 = vadd.f32 %v2558_v15, %v2500_v27  ;;  %6598 = vst [vmem:[#allocation38_spill] sm:$0xff] %v6104_v47  ;;  %v2882_v53 = vpop.f32.mrf.mxu0  ;;  %v3075_v47 = vld [vmem:[#allocation7 + $0x78] sm:$0xff] }
 0x441   : > { %3116 = vmatpush.msrb.mxu3 %v3075_v47  ;;  %v2650_v47 = vadd.f32 %v5954_v42, %v6015_v40 }
 0x442   : > { %v2614_v35 = vpop.f32.mrf.mxu3 }
 0x443   : > { %v6097_v22 = vadd.f32 %v2614_v35, %v2556_v4 }
 0x444   : > { %2802 = vmatmul.f32.gmra.mxu2 %v5849_v18 }
 0x447   : > { %v2561_v54 = vpop.f32.mrf.mxu2  ;;  %2858 = vmatmul.f32.gmra.mxu3 %v5826_v44  ;;  %v2941_v27 = vpop.f32.mrf.mxu1 }
 0x448   : > { %v2562_v55 = vadd.f32 %v2561_v54, %v5991_v48  ;;  %v2885_v4 = vpop.f32.mrf.mxu0 }
 0x44a   : > { %v2617_v24 = vpop.f32.mrf.mxu3 }
 0x44b   : > { %v6106_v49 = vadd.f32 %v2617_v24, %v2559_v43 }
 0x44f   : > { %v2564_v36 = vpop.f32.mrf.mxu2  ;;  %2861 = vmatmul.f32.gmra.mxu3 %v5970_v32  ;;  %v2944_v35 = vpop.f32.mrf.mxu1 }
 0x450   : > { %v2565_v16 = vadd.f32 %v2564_v36, %v5995_v1  ;;  %v2888_v32 = vpop.f32.mrf.mxu0  ;;  %v3095_v36 = vld [vmem:[#allocation7 + $0xf8] sm:$0xff] }
 0x451   : > { %3096 = vmatpush.msrb.mxu2 %v3095_v36 }
 0x452   : > { %v2620_v9 = vpop.f32.mrf.mxu3 }
 0x453   : > { %v6110_v18 = vadd.f32 %v2620_v9, %v2562_v55  ;;  %3097 = vmatpush.msrb.mxu2 %v3094_v5 }
 0x457   : > { %v2567_v44 = vpop.f32.mrf.mxu2  ;;  %v2947_v1 = vpop.f32.mrf.mxu1 }
 0x458   : > { %v2568_v19 = vadd.f32 %v2567_v44, %v5999_v25 }
 0x45a   : > { %v2623_v15 = vpop.f32.mrf.mxu3 }
 0x45b   : > { %v6113_v48 = vadd.f32 %v2623_v15, %v2565_v16  ;;  %v2891_v15 = vpop.f32.mrf.mxu0 }
 0x45d   : > { %6599 = vst [vmem:[#allocation46_spill] sm:$0xff] %v6113_v48  ;;  %v3074_v48 = vld [vmem:[#allocation7 + $0x70] sm:$0xff] }
 0x45e   : > { %3117 = vmatpush.msrb.mxu3 %v3074_v48 }
 0x45f   : > { %v2764_v43 = vpop.f32.mrf.mxu2 }
 0x460   : > { %v2765_v55 = vadd.f32 %v2764_v43, %v5924_v30  ;;  %v2647_v30 = vadd.f32 %v5940_v14, %v6009_v12 }
 0x462   : > { %v2626_v54 = vpop.f32.mrf.mxu3 }
 0x463   : > { %v6115_v24 = vadd.f32 %v2626_v54, %v2568_v19  ;;  %v2950_v19 = vpop.f32.mrf.mxu1 }
 0x465   : > { %6600 = vst [vmem:[#allocation42_spill] sm:$0xff] %v6115_v24 }
 0x467   : > { %v2767_v56 = vpop.f32.mrf.mxu2 }
 0x468   : > { %v2768_v7 = vadd.f32 %v2767_v56, %v5938_v59  ;;  %v3092_v59 = vld [vmem:[#allocation7 + $0xe0] sm:$0xff] }
 0x46a   : > { %v2823_v9 = vpop.f32.mrf.mxu3 }
 0x46b   : > { %v2824_v25 = vadd.f32 %v2823_v9, %v2765_v55  ;;  %v3093_v9 = vld [vmem:[#allocation7 + $0xe8] sm:$0xff]  ;;  %v2953_v42 = vpop.f32.mrf.mxu1 }
 0x46c   : > { %3098 = vmatpush.msrb.mxu2 %v3093_v9 }
 0x46d   : > { %v2883_v44 = vadd.f32 %v2882_v53, %v2824_v25  ;;  %v3073_v25 = vld [vmem:[#allocation7 + $0x68] sm:$0xff] }
 0x46e   : > { %3118 = vmatpush.msrb.mxu3 %v3073_v25  ;;  %3099 = vmatpush.msrb.mxu2 %v3092_v59 }
 0x46f   : > { %v2770_v16 = vpop.f32.mrf.mxu2  ;;  %v2942_v24 = vadd.f32 %v2941_v27, %v2883_v44  ;;  %v3072_v44 = vld [vmem:[#allocation7 + $0x60] sm:$0xff] }
 0x470   : > { %v2771_v5 = vadd.f32 %v2770_v16, %v5952_v17  ;;  %v2653_v17 = vadd.f32 %v5976_v21, %v6025_v45  ;;  %v3091_v16 = vld [vmem:[#allocation7 + $0xd8] sm:$0xff]  ;;  %3119 = vmatpush.msrb.mxu3 %v3072_v44  ;;  %v2482_v45 = vadd.f32 %v5912_v10, %v5900_v3  ;;  %v3089_v44 = vld [vmem:[#allocation7 + $0xc8] sm:$0xff] }
 0x471   : > { %v6123_v53 = vmax.f32 %v2647_v30, %v2942_v24  ;;  %3100 = vmatpush.msrb.mxu2 %v3091_v16 }
 0x472   : > { %v2826_v54 = vpop.f32.mrf.mxu3 }
 0x473   : > { %v2827_v29 = vadd.f32 %v2826_v54, %v2768_v7  ;;  %v2894_v7 = vpop.f32.mrf.mxu0  ;;  %v2997_v14 = vrot.slane %v6123_v53, 1  ;;  %v2956_v59 = vpop.f32.mrf.mxu1 }
 0x475   : > { %v2886_v43 = vadd.f32 %v2885_v4, %v2827_v29 }
 0x477   : > { %v2945_v36 = vadd.f32 %v2944_v35, %v2886_v43  ;;  %v2773_v55 = vpop.f32.mrf.mxu2 }
 0x478   : > { %v2774_v54 = vadd.f32 %v2773_v55, %v5972_v46 }
 0x479   : > { %v2984_v56 = vmax.f32 %v2650_v47, %v2945_v36 }
 0x47a   : > { %v2829_v27 = vpop.f32.mrf.mxu3 }
 0x47b   : > { %v2998_v12 = vrot.slane %v2984_v56, 1  ;;  %v2830_v29 = vadd.f32 %v2829_v27, %v2771_v5  ;;  %v2897_v9 = vpop.f32.mrf.mxu0  ;;  %v3071_v5 = vld [vmem:[#allocation7 + $0x58] sm:$0xff]  ;;  %v3090_v27 = vld [vmem:[#allocation7 + $0xd0] sm:$0xff] }
 0x47c   : > { %3120 = vmatpush.msrb.mxu3 %v3071_v5  ;;  %3101 = vmatpush.msrb.mxu2 %v3090_v27 }
 0x47d   : > { %v3023_v40 = vsel %vm552_vm0, %v2997_v14, %v2998_v12  ;;  %v2889_v48 = vadd.f32 %v2888_v32, %v2830_v29  ;;  %v3070_v29 = vld [vmem:[#allocation7 + $0x50] sm:$0xff] }
 0x47e   : > { %v3025_v4 = vmax.f32 %v6123_v53, %v3023_v40  ;;  %v2541_v40 = vadd.f32 %v6034_v8, %v2482_v45  ;;  %3121 = vmatpush.msrb.mxu3 %v3070_v29  ;;  %v2485_v8 = vadd.f32 %v5920_v31, %v5908_v2  ;;  %3102 = vmatpush.msrb.mxu2 %v3089_v44  ;;  %v3088_v45 = vld [vmem:[#allocation7 + $0xc0] sm:$0xff] }
 0x47f   : > { %v2948_v35 = vadd.f32 %v2947_v1, %v2889_v48  ;;  %v2776_v24 = vpop.f32.mrf.mxu2  ;;  %v2656_v1 = vadd.f32 %v5989_v58, %v6037_v57  ;;  %v3239_v53 = vld [vmem:[%s6293_s8 + $0x78] sm:$0xff] }
 0x480   : > { %3039 = vst [vmem:[#allocation3] sm:$0xff] %v3025_v4  ;;  %v2777_v48 = vadd.f32 %v2776_v24, %v6007_v26  ;;  %v2959_v24 = vpop.f32.mrf.mxu1  ;;  %v2544_v16 = vadd.f32 %v6042_v51, %v2485_v8  ;;  %3103 = vmatpush.msrb.mxu2 %v3088_v45 }
 0x481   : > { %v2985_v30 = vmax.f32 %v2653_v17, %v2948_v35 }
 0x482   : > { %v2832_v43 = vpop.f32.mrf.mxu3 }
 0x483   : > { %v2999_v47 = vrot.slane %v2985_v30, 1  ;;  %v2833_v36 = vadd.f32 %v2832_v43, %v2774_v54 }
 0x485   : > { %v3022_v32 = vsel %vm552_vm0, %v2998_v12, %v2999_v47  ;;  %v2892_v25 = vadd.f32 %v2891_v15, %v2833_v36  ;;  %v6601_v36 = vld [vmem:[#allocation27_spill] sm:$0xff] }
 0x486   : > { %v3026_v21 = vmax.f32 %v2984_v56, %v3022_v32  ;;  %v2600_v56 = vadd.f32 %v6047_v61, %v2541_v40  ;;  %v3069_v61 = vld [vmem:[#allocation7 + $0x48] sm:$0xff]  ;;  %v2488_v32 = vadd.f32 %v6601_v36, %v5916_v38 }
 0x487   : > { %v2951_v46 = vadd.f32 %v2950_v19, %v2892_v25  ;;  %v2779_v55 = vpop.f32.mrf.mxu2  ;;  %v2900_v19 = vpop.f32.mrf.mxu0  ;;  %3122 = vmatpush.msrb.mxu3 %v3069_v61 }
 0x488   : > { %3040 = vst [vmem:[#allocation3 + $0x8] sm:$0xff] %v3026_v21  ;;  %v2659_v26 = vadd.f32 %v6005_v60, %v2600_v56  ;;  %v2780_v54 = vadd.f32 %v2779_v55, %v6019_v0 }
 0x489   : > { %v2986_v12 = vmax.f32 %v2656_v1, %v2951_v46  ;;  %v3068_v1 = vld [vmem:[#allocation7 + $0x40] sm:$0xff] }
 0x48a   : > { %v2835_v15 = vpop.f32.mrf.mxu3  ;;  %3123 = vmatpush.msrb.mxu3 %v3068_v1  ;;  %v3082_v1 = vld [vmem:[#allocation7 + $0x90] sm:$0xff] }
 0x48b   : > { %v3000_v3 = vrot.slane %v2986_v12, 1  ;;  %v2836_v10 = vadd.f32 %v2835_v15, %v2777_v48  ;;  %v3067_v15 = vld [vmem:[#allocation7 + $0x38] sm:$0xff] }
 0x48c   : > { %3124 = vmatpush.msrb.mxu3 %v3067_v15 }
 0x48d   : > { %v3021_v58 = vsel %vm552_vm0, %v2999_v47, %v3000_v3  ;;  %v2895_v57 = vadd.f32 %v2894_v7, %v2836_v10 }
 0x48e   : > { %v3027_v4 = vmax.f32 %v2985_v30, %v3021_v58  ;;  %v2603_v30 = vadd.f32 %v6057_v33, %v2544_v16  ;;  %v2547_v33 = vadd.f32 %v6052_v41, %v2488_v32  ;;  %v3083_v32 = vld [vmem:[#allocation7 + $0x98] sm:$0xff] }
 0x48f   : > { %v2954_v17 = vadd.f32 %v2953_v42, %v2895_v57  ;;  %v2782_v35 = vpop.f32.mrf.mxu2  ;;  %v2903_v21 = vpop.f32.mrf.mxu0 }
 0x490   : > { %3041 = vst [vmem:[#allocation3 + $0x10] sm:$0xff] %v3027_v4  ;;  %v2662_v51 = vadd.f32 %v6017_v63, %v2603_v30  ;;  %v2783_v46 = vadd.f32 %v2782_v35, %v6030_v34  ;;  %v2606_v27 = vadd.f32 %v6065_v20, %v2547_v33  ;;  %v3087_v34 = vld [vmem:[#allocation7 + $0xb8] sm:$0xff]  ;;  %v3065_v30 = vld [vmem:[#allocation7 + $0x28] sm:$0xff]  ;;  %v3062_v33 = vld [vmem:[#allocation7 + $0x10] sm:$0xff] }
 0x491   : > { %v2987_v43 = vmax.f32 %v2659_v26, %v2954_v17  ;;  %3104 = vmatpush.msrb.mxu2 %v3087_v34  ;;  %v2668_v26 = vadd.f32 %v6039_v13, %v6075_v50 }
 0x492   : > { %v2838_v7 = vpop.f32.mrf.mxu3  ;;  %v2665_v48 = vadd.f32 %v6027_v23, %v2606_v27  ;;  %v3061_v27 = vld [vmem:[#allocation7 + $0x8] sm:$0xff] }
 0x493   : > { %v3001_v47 = vrot.slane %v2987_v43, 1  ;;  %v2839_v2 = vadd.f32 %v2838_v7, %v2780_v54  ;;  %v3085_v7 = vld [vmem:[#allocation7 + $0xa8] sm:$0xff] }
 0x495   : > { %v3020_v31 = vsel %vm552_vm0, %v3000_v3, %v3001_v47  ;;  %v2898_v60 = vadd.f32 %v2897_v9, %v2839_v2  ;;  %v2962_v9 = vpop.f32.mrf.mxu1  ;;  %v3084_v2 = vld [vmem:[#allocation7 + $0xa0] sm:$0xff] }
 0x496   : > { %v3028_v42 = vmax.f32 %v2986_v12, %v3020_v31  ;;  %v3064_v31 = vld [vmem:[#allocation7 + $0x20] sm:$0xff] }
 0x497   : > { %v2957_v25 = vadd.f32 %v2956_v59, %v2898_v60  ;;  %v2785_v0 = vpop.f32.mrf.mxu2  ;;  %v2906_v20 = vpop.f32.mrf.mxu0 }
 0x498   : > { %3042 = vst [vmem:[#allocation3 + $0x18] sm:$0xff] %v3028_v42  ;;  %v2786_v56 = vadd.f32 %v2785_v0, %v6045_v6  ;;  %v3086_v6 = vld [vmem:[#allocation7 + $0xb0] sm:$0xff] }
 0x499   : > { %v2988_v55 = vmax.f32 %v2662_v51, %v2957_v25  ;;  %3105 = vmatpush.msrb.mxu2 %v3086_v6  ;;  %v3063_v51 = vld [vmem:[#allocation7 + $0x18] sm:$0xff]  ;;  %v6602_v0 = vld [vmem:[#allocation29_spill] sm:$0xff] }
 0x49a   : > { %v2841_v5 = vpop.f32.mrf.mxu3  ;;  %v3151_v6 = vld [vmem:[#allocation7 + $0x158] sm:$0xff] }
 0x49b   : > { %v3002_v38 = vrot.slane %v2988_v55, 1  ;;  %v2842_v29 = vadd.f32 %v2841_v5, %v2783_v46  ;;  %3106 = vmatpush.msrb.mxu2 %v3085_v7  ;;  %v3081_v5 = vld [vmem:[#allocation7 + $0x88] sm:$0xff]  ;;  %v3191_v7 = vld [vmem:[#allocation7 + $0x1d0] sm:$0xff] }
 0x49d   : > { %v3019_v63 = vsel %vm552_vm0, %v3001_v47, %v3002_v38  ;;  %v2901_v59 = vadd.f32 %v2900_v19, %v2842_v29  ;;  %v2965_v4 = vpop.f32.mrf.mxu1  ;;  %3107 = vmatpush.msrb.mxu2 %v3084_v2  ;;  %v3060_v29 = vld [vmem:[#allocation7] sm:$0xff] }
 0x49e   : > { %v3029_v40 = vmax.f32 %v2987_v43, %v3019_v63 }
 0x49f   : > { %v2960_v12 = vadd.f32 %v2959_v24, %v2901_v59  ;;  %v2788_v41 = vpop.f32.mrf.mxu2  ;;  %v3066_v24 = vld [vmem:[#allocation7 + $0x30] sm:$0xff]  ;;  %v2909_v47 = vpop.f32.mrf.mxu0  ;;  %3108 = vmatpush.msrb.mxu2 %v3083_v32  ;;  %v3147_v32 = vld [vmem:[#allocation7 + $0x138] sm:$0xff] }
 0x4a0   : > { %3043 = vst [vmem:[#allocation3 + $0x20] sm:$0xff] %v3029_v40  ;;  %v2789_v44 = vadd.f32 %v2788_v41, %v6055_v37  ;;  %3125 = vmatpush.msrb.mxu3 %v3066_v24  ;;  %v2671_v37 = vadd.f32 %v6049_v28, %v6085_v11  ;;  %v3155_v40 = vld [vmem:[#allocation7 + $0x178] sm:$0xff] }
 0x4a1   : > { %v2989_v3 = vmax.f32 %v2665_v48, %v2960_v12  ;;  %3109 = vmatpush.msrb.mxu2 %v3082_v1  ;;  %v3196_v48 = vld [vmem:[#allocation7 + $0x1f8] sm:$0xff]  ;;  %v6605_v1 = vld [vmem:[#allocation31_spill] sm:$0xff] }
 0x4a2   : > { %v2844_v10 = vpop.f32.mrf.mxu3  ;;  %3126 = vmatpush.msrb.mxu3 %v3065_v30  ;;  %v6603_v12 = vld [vmem:[#allocation30_spill] sm:$0xff] }
 0x4a3   : > { %v3003_v58 = vrot.slane %v2989_v3, 1  ;;  %v2845_v57 = vadd.f32 %v2844_v10, %v2786_v56  ;;  %3110 = vmatpush.msrb.mxu2 %v3081_v5  ;;  %v2674_v41 = vadd.f32 %v6603_v12, %v6097_v22  ;;  %v3154_v56 = vld [vmem:[#allocation7 + $0x170] sm:$0xff]  ;;  %v3152_v22 = vld [vmem:[#allocation7 + $0x160] sm:$0xff]  ;;  %v3192_v24 = vld [vmem:[#allocation7 + $0x1d8] sm:$0xff] }
 0x4a4   : > { %3127 = vmatpush.msrb.mxu3 %v3064_v31  ;;  %v6606_v5 = vld [vmem:[#allocation34_spill] sm:$0xff] }
 0x4a5   : > { %v3018_v19 = vsel %vm552_vm0, %v3002_v38, %v3003_v58  ;;  %v2904_v8 = vadd.f32 %v2903_v21, %v2845_v57  ;;  %v2968_v60 = vpop.f32.mrf.mxu1  ;;  %v3080_v38 = vld [vmem:[#allocation7 + $0x80] sm:$0xff]  ;;  %v3184_v12 = vld [vmem:[#allocation7 + $0x198] sm:$0xff] }
 0x4a6   : > { %v3030_v23 = vmax.f32 %v2988_v55, %v3018_v19  ;;  %3128 = vmatpush.msrb.mxu3 %v3063_v51  ;;  %3111 = vmatpush.msrb.mxu2 %v3080_v38  ;;  %v3194_v19 = vld [vmem:[#allocation7 + $0x1e8] sm:$0xff]  ;;  %v3188_v51 = vld [vmem:[#allocation7 + $0x1b8] sm:$0xff] }
 0x4a7   : > { %v2963_v17 = vadd.f32 %v2962_v9, %v2904_v8  ;;  %v2791_v35 = vpop.f32.mrf.mxu2  ;;  %v2912_v63 = vpop.f32.mrf.mxu0 }
 0x4a8   : > { %3044 = vst [vmem:[#allocation3 + $0x28] sm:$0xff] %v3030_v23  ;;  %v2792_v21 = vadd.f32 %v2791_v35, %v6602_v0  ;;  %3129 = vmatpush.msrb.mxu3 %v3062_v33  ;;  %3156 = vmatpush.msra.mxu2 %v3155_v40  ;;  %v2680_v33 = vadd.f32 %v6605_v1, %v6110_v18 }
 0x4a9   : > { %v2990_v61 = vmax.f32 %v2668_v26, %v2963_v17  ;;  %v3193_v26 = vld [vmem:[#allocation7 + $0x1e0] sm:$0xff] }
 0x4aa   : > { %v2847_v16 = vpop.f32.mrf.mxu3  ;;  %3130 = vmatpush.msrb.mxu3 %v3061_v27  ;;  %3157 = vmatpush.msra.mxu2 %v3154_v56 }
 0x4ab   : > { %v3004_v54 = vrot.slane %v2990_v61, 1  ;;  %v2848_v43 = vadd.f32 %v2847_v16, %v2789_v44  ;;  %v6604_v44 = vld [vmem:[#allocation33_spill] sm:$0xff] }
 0x4ac   : > { %3131 = vmatpush.msrb.mxu3 %v3060_v29  ;;  %v3144_v29 = vld [vmem:[#allocation7 + $0x120] sm:$0xff] }
 0x4ad   : > { %v3017_v13 = vsel %vm552_vm0, %v3003_v58, %v3004_v54  ;;  %v2907_v50 = vadd.f32 %v2906_v20, %v2848_v43  ;;  %v2971_v15 = vpop.f32.mrf.mxu1  ;;  %v3150_v43 = vld [vmem:[#allocation7 + $0x150] sm:$0xff] }
 0x4ae   : > { %v3031_v42 = vmax.f32 %v2989_v3, %v3017_v13  ;;  %3197 = vmatpush.msra.mxu3 %v3196_v48  ;;  %v3195_v3 = vld [vmem:[#allocation7 + $0x1f0] sm:$0xff]  ;;  %v3149_v13 = vld [vmem:[#allocation7 + $0x148] sm:$0xff]  ;;  %v3143_v48 = vld [vmem:[#allocation7 + $0x118] sm:$0xff] }
 0x4af   : > { %v2966_v36 = vadd.f32 %v2965_v4, %v2907_v50  ;;  %v2794_v25 = vpop.f32.mrf.mxu2  ;;  %v3153_v4 = vld [vmem:[#allocation7 + $0x168] sm:$0xff] }
 0x4b0   : > { %3045 = vst [vmem:[#allocation3 + $0x30] sm:$0xff] %v3031_v42  ;;  %v2795_v20 = vadd.f32 %v2794_v25, %v6073_v62  ;;  %3198 = vmatpush.msra.mxu3 %v3195_v3  ;;  %3158 = vmatpush.msra.mxu2 %v3153_v4  ;;  %v3190_v50 = vld [vmem:[#allocation7 + $0x1c8] sm:$0xff]  ;;  %v3189_v42 = vld [vmem:[#allocation7 + $0x1c0] sm:$0xff]  ;;  %v3142_v3 = vld [vmem:[#allocation7 + $0x110] sm:$0xff] }
 0x4b1   : > { %v2991_v45 = vmax.f32 %v2671_v37, %v2966_v36 }
 0x4b2   : > { %v2850_v46 = vpop.f32.mrf.mxu3  ;;  %3199 = vmatpush.msra.mxu3 %v3194_v19  ;;  %3159 = vmatpush.msra.mxu2 %v3152_v22  ;;  %v3141_v19 = vld [vmem:[#allocation7 + $0x108] sm:$0xff] }
 0x4b3   : > { %v3005_v55 = vrot.slane %v2991_v45, 1  ;;  %v2851_v9 = vadd.f32 %v2850_v46, %v2792_v21  ;;  %v3146_v21 = vld [vmem:[#allocation7 + $0x130] sm:$0xff] }
 0x4b4   : > { %3200 = vmatpush.msra.mxu3 %v3193_v26  ;;  %3160 = vmatpush.msra.mxu2 %v3151_v6 }
 0x4b5   : > { %v3016_v28 = vsel %vm552_vm0, %v3004_v54, %v3005_v55  ;;  %v2910_v11 = vadd.f32 %v2909_v47, %v2851_v9  ;;  %v2915_v54 = vpop.f32.mrf.mxu0  ;;  %v2974_v2 = vpop.f32.mrf.mxu1  ;;  %v3186_v9 = vld [vmem:[#allocation7 + $0x1a8] sm:$0xff] }
 0x4b6   : > { %v3032_v59 = vmax.f32 %v2990_v61, %v3016_v28  ;;  %v2677_v61 = vadd.f32 %v6604_v44, %v6106_v49  ;;  %3201 = vmatpush.msra.mxu3 %v3192_v24  ;;  %3161 = vmatpush.msra.mxu2 %v3150_v43 }
 0x4b7   : > { %v2969_v34 = vadd.f32 %v2968_v60, %v2910_v11  ;;  %v2797_v58 = vpop.f32.mrf.mxu2  ;;  %v3148_v60 = vld [vmem:[#allocation7 + $0x140] sm:$0xff] }
 0x4b8   : > { %3046 = vst [vmem:[#allocation3 + $0x38] sm:$0xff] %v3032_v59  ;;  %v2798_v30 = vadd.f32 %v2797_v58, %v6083_v39  ;;  %3202 = vmatpush.msra.mxu3 %v3191_v7  ;;  %3162 = vmatpush.msra.mxu2 %v3149_v13  ;;  %v6608_v58 = vld [vmem:[#allocation37_spill] sm:$0xff]  ;;  %v6610_v7 = vld [vmem:[#allocation42_spill] sm:$0xff] }
 0x4b9   : > { %v2992_v10 = vmax.f32 %v2674_v41, %v2969_v34 }
 0x4ba   : > { %v2853_v57 = vpop.f32.mrf.mxu3  ;;  %3203 = vmatpush.msra.mxu3 %v3190_v50  ;;  %3163 = vmatpush.msra.mxu2 %v3148_v60 }
 0x4bb   : > { %v3006_v8 = vrot.slane %v2992_v10, 1  ;;  %v2854_v23 = vadd.f32 %v2853_v57, %v2795_v20  ;;  %v3183_v20 = vld [vmem:[#allocation7 + $0x190] sm:$0xff] }
 0x4bc   : > { %3204 = vmatpush.msra.mxu3 %v3189_v42  ;;  %3164 = vmatpush.msra.mxu2 %v3147_v32 }
 0x4bd   : > { %v3015_v17 = vsel %vm552_vm0, %v3005_v55, %v3006_v8  ;;  %v2913_v35 = vadd.f32 %v2912_v63, %v2854_v23  ;;  %v3145_v55 = vld [vmem:[#allocation7 + $0x128] sm:$0xff]  ;;  %v2918_v11 = vpop.f32.mrf.mxu0  ;;  %v3185_v63 = vld [vmem:[#allocation7 + $0x1a0] sm:$0xff]  ;;  %v2977_v18 = vpop.f32.mrf.mxu1  ;;  %v6609_v23 = vld [vmem:[#allocation38_spill] sm:$0xff] }
 0x4be   : > { %v3033_v62 = vmax.f32 %v2991_v45, %v3015_v17  ;;  %v3187_v45 = vld [vmem:[#allocation7 + $0x1b0] sm:$0xff]  ;;  %3205 = vmatpush.msra.mxu3 %v3188_v51  ;;  %3165 = vmatpush.msra.mxu2 %v3146_v21  ;;  %v3238_v21 = vld [vmem:[%s6293_s8 + $0x70] sm:$0xff] }
 0x4bf   : > { %v2972_v16 = vadd.f32 %v2971_v15, %v2913_v35  ;;  %v2800_v36 = vpop.f32.mrf.mxu2  ;;  %v3140_v35 = vld [vmem:[#allocation7 + $0x100] sm:$0xff] }
 0x4c0   : > { %3047 = vst [vmem:[#allocation3 + $0x40] sm:$0xff] %v3033_v62  ;;  %v2801_v27 = vadd.f32 %v2800_v36, %v6606_v5  ;;  %3206 = vmatpush.msra.mxu3 %v3187_v45  ;;  %3166 = vmatpush.msra.mxu2 %v3145_v55  ;;  %v3181_v62 = vld [vmem:[#allocation7 + $0x180] sm:$0xff] }
 0x4c1   : > { %v2993_v47 = vmax.f32 %v2677_v61, %v2972_v16  ;;  %v3235_v5 = vld [vmem:[%s6293_s8 + $0x58] sm:$0xff] }
 0x4c2   : > { %v2856_v31 = vpop.f32.mrf.mxu3  ;;  %3207 = vmatpush.msra.mxu3 %v3186_v9  ;;  %3167 = vmatpush.msra.mxu2 %v3144_v29  ;;  %v3230_v29 = vld [vmem:[%s6293_s8 + $0x30] sm:$0xff] }
 0x4c3   : > { %v3007_v37 = vrot.slane %v2993_v47, 1  ;;  %v2857_v49 = vadd.f32 %v2856_v31, %v2798_v30  ;;  %v6611_v30 = vld [vmem:[#allocation41_spill] sm:$0xff] }
 0x4c4   : > { %3208 = vmatpush.msra.mxu3 %v3185_v63  ;;  %3168 = vmatpush.msra.mxu2 %v3143_v48  ;;  %v3229_v63 = vld [vmem:[%s6293_s8 + $0x28] sm:$0xff] }
 0x4c5   : > { %v3014_v25 = vsel %vm552_vm0, %v3006_v8, %v3007_v37  ;;  %v2916_v39 = vadd.f32 %v2915_v54, %v2857_v49  ;;  %v3182_v8 = vld [vmem:[#allocation7 + $0x188] sm:$0xff]  ;;  %v2921_v44 = vpop.f32.mrf.mxu0  ;;  %v2980_v54 = vpop.f32.mrf.mxu1  ;;  %v3225_v48 = vld [vmem:[%s6293_s8 + $0x8] sm:$0xff] }
 0x4c6   : > { %v3034_v0 = vmax.f32 %v2992_v10, %v3014_v25  ;;  %v6607_v10 = vld [vmem:[#allocation46_spill] sm:$0xff]  ;;  %3209 = vmatpush.msra.mxu3 %v3184_v12  ;;  %3169 = vmatpush.msra.mxu2 %v3142_v3  ;;  %v3434_v49 = vld [vmem:[%s6290_s5] ss:$0 sm:$0xff] }
 0x4c7   : > { %v2975_v46 = vadd.f32 %v2974_v2, %v2916_v39  ;;  %v2803_v56 = vpop.f32.mrf.mxu2  ;;  %v2683_v57 = vadd.f32 %v6608_v58, %v6607_v10  ;;  %v3224_v12 = vld [vmem:[%s6293_s8] sm:$0xff] }
 0x4c8   : > { %3048 = vst [vmem:[#allocation3 + $0x48] sm:$0xff] %v3034_v0  ;;  %v2804_v22 = vadd.f32 %v2803_v56, %v6609_v23  ;;  %3210 = vmatpush.msra.mxu3 %v3183_v20  ;;  %3170 = vmatpush.msra.mxu2 %v3141_v19  ;;  %v3435_v58 = vld [vmem:[%s6292_s7] ss:$0 sm:$0xff] }
 0x4c9   : > { %v2994_v28 = vmax.f32 %v2680_v33, %v2975_v46  ;;  %v3237_v33 = vld [vmem:[%s6293_s8 + $0x68] sm:$0xff]  ;;  %v3236_v46 = vld [vmem:[%s6293_s8 + $0x60] sm:$0xff] }
 0x4ca   : > { %v2859_v38 = vpop.f32.mrf.mxu3  ;;  %3211 = vmatpush.msra.mxu3 %v3182_v8  ;;  %3171 = vmatpush.msra.mxu2 %v3140_v35  ;;  %v3436_v23 = vld [vmem:[%s6294_s9] ss:$0 sm:$0xff] }
 0x4cb   : > { %v3008_v59 = vrot.slane %v2994_v28, 1  ;;  %v2860_v40 = vadd.f32 %v2859_v38, %v2801_v27  ;;  %v3234_v27 = vld [vmem:[%s6293_s8 + $0x50] sm:$0xff]  ;;  %v3231_v38 = vld [vmem:[%s6293_s8 + $0x38] sm:$0xff] }
 0x4cc   : > { %3212 = vmatpush.msra.mxu3 %v3181_v62 }
 0x4cd   : > { %v3013_v41 = vsel %vm552_vm0, %v3007_v37, %v3008_v59  ;;  %v2919_v34 = vadd.f32 %v2918_v11, %v2860_v40  ;;  %v3232_v11 = vld [vmem:[%s6293_s8 + $0x40] sm:$0xff]  ;;  %v3227_v40 = vld [vmem:[%s6293_s8 + $0x18] sm:$0xff] }
 0x4ce   : > { %v3035_v15 = vmax.f32 %v2993_v47, %v3013_v41  ;;  %v2686_v47 = vadd.f32 %v6611_v30, %v6610_v7  ;;  %v3240_v41 = vld [vmem:[%s489_s22] sm:$0xff]  ;;  %s493_s22 = scalar_lea.vmem %s6298_s13, %s3393_s18 }
 0x4cf   : > { %v2978_v4 = vadd.f32 %v2977_v18, %v2919_v34  ;;  %v3226_v18 = vld [vmem:[%s6293_s8 + $0x10] sm:$0xff]  ;;  %v3547_v34 = vmov 0  }
 0x4d0   : > { %3049 = vst [vmem:[#allocation3 + $0x50] sm:$0xff] %v3035_v15  ;;  %3431 = vset.pattern.permute.xlu0 %v3547_v34  ;;  %3432 = vset.pattern.permute.xlu1 %v3547_v34 }
 0x4d1   : > { %v2995_v26 = vmax.f32 %v2683_v57, %v2978_v4  ;;  %3244 = vperm.xlu0 %3431, %v3240_v41  }
 0x4d2   : > { %v2862_v17 = vpop.f32.mrf.mxu3 }
 0x4d3   : > { %v3009_v6 = vrot.slane %v2995_v26, 1  ;;  %v2863_v24 = vadd.f32 %v2862_v17, %v2804_v22  ;;  %v3437_v17 = vld [vmem:[%s6295_s10] ss:$0 sm:$0xff] }
 0x4d5   : > { %v3012_v61 = vsel %vm552_vm0, %v3008_v59, %v3009_v6  ;;  %v2922_v16 = vadd.f32 %v2921_v44, %v2863_v24  ;;  %v3228_v59 = vld [vmem:[%s6293_s8 + $0x20] sm:$0xff] }
 0x4d6   : > { %v3036_v43 = vmax.f32 %v2994_v28, %v3012_v61  ;;  %v3233_v28 = vld [vmem:[%s6293_s8 + $0x48] sm:$0xff]  ;;  %v3438_v24 = vld [vmem:[%s6296_s11] ss:$0 sm:$0xff] }
 0x4d7   : > { %v2981_v13 = vadd.f32 %v2980_v54, %v2922_v16  ;;  %v3439_v16 = vld [vmem:[#allocation4] ss:$0 sm:$0xff] }
 0x4d8   : > { %3050 = vst [vmem:[#allocation3 + $0x58] sm:$0xff] %v3036_v43 }
 0x4d9   : > { %v2996_v50 = vmax.f32 %v2686_v47, %v2981_v13 }
 0x4db   : > { %v3010_v2 = vrot.slane %v2996_v50, 1 }
 0x4dd   : > { %v3011_v31 = vsel %vm552_vm0, %v3009_v6, %v3010_v2  ;;  %v3024_v60 = vsel %vm552_vm0, %v3010_v2, %v2997_v14 }
 0x4de   : > { %v3037_v42 = vmax.f32 %v2995_v26, %v3011_v31  ;;  %v3038_v37 = vmax.f32 %v2996_v50, %v3024_v60 }
 0x4e0   : > { %3051 = vst [vmem:[#allocation3 + $0x60] sm:$0xff] %v3037_v42 }
 0x4e1   : > { %3052 = vst [vmem:[#allocation3 + $0x68] sm:$0xff] %v3038_v37 }
 0x4e7   : > { %v3077_v36 = vld [vmem:[#allocation3 + $0x2] ss:$14 sm:$0xff] }
 0x4e8   : > { %v3053_v32 = vld [vmem:[#allocation3] ss:$14 sm:$0xff]  ;;  %v3078_v51 = vadd.f32 %v3434_v49, %v3077_v36 }
 0x4e9   : > { %v3058_v25 = vadd.f32 %v3434_v49, %v3053_v32  ;;  %v3137_v52 = vld [vmem:[#allocation3 + $0x4] ss:$14 sm:$0xff] }
 0x4ea   : > { %v3079_v39 = vmax.f32 %v3078_v51, 0.0  ;;  %v3178_v14 = vld [vmem:[#allocation3 + $0x6] ss:$14 sm:$0xff]  ;;  %v3138_v45 = vadd.f32 %v3434_v49, %v3137_v52 }
 0x4eb   : > { %v3059_v0 = vmax.f32 %v3058_v25, 0.0  ;;  %v3179_v1 = vadd.f32 %v3434_v49, %v3178_v14 }
 0x4ec   : > { %3112 = vmatmul.f32.vlgmr.msrb.gmra.mxu2 %v3079_v39  ;;  %v3139_v55 = vmax.f32 %v3138_v45, 0.0 }
 0x4ed   : > { %3132 = vmatmul.f32.vlgmr.msrb.gmra.mxu3 %v3059_v0  ;;  %3251 = vmatpush.msrb.mxu2 %v3239_v53  ;;  %v3180_v9 = vmax.f32 %v3179_v1, 0.0 }
 0x4ef   : > { %3252 = vmatpush.msrb.mxu2 %v3238_v21 }
 0x4f1   : > { %3253 = vmatpush.msrb.mxu2 %v3237_v33 }
 0x4f3   : > { %3254 = vmatpush.msrb.mxu2 %v3236_v46 }
 0x4f4   : > { %3172 = vmatmul.f32.vlgmr.msra.gmra.mxu2 %v3139_v55 }
 0x4f5   : > { %3213 = vmatmul.f32.vlgmr.msra.gmra.mxu3 %v3180_v9  ;;  %3255 = vmatpush.msrb.mxu2 %v3235_v5 }
 0x4f7   : > { %3256 = vmatpush.msrb.mxu2 %v3234_v27 }
 0x4f9   : > { %3257 = vmatpush.msrb.mxu2 %v3233_v28 }
 0x4fb   : > { %3258 = vmatpush.msrb.mxu2 %v3232_v11 }
 0x4fd   : > { %3259 = vmatpush.msrb.mxu2 %v3231_v38 }
 0x4ff   : > { %3260 = vmatpush.msrb.mxu2 %v3230_v29 }
 0x501   : > { %3261 = vmatpush.msrb.mxu2 %v3229_v63 }
 0x503   : > { %3262 = vmatpush.msrb.mxu2 %v3228_v59 }
 0x505   : > { %3263 = vmatpush.msrb.mxu2 %v3227_v40 }
 0x507   : > { %3264 = vmatpush.msrb.mxu2 %v3226_v18 }
 0x509   : > { %3265 = vmatpush.msrb.mxu2 %v3225_v48 }
 0x50b   : > { %3266 = vmatpush.msrb.mxu2 %v3224_v12 }
 0x543   : > { %v3245_v22 = vpop.permute.xlu0 %3244 }
 0x544   : > { %v3250_v26 = vmul.f32 %v3436_v23, %v3245_v22 }
 0x56f   : > { %v3113_v15 = vpop.f32.mrf.mxu2 }
 0x570   : > { %v3133_v56 = vpop.f32.mrf.mxu3 }
 0x571   : > { %v3134_v3 = vadd.f32 %v3133_v56, %v3113_v15 }
 0x577   : > { %v3173_v20 = vpop.f32.mrf.mxu2 }
 0x578   : > { %v3176_v10 = vadd.f32 %v3173_v20, %v3134_v3  ;;  %v3214_v57 = vpop.f32.mrf.mxu3 }
 0x57a   : > { %v3217_v4 = vadd.f32 %v3214_v57, %v3176_v10 }
 0x57c   : > { %v3222_v19 = vadd.f32 %v3435_v58, %v3217_v4 }
 0x57e   : > { %v3223_v8 = vmax.f32 %v3222_v19, 0.0 }
 0x580   : > { %3267 = vmatmul.f32.vlgmr.msrb.gmra.mxu2 %v3223_v8 }
 0x603   : > { %v3268_v35 = vpop.f32.mrf.mxu2 }
 0x604   : > { %v3269_v62 = vadd.f32 %v3268_v35, %v3250_v26 }
 0x606   : > { %v3275_v6 = vadd.f32 %v3437_v17, %v3269_v62 }
 0x608   : > { %v3276_v44 = vmax.f32 %v3275_v6, 0.0 }
 0x60a   : > { %v3281_v61 = vmul.f32 %v3438_v24, %v3276_v44 }
 0x60c   : > { %3282 = vadd.xlane.f32.xlu0 %v3281_v61 }
 0x67f   : > { %v3283_v54 = vpop.xlane.xlu0 %3282 }
 0x680   : > { %v3288_v43 = vadd.f32 %v3439_v16, %v3283_v54 }
 0x682   : > { %v3289_v7 = vmax.f32 %v3288_v43, 0.0 }
 0x684   : > { %3292 = vperm.xlu1 %3432, %v3289_v7  }
 0x6f6   : > { %v3293_v30 = vpop.permute.xlu1 %3292 }
 0x6f7   : > { %3295 = vst [vmem:[%s493_s22] sm:$0xff] %v3293_v30 }
 0x6f8 PF: > { %s27_s27 = sadd.s32 1, %s3539_s27  }
 0x6f9   : > { %p24_p8 = scmp.ge.s32.totalorder %s27_s27, 4  }
 0x6fb   :  { %26 = sbr.rel (!%p24_p8) target bundleno = 5 (0x5), region = 130 }
 0x700   :  { %3315 = vsyncpa [#allocation6], 1 }
 0x701   :  { %3317 = vsyncpa [#allocation6 + $0x1], 1 }
 0x702   :  { %3318 = vsyncpa [#allocation8], 1 }

</bundles_post_ra>
